<compile_context>
chip_gen: v6e
topology: v6e:2x2x1
jax: 0.10.0
libtpu: 0.0.40
codegen_flags: <defaults>
</compile_context>

<pallas_src>
import functools
import math

import jax
import jax.numpy as jnp
from jax import lax
from jax.experimental import pallas as pl
from jax.experimental.pallas import tpu as pltpu


# ----------------------------- helpers ------------------------------------- #

def _layer_norm(v, w, b, eps=1e-5):
    # v: [..., D] (f32), w/b: [1, D] (f32) -- broadcasts over leading dims.
    mu = jnp.mean(v, axis=-1, keepdims=True)
    var = jnp.mean((v - mu) ** 2, axis=-1, keepdims=True)
    return (v - mu) * lax.rsqrt(var + eps) * w + b


def _gelu_exact(x):
    # nn.GELU() default (approximate='none') -> exact erf formulation.
    # (tanh approx would route to the EUP but deviates from the reference.)
    return 0.5 * x * (1.0 + lax.erf(x / math.sqrt(2.0)))


def _pick_tile(n, candidates):
    """Largest candidate tile that divides n; full n if n is small/odd-sized."""
    if n <= candidates[-1]:
        return n
    for c in candidates:
        if n % c == 0:
            return c
    return n


# ----------------------------- kernel -------------------------------------- #

def transformer_block_kernel(
    x_ref, ada_ref,
    n1_w_ref, n1_b_ref,
    n2_w_ref, n2_b_ref,
    w_qkv_ref, b_qkv_ref,
    qn_w_ref, qn_b_ref,
    kn_w_ref, kn_b_ref,
    w_out_ref, b_out_ref,
    w1_ref, b1_ref,
    w2_ref, b2_ref,
    o_ref,
    k_scr, v_scr, m_scr, l_scr, acc_scr, mlp_scr,
    *, num_heads, head_dim, seq_len, kv_tile, hidden_tile,
):
    Bt = x_ref.shape[0]
    N = seq_len
    H = num_heads
    hd = head_dim
    C = H * hd
    BH = Bt * H

    x = x_ref[...].astype(jnp.float32)        # [Bt, N, C]
    ada = ada_ref[...].astype(jnp.float32)    # [Bt, 6, C]  (precomputed adaLN)

    # modulation vectors, indexed on the sublane axis (no lane-offset slices)
    shift_a = ada[:, 0:1, :]
    scale_a = ada[:, 1:2, :]
    gate_a = ada[:, 2:3, :]
    shift_m = ada[:, 3:4, :]
    scale_m = ada[:, 4:5, :]
    gate_m = ada[:, 5:6, :]

    # ---- attention branch -------------------------------------------------- #
    xn = _layer_norm(x, n1_w_ref[...], n1_b_ref[...])                 # [Bt, N, C]
    xa2 = (xn * (1.0 + scale_a) + shift_a).reshape(Bt * N, C)
    xa2 = xa2.astype(jnp.bfloat16)                                    # cast once

    qkv = jnp.dot(xa2, w_qkv_ref[...],
                  preferred_element_type=jnp.float32) + b_qkv_ref[...]  # [Bt*N,3C] f32

    q = qkv[:, 0 * C:1 * C].reshape(Bt, N, H, hd)
    k = qkv[:, 1 * C:2 * C].reshape(Bt, N, H, hd)
    v = qkv[:, 2 * C:3 * C].reshape(Bt, N, H, hd).astype(jnp.bfloat16)  # bf16 at slice

    # fold (batch, head) into one batch axis for the batched attention matmuls.
    # TODO(synk): verify in the Mosaic dump whether these swapaxes+reshape pairs
    # materialize relayout copies; pltpu.einshape is the alternative if so.
    q = jnp.swapaxes(q, 1, 2).reshape(BH, N, hd)
    k = jnp.swapaxes(k, 1, 2).reshape(BH, N, hd)
    v = jnp.swapaxes(v, 1, 2).reshape(BH, N, hd)

    # vectorized q/k LayerNorm over head_dim (f32 stats), then downcast once.
    # 1/sqrt(hd) is pre-folded into qn_w/qn_b on the host.
    q = _layer_norm(q, qn_w_ref[...], qn_b_ref[...]).astype(jnp.bfloat16)
    k = _layer_norm(k, kn_w_ref[...], kn_b_ref[...]).astype(jnp.bfloat16)

    k_scr[...] = k
    v_scr[...] = v

    # online-softmax accumulators in VMEM scratch
    m_scr[...] = jnp.full((BH, N, 1), -jnp.inf, jnp.float32)
    l_scr[...] = jnp.zeros((BH, N, 1), jnp.float32)
    acc_scr[...] = jnp.zeros((BH, N, hd), jnp.float32)

    # causal mask pieces built in-kernel (no [N, N] HBM input).
    row = lax.broadcasted_iota(jnp.int32, (N, kv_tile), 0)
    col = lax.broadcasted_iota(jnp.int32, (N, kv_tile), 1)

    num_kv = N // kv_tile

    # TODO(synk): q tiling would additionally allow skipping kv tiles fully
    # above the diagonal; with a full-N q block no kv tile is fully masked.
    @pl.loop(0, num_kv)
    def _(t):
        start = pl.multiple_of(t * kv_tile, kv_tile)
        k_t = k_scr[:, pl.ds(start, kv_tile), :]          # [BH, kv, hd] bf16
        v_t = v_scr[:, pl.ds(start, kv_tile), :]

        s = jnp.einsum('bqd,bkd->bqk', q, k_t,
                       preferred_element_type=jnp.float32)  # [BH, N, kv] f32
        mask = jnp.where(row >= col + start,
                         jnp.float32(0.0), jnp.float32(-1e30))
        s = s + mask

        m_prev = m_scr[...]
        m_new = jnp.maximum(m_prev, jnp.max(s, axis=-1, keepdims=True))
        alpha = jnp.exp(m_prev - m_new)
        p = jnp.exp(s - m_new)

        l_scr[...] = alpha * l_scr[...] + jnp.sum(p, axis=-1, keepdims=True)
        acc_scr[...] = alpha * acc_scr[...] + jnp.einsum(
            'bqk,bkd->bqd', p.astype(jnp.bfloat16), v_t,
            preferred_element_type=jnp.float32)
        m_scr[...] = m_new

    # normalize AFTER the PV matmul (O(N*hd) instead of O(N*N) multiplies)
    attn = acc_scr[...] * pl.reciprocal(l_scr[...], approx=True)   # [BH, N, hd] f32
    attn = attn.reshape(Bt, H, N, hd)
    attn = jnp.swapaxes(attn, 1, 2).reshape(Bt * N, C).astype(jnp.bfloat16)

    attn_out = jnp.dot(attn, w_out_ref[...],
                       preferred_element_type=jnp.float32) + b_out_ref[...]
    attn_out = attn_out.reshape(Bt, N, C)

    x = x + gate_a * attn_out

    # ---- MLP branch (hidden dimension chunked) ------------------------------ #
    xn2 = _layer_norm(x, n2_w_ref[...], n2_b_ref[...])
    xm = (xn2 * (1.0 + scale_m) + shift_m).reshape(Bt * N, C).astype(jnp.bfloat16)

    hidden = w1_ref.shape[1]
    num_h = hidden // hidden_tile

    mlp_scr[...] = jnp.zeros((Bt * N, C), jnp.float32)

    @pl.loop(0, num_h)
    def _(t):
        h0 = pl.multiple_of(t * hidden_tile, hidden_tile)
        w1_t = w1_ref[:, pl.ds(h0, hidden_tile)]          # [C, T] bf16
        b1_t = b1_ref[:, pl.ds(h0, hidden_tile)]          # [1, T] f32
        h1 = jnp.dot(xm, w1_t, preferred_element_type=jnp.float32) + b1_t
        h1 = _gelu_exact(h1).astype(jnp.bfloat16)
        w2_t = w2_ref[pl.ds(h0, hidden_tile), :]          # [T, C] bf16
        mlp_scr[...] += jnp.dot(h1, w2_t, preferred_element_type=jnp.float32)

    h2 = (mlp_scr[...] + b2_ref[...]).reshape(Bt, N, C)

    o_ref[...] = (x + gate_m * h2).astype(o_ref.dtype)


# ----------------------------- wrapper -------------------------------------- #

def _vmem_limit_bytes():
    """Per-generation scoped-VMEM cap: leave headroom below physical VMEM."""
    MiB = 1024 * 1024
    try:
        phys = getattr(pltpu.get_tpu_info(), "vmem_capacity_bytes", 64 * MiB)
    except Exception:
        phys = 64 * MiB
    # v7x (64 MiB/core) -> 48 MiB; v5e/v6e (128 MiB) -> 104 MiB.
    return int(min(phys - 16 * MiB, 104 * MiB))


def adaptive_ar_transformer(x, cond, params, *, num_heads, batch_tile=None):
    """x: [B, N, C] f32, cond: [B, cond_dim] f32. Causal mask is built in-kernel."""
    B, N, C = x.shape
    head_dim = C // num_heads
    hidden = params["w1"].shape[1]

    # adaLN projection hoisted out of the kernel (M=1 GEMM): one batched XLA gemm.
    ada = jnp.dot(jax.nn.silu(cond).astype(params["w_ada"].dtype), params["w_ada"],
                  preferred_element_type=jnp.float32) + params["b_ada"]     # [B, 6C]
    ada = ada.reshape(B, 6, C).astype(jnp.float32)

    # Fold the 1/sqrt(head_dim) query scale into the q-norm affine params (host side).
    qscale = 1.0 / math.sqrt(head_dim)
    qn_w = (params["qn_w"] * qscale).astype(jnp.float32)
    qn_b = (params["qn_b"] * qscale).astype(jnp.float32)

    # Batch tile: want Bt*N >= 256 for the MXU, but keep >= 2 grid steps so the
    # two TensorCores on v7x both get work (harmless on 1-TC v5e/v6e).
    if batch_tile is None:
        target = max(1, pl.cdiv(256, N))
        if B >= 2:
            target = min(target, max(1, B // 2))
        batch_tile = max(d for d in range(1, B + 1) if B % d == 0 and d <= target)
    Bt = batch_tile
    assert B % Bt == 0, "batch_tile must divide B"
    grid = (B // Bt,)

    kv_tile = _pick_tile(N, (512, 256, 128))
    hidden_tile = _pick_tile(hidden, (1024, 512, 256))

    kernel = functools.partial(
        transformer_block_kernel,
        num_heads=num_heads, head_dim=head_dim, seq_len=N,
        kv_tile=kv_tile, hidden_tile=hidden_tile)

    scratch_shapes = [
        pltpu.VMEM((Bt * num_heads, N, head_dim), jnp.bfloat16),   # k (head-folded)
        pltpu.VMEM((Bt * num_heads, N, head_dim), jnp.bfloat16),   # v (head-folded)
        pltpu.VMEM((Bt * num_heads, N, 1), jnp.float32),           # running max
        pltpu.VMEM((Bt * num_heads, N, 1), jnp.float32),           # running sum
        pltpu.VMEM((Bt * num_heads, N, head_dim), jnp.float32),    # attn accumulator
        pltpu.VMEM((Bt * N, C), jnp.float32),                      # MLP accumulator
    ]

    operands = (
        x, ada,
        params["n1_w"], params["n1_b"],
        params["n2_w"], params["n2_b"],
        params["w_qkv"], params["b_qkv"],
        qn_w, qn_b,
        params["kn_w"], params["kn_b"],
        params["w_out"], params["b_out"],
        params["w1"], params["b1"],
        params["w2"], params["b2"],
    )

    def build(single_buffer_weights):
        def rep(a):
            # Parameter spec: full array, constant block index every grid step
            # -> not re-DMA'd across iterations.  Single buffering (Buffered(1))
            # halves resident weight VMEM since there is nothing to pipeline.
            nd = a.ndim
            kwargs = {}
            if single_buffer_weights:
                kwargs["pipeline_mode"] = pl.Buffered(1)
            return pl.BlockSpec(a.shape, lambda b: (0,) * nd, **kwargs)

        in_specs = [
            pl.BlockSpec((Bt, N, C), lambda b: (b, 0, 0)),      # x
            pl.BlockSpec((Bt, 6, C), lambda b: (b, 0, 0)),      # precomputed adaLN
            rep(params["n1_w"]), rep(params["n1_b"]),
            rep(params["n2_w"]), rep(params["n2_b"]),
            rep(params["w_qkv"]), rep(params["b_qkv"]),
            rep(qn_w), rep(qn_b),
            rep(params["kn_w"]), rep(params["kn_b"]),
            rep(params["w_out"]), rep(params["b_out"]),
            rep(params["w1"]), rep(params["b1"]),
            rep(params["w2"]), rep(params["b2"]),
        ]

        return pl.pallas_call(
            kernel,
            out_shape=jax.ShapeDtypeStruct((B, N, C), jnp.float32),
            grid=grid,
            in_specs=in_specs,
            out_specs=pl.BlockSpec((Bt, N, C), lambda b: (b, 0, 0)),
            scratch_shapes=scratch_shapes,
            compiler_params=pltpu.CompilerParams(
                dimension_semantics=("parallel",),
                vmem_limit_bytes=_vmem_limit_bytes(),
            ),
        )

    try:
        return build(True)(*operands)
    except Exception:
        # TODO(synk): pl.Buffered(1) (single-buffered resident weights) is not
        # accepted by every JAX version; fall back to default double-buffering.
        return build(False)(*operands)


# ----------------------------- setup ---------------------------------------- #

def init_params(key, embed_dim, cond_dim, num_heads, mlp_ratio=4.0):
    C = embed_dim
    hd = C // num_heads
    hidden = int(C * mlp_ratio)
    keys = jax.random.split(key, 8)

    def w(k, shape, scale=0.02, dtype=jnp.bfloat16):
        return (scale * jax.random.normal(k, shape)).astype(dtype)

    # Matmul weights pre-transposed to [in, out] and stored bf16;
    # LayerNorm params and biases stay f32.
    return {
        # adaLN: Linear(cond_dim, 6C)  (applied in the wrapper)
        "w_ada": w(keys[0], (cond_dim, 6 * C)),
        "b_ada": jnp.zeros((1, 6 * C), jnp.float32),
        # LayerNorms
        "n1_w": jnp.ones((1, C), jnp.float32), "n1_b": jnp.zeros((1, C), jnp.float32),
        "n2_w": jnp.ones((1, C), jnp.float32), "n2_b": jnp.zeros((1, C), jnp.float32),
        "qn_w": jnp.ones((1, hd), jnp.float32), "qn_b": jnp.zeros((1, hd), jnp.float32),
        "kn_w": jnp.ones((1, hd), jnp.float32), "kn_b": jnp.zeros((1, hd), jnp.float32),
        # attention projections
        "w_qkv": w(keys[1], (C, 3 * C)),
        "b_qkv": w(keys[2], (1, 3 * C), scale=0.01, dtype=jnp.float32),
        "w_out": w(keys[3], (C, C)),
        "b_out": w(keys[4], (1, C), scale=0.01, dtype=jnp.float32),
        # MLP
        "w1": w(keys[5], (C, hidden)),
        "b1": w(keys[6], (1, hidden), scale=0.01, dtype=jnp.float32),
        "w2": w(keys[7], (hidden, C)),
        "b2": jnp.zeros((1, C), jnp.float32),
    }


if __name__ == "__main__":
    B, N, C = 2, 8, 32
    cond_dim = 16
    num_heads = 4

    key = jax.random.PRNGKey(0)
    kx, kc, kp = jax.random.split(key, 3)

    x = jax.random.normal(kx, (B, N, C), dtype=jnp.float32)
    cond = jax.random.normal(kc, (B, cond_dim), dtype=jnp.float32)
    params = init_params(kp, C, cond_dim, num_heads)

    # TODO(synk): KV caching (use_cache path), dropout (p=0 here) and arbitrary
    # (non-causal) attn_mask are inference/training extras not exercised here.

    out = adaptive_ar_transformer(x, cond, params, num_heads=num_heads)
    jax.block_until_ready(out)
    assert out.shape == (B, N, C)
    assert bool(jnp.all(jnp.isfinite(out)))
    print("KERNEL_OK")
</pallas_src>

<mosaic_0001>
module attributes {stable_mosaic.version = 11 : i64} {
  func.func @transformer_block_kernel(%arg0: i32, %arg1: memref<1x8x32xf32, #tpu.memory_space<vmem>>, %arg2: memref<1x6x32xf32, #tpu.memory_space<vmem>>, %arg3: memref<1x32xf32, #tpu.memory_space<vmem>>, %arg4: memref<1x32xf32, #tpu.memory_space<vmem>>, %arg5: memref<1x32xf32, #tpu.memory_space<vmem>>, %arg6: memref<1x32xf32, #tpu.memory_space<vmem>>, %arg7: memref<32x96xbf16, #tpu.memory_space<vmem>>, %arg8: memref<1x96xf32, #tpu.memory_space<vmem>>, %arg9: memref<1x8xf32, #tpu.memory_space<vmem>>, %arg10: memref<1x8xf32, #tpu.memory_space<vmem>>, %arg11: memref<1x8xf32, #tpu.memory_space<vmem>>, %arg12: memref<1x8xf32, #tpu.memory_space<vmem>>, %arg13: memref<32x32xbf16, #tpu.memory_space<vmem>>, %arg14: memref<1x32xf32, #tpu.memory_space<vmem>>, %arg15: memref<32x128xbf16, #tpu.memory_space<vmem>>, %arg16: memref<1x128xf32, #tpu.memory_space<vmem>>, %arg17: memref<128x32xbf16, #tpu.memory_space<vmem>>, %arg18: memref<1x32xf32, #tpu.memory_space<vmem>>, %arg19: memref<1x8x32xf32, #tpu.memory_space<vmem>>, %arg20: memref<4x8x8xbf16, #tpu.memory_space<vmem>>, %arg21: memref<4x8x8xbf16, #tpu.memory_space<vmem>>, %arg22: memref<4x8x1xf32, #tpu.memory_space<vmem>>, %arg23: memref<4x8x1xf32, #tpu.memory_space<vmem>>, %arg24: memref<4x8x8xf32, #tpu.memory_space<vmem>>, %arg25: memref<8x32xf32, #tpu.memory_space<vmem>>) attributes {dimension_semantics = [#tpu.dimension_semantics<parallel>], iteration_bounds = array<i64: 2>, scalar_prefetch = 0 : i64, scratch_operands = 6 : i64, tpu.core_type = #tpu.core_type<tc>, window_params = [{transform_indices = @transform_0, window_bounds = array<i64: 1, 8, 32>}, {transform_indices = @transform_1, window_bounds = array<i64: 1, 6, 32>}, {pipeline_mode = #tpu.pipeline_mode<synchronous>, transform_indices = @transform_2, window_bounds = array<i64: 1, 32>}, {pipeline_mode = #tpu.pipeline_mode<synchronous>, transform_indices = @transform_3, window_bounds = array<i64: 1, 32>}, {pipeline_mode = #tpu.pipeline_mode<synchronous>, transform_indices = @transform_4, window_bounds = array<i64: 1, 32>}, {pipeline_mode = #tpu.pipeline_mode<synchronous>, transform_indices = @transform_5, window_bounds = array<i64: 1, 32>}, {pipeline_mode = #tpu.pipeline_mode<synchronous>, transform_indices = @transform_6, window_bounds = array<i64: 32, 96>}, {pipeline_mode = #tpu.pipeline_mode<synchronous>, transform_indices = @transform_7, window_bounds = array<i64: 1, 96>}, {pipeline_mode = #tpu.pipeline_mode<synchronous>, transform_indices = @transform_8, window_bounds = array<i64: 1, 8>}, {pipeline_mode = #tpu.pipeline_mode<synchronous>, transform_indices = @transform_9, window_bounds = array<i64: 1, 8>}, {pipeline_mode = #tpu.pipeline_mode<synchronous>, transform_indices = @transform_10, window_bounds = array<i64: 1, 8>}, {pipeline_mode = #tpu.pipeline_mode<synchronous>, transform_indices = @transform_11, window_bounds = array<i64: 1, 8>}, {pipeline_mode = #tpu.pipeline_mode<synchronous>, transform_indices = @transform_12, window_bounds = array<i64: 32, 32>}, {pipeline_mode = #tpu.pipeline_mode<synchronous>, transform_indices = @transform_13, window_bounds = array<i64: 1, 32>}, {pipeline_mode = #tpu.pipeline_mode<synchronous>, transform_indices = @transform_14, window_bounds = array<i64: 32, 128>}, {pipeline_mode = #tpu.pipeline_mode<synchronous>, transform_indices = @transform_15, window_bounds = array<i64: 1, 128>}, {pipeline_mode = #tpu.pipeline_mode<synchronous>, transform_indices = @transform_16, window_bounds = array<i64: 128, 32>}, {pipeline_mode = #tpu.pipeline_mode<synchronous>, transform_indices = @transform_17, window_bounds = array<i64: 1, 32>}, {transform_indices = @transform_18, window_bounds = array<i64: 1, 8, 32>}]} {
    %c0 = arith.constant 0 : index
    %c0_0 = arith.constant 0 : index
    %c0_1 = arith.constant 0 : index
    %0 = vector.load %arg1[%c0, %c0_0, %c0_1] : memref<1x8x32xf32, #tpu.memory_space<vmem>>, vector<1x8x32xf32>
    %c0_2 = arith.constant 0 : index
    %c0_3 = arith.constant 0 : index
    %c0_4 = arith.constant 0 : index
    %1 = vector.load %arg2[%c0_2, %c0_3, %c0_4] : memref<1x6x32xf32, #tpu.memory_space<vmem>>, vector<1x6x32xf32>
    %2 = vector.extract_strided_slice %1 {offsets = [0, 0, 0], sizes = [1, 1, 32], strides = [1, 1, 1]} : vector<1x6x32xf32> to vector<1x1x32xf32>
    %3 = vector.extract_strided_slice %1 {offsets = [0, 1, 0], sizes = [1, 1, 32], strides = [1, 1, 1]} : vector<1x6x32xf32> to vector<1x1x32xf32>
    %4 = vector.extract_strided_slice %1 {offsets = [0, 2, 0], sizes = [1, 1, 32], strides = [1, 1, 1]} : vector<1x6x32xf32> to vector<1x1x32xf32>
    %5 = vector.extract_strided_slice %1 {offsets = [0, 3, 0], sizes = [1, 1, 32], strides = [1, 1, 1]} : vector<1x6x32xf32> to vector<1x1x32xf32>
    %6 = vector.extract_strided_slice %1 {offsets = [0, 4, 0], sizes = [1, 1, 32], strides = [1, 1, 1]} : vector<1x6x32xf32> to vector<1x1x32xf32>
    %7 = vector.extract_strided_slice %1 {offsets = [0, 5, 0], sizes = [1, 1, 32], strides = [1, 1, 1]} : vector<1x6x32xf32> to vector<1x1x32xf32>
    %c0_5 = arith.constant 0 : index
    %c0_6 = arith.constant 0 : index
    %8 = vector.load %arg3[%c0_5, %c0_6] : memref<1x32xf32, #tpu.memory_space<vmem>>, vector<1x32xf32>
    %c0_7 = arith.constant 0 : index
    %c0_8 = arith.constant 0 : index
    %9 = vector.load %arg4[%c0_7, %c0_8] : memref<1x32xf32, #tpu.memory_space<vmem>>, vector<1x32xf32>
    %cst = arith.constant dense<0.000000e+00> : vector<1x8xf32>
    %10 = vector.multi_reduction <add>, %0, %cst [2] : vector<1x8x32xf32> to vector<1x8xf32>
    %11 = vector.shape_cast %10 : vector<1x8xf32> to vector<1x8x1xf32>
    %cst_9 = arith.constant 3.200000e+01 : f32
    %12 = vector.broadcast %cst_9 : f32 to vector<1x8x1xf32>
    %13 = arith.divf %11, %12 : vector<1x8x1xf32>
    %14 = vector.broadcast %13 : vector<1x8x1xf32> to vector<1x8x32xf32>
    %15 = arith.subf %0, %14 : vector<1x8x32xf32>
    %16 = arith.mulf %15, %15 : vector<1x8x32xf32>
    %cst_10 = arith.constant dense<0.000000e+00> : vector<1x8xf32>
    %17 = vector.multi_reduction <add>, %16, %cst_10 [2] : vector<1x8x32xf32> to vector<1x8xf32>
    %18 = vector.shape_cast %17 : vector<1x8xf32> to vector<1x8x1xf32>
    %cst_11 = arith.constant 3.200000e+01 : f32
    %19 = vector.broadcast %cst_11 : f32 to vector<1x8x1xf32>
    %20 = arith.divf %18, %19 : vector<1x8x1xf32>
    %21 = vector.broadcast %13 : vector<1x8x1xf32> to vector<1x8x32xf32>
    %22 = arith.subf %0, %21 : vector<1x8x32xf32>
    %cst_12 = arith.constant 9.99999974E-6 : f32
    %23 = vector.broadcast %cst_12 : f32 to vector<1x8x1xf32>
    %24 = arith.addf %20, %23 : vector<1x8x1xf32>
    %25 = math.rsqrt %24 : vector<1x8x1xf32>
    %26 = vector.broadcast %25 : vector<1x8x1xf32> to vector<1x8x32xf32>
    %27 = arith.mulf %22, %26 : vector<1x8x32xf32>
    %28 = vector.shape_cast %8 : vector<1x32xf32> to vector<1x1x32xf32>
    %29 = vector.broadcast %28 : vector<1x1x32xf32> to vector<1x8x32xf32>
    %30 = arith.mulf %27, %29 : vector<1x8x32xf32>
    %31 = vector.shape_cast %9 : vector<1x32xf32> to vector<1x1x32xf32>
    %32 = vector.broadcast %31 : vector<1x1x32xf32> to vector<1x8x32xf32>
    %33 = arith.addf %30, %32 : vector<1x8x32xf32>
    %cst_13 = arith.constant 1.000000e+00 : f32
    %34 = vector.broadcast %cst_13 : f32 to vector<1x1x32xf32>
    %35 = arith.addf %34, %3 : vector<1x1x32xf32>
    %36 = vector.broadcast %35 : vector<1x1x32xf32> to vector<1x8x32xf32>
    %37 = arith.mulf %33, %36 : vector<1x8x32xf32>
    %38 = vector.broadcast %2 : vector<1x1x32xf32> to vector<1x8x32xf32>
    %39 = arith.addf %37, %38 : vector<1x8x32xf32>
    %40 = vector.shape_cast %39 : vector<1x8x32xf32> to vector<8x32xf32>
    %41 = arith.truncf %40 : vector<8x32xf32> to vector<8x32xbf16>
    %c0_14 = arith.constant 0 : index
    %c0_15 = arith.constant 0 : index
    %42 = vector.load %arg7[%c0_14, %c0_15] : memref<32x96xbf16, #tpu.memory_space<vmem>>, vector<32x96xbf16>
    %cst_16 = arith.constant dense<0.000000e+00> : vector<8x96xf32>
    %43 = tpu.matmul %41, %42, %cst_16 {dimension_numbers = #tpu.dot_dimension_numbers<[1], [0], [0], [1], [0, 0, 1, 1], [], []>} : vector<8x32xbf16>, vector<32x96xbf16>, vector<8x96xf32> -> vector<8x96xf32>
    %c0_17 = arith.constant 0 : index
    %c0_18 = arith.constant 0 : index
    %44 = vector.load %arg8[%c0_17, %c0_18] : memref<1x96xf32, #tpu.memory_space<vmem>>, vector<1x96xf32>
    %45 = vector.broadcast %44 : vector<1x96xf32> to vector<8x96xf32>
    %46 = arith.addf %43, %45 : vector<8x96xf32>
    %47 = vector.extract_strided_slice %46 {offsets = [0, 0], sizes = [8, 32], strides = [1, 1]} : vector<8x96xf32> to vector<8x32xf32>
    %48 = vector.shape_cast %47 : vector<8x32xf32> to vector<1x8x4x8xf32>
    %49 = vector.extract_strided_slice %46 {offsets = [0, 32], sizes = [8, 32], strides = [1, 1]} : vector<8x96xf32> to vector<8x32xf32>
    %50 = vector.shape_cast %49 : vector<8x32xf32> to vector<1x8x4x8xf32>
    %51 = vector.extract_strided_slice %46 {offsets = [0, 64], sizes = [8, 32], strides = [1, 1]} : vector<8x96xf32> to vector<8x32xf32>
    %52 = vector.shape_cast %51 : vector<8x32xf32> to vector<1x8x4x8xf32>
    %53 = arith.truncf %52 : vector<1x8x4x8xf32> to vector<1x8x4x8xbf16>
    %54 = tpu.transpose %48, [0, 2, 1, 3] : vector<1x8x4x8xf32> -> vector<1x4x8x8xf32>
    %55 = vector.shape_cast %54 : vector<1x4x8x8xf32> to vector<4x8x8xf32>
    %56 = tpu.transpose %50, [0, 2, 1, 3] : vector<1x8x4x8xf32> -> vector<1x4x8x8xf32>
    %57 = vector.shape_cast %56 : vector<1x4x8x8xf32> to vector<4x8x8xf32>
    %58 = tpu.transpose %53, [0, 2, 1, 3] : vector<1x8x4x8xbf16> -> vector<1x4x8x8xbf16>
    %59 = vector.shape_cast %58 : vector<1x4x8x8xbf16> to vector<4x8x8xbf16>
    %c0_19 = arith.constant 0 : index
    %c0_20 = arith.constant 0 : index
    %60 = vector.load %arg9[%c0_19, %c0_20] : memref<1x8xf32, #tpu.memory_space<vmem>>, vector<1x8xf32>
    %c0_21 = arith.constant 0 : index
    %c0_22 = arith.constant 0 : index
    %61 = vector.load %arg10[%c0_21, %c0_22] : memref<1x8xf32, #tpu.memory_space<vmem>>, vector<1x8xf32>
    %cst_23 = arith.constant dense<0.000000e+00> : vector<4x8xf32>
    %62 = vector.multi_reduction <add>, %55, %cst_23 [2] : vector<4x8x8xf32> to vector<4x8xf32>
    %63 = vector.shape_cast %62 : vector<4x8xf32> to vector<4x8x1xf32>
    %cst_24 = arith.constant 8.000000e+00 : f32
    %64 = vector.broadcast %cst_24 : f32 to vector<4x8x1xf32>
    %65 = arith.divf %63, %64 : vector<4x8x1xf32>
    %66 = vector.broadcast %65 : vector<4x8x1xf32> to vector<4x8x8xf32>
    %67 = arith.subf %55, %66 : vector<4x8x8xf32>
    %68 = arith.mulf %67, %67 : vector<4x8x8xf32>
    %cst_25 = arith.constant dense<0.000000e+00> : vector<4x8xf32>
    %69 = vector.multi_reduction <add>, %68, %cst_25 [2] : vector<4x8x8xf32> to vector<4x8xf32>
    %70 = vector.shape_cast %69 : vector<4x8xf32> to vector<4x8x1xf32>
    %cst_26 = arith.constant 8.000000e+00 : f32
    %71 = vector.broadcast %cst_26 : f32 to vector<4x8x1xf32>
    %72 = arith.divf %70, %71 : vector<4x8x1xf32>
    %73 = vector.broadcast %65 : vector<4x8x1xf32> to vector<4x8x8xf32>
    %74 = arith.subf %55, %73 : vector<4x8x8xf32>
    %cst_27 = arith.constant 9.99999974E-6 : f32
    %75 = vector.broadcast %cst_27 : f32 to vector<4x8x1xf32>
    %76 = arith.addf %72, %75 : vector<4x8x1xf32>
    %77 = math.rsqrt %76 : vector<4x8x1xf32>
    %78 = vector.broadcast %77 : vector<4x8x1xf32> to vector<4x8x8xf32>
    %79 = arith.mulf %74, %78 : vector<4x8x8xf32>
    %80 = vector.shape_cast %60 : vector<1x8xf32> to vector<1x1x8xf32>
    %81 = vector.broadcast %80 : vector<1x1x8xf32> to vector<4x8x8xf32>
    %82 = arith.mulf %79, %81 : vector<4x8x8xf32>
    %83 = vector.shape_cast %61 : vector<1x8xf32> to vector<1x1x8xf32>
    %84 = vector.broadcast %83 : vector<1x1x8xf32> to vector<4x8x8xf32>
    %85 = arith.addf %82, %84 : vector<4x8x8xf32>
    %86 = arith.truncf %85 : vector<4x8x8xf32> to vector<4x8x8xbf16>
    %c0_28 = arith.constant 0 : index
    %c0_29 = arith.constant 0 : index
    %87 = vector.load %arg11[%c0_28, %c0_29] : memref<1x8xf32, #tpu.memory_space<vmem>>, vector<1x8xf32>
    %c0_30 = arith.constant 0 : index
    %c0_31 = arith.constant 0 : index
    %88 = vector.load %arg12[%c0_30, %c0_31] : memref<1x8xf32, #tpu.memory_space<vmem>>, vector<1x8xf32>
    %cst_32 = arith.constant dense<0.000000e+00> : vector<4x8xf32>
    %89 = vector.multi_reduction <add>, %57, %cst_32 [2] : vector<4x8x8xf32> to vector<4x8xf32>
    %90 = vector.shape_cast %89 : vector<4x8xf32> to vector<4x8x1xf32>
    %cst_33 = arith.constant 8.000000e+00 : f32
    %91 = vector.broadcast %cst_33 : f32 to vector<4x8x1xf32>
    %92 = arith.divf %90, %91 : vector<4x8x1xf32>
    %93 = vector.broadcast %92 : vector<4x8x1xf32> to vector<4x8x8xf32>
    %94 = arith.subf %57, %93 : vector<4x8x8xf32>
    %95 = arith.mulf %94, %94 : vector<4x8x8xf32>
    %cst_34 = arith.constant dense<0.000000e+00> : vector<4x8xf32>
    %96 = vector.multi_reduction <add>, %95, %cst_34 [2] : vector<4x8x8xf32> to vector<4x8xf32>
    %97 = vector.shape_cast %96 : vector<4x8xf32> to vector<4x8x1xf32>
    %cst_35 = arith.constant 8.000000e+00 : f32
    %98 = vector.broadcast %cst_35 : f32 to vector<4x8x1xf32>
    %99 = arith.divf %97, %98 : vector<4x8x1xf32>
    %100 = vector.broadcast %92 : vector<4x8x1xf32> to vector<4x8x8xf32>
    %101 = arith.subf %57, %100 : vector<4x8x8xf32>
    %cst_36 = arith.constant 9.99999974E-6 : f32
    %102 = vector.broadcast %cst_36 : f32 to vector<4x8x1xf32>
    %103 = arith.addf %99, %102 : vector<4x8x1xf32>
    %104 = math.rsqrt %103 : vector<4x8x1xf32>
    %105 = vector.broadcast %104 : vector<4x8x1xf32> to vector<4x8x8xf32>
    %106 = arith.mulf %101, %105 : vector<4x8x8xf32>
    %107 = vector.shape_cast %87 : vector<1x8xf32> to vector<1x1x8xf32>
    %108 = vector.broadcast %107 : vector<1x1x8xf32> to vector<4x8x8xf32>
    %109 = arith.mulf %106, %108 : vector<4x8x8xf32>
    %110 = vector.shape_cast %88 : vector<1x8xf32> to vector<1x1x8xf32>
    %111 = vector.broadcast %110 : vector<1x1x8xf32> to vector<4x8x8xf32>
    %112 = arith.addf %109, %111 : vector<4x8x8xf32>
    %113 = arith.truncf %112 : vector<4x8x8xf32> to vector<4x8x8xbf16>
    %c0_37 = arith.constant 0 : index
    %c0_38 = arith.constant 0 : index
    %c0_39 = arith.constant 0 : index
    %114 = vector.load %arg20[%c0_37, %c0_38, %c0_39] : memref<4x8x8xbf16, #tpu.memory_space<vmem>>, vector<4x8x8xbf16>
    tpu.vector_store %arg20[%c0_37, %c0_38, %c0_39], %113 {strides = array<i32>} : memref<4x8x8xbf16, #tpu.memory_space<vmem>>, vector<4x8x8xbf16>,
    %c0_40 = arith.constant 0 : index
    %c0_41 = arith.constant 0 : index
    %c0_42 = arith.constant 0 : index
    %115 = vector.load %arg21[%c0_40, %c0_41, %c0_42] : memref<4x8x8xbf16, #tpu.memory_space<vmem>>, vector<4x8x8xbf16>
    tpu.vector_store %arg21[%c0_40, %c0_41, %c0_42], %59 {strides = array<i32>} : memref<4x8x8xbf16, #tpu.memory_space<vmem>>, vector<4x8x8xbf16>,
    %cst_43 = arith.constant 0xFF800000 : f32
    %116 = vector.broadcast %cst_43 : f32 to vector<4x8x1xf32>
    %c0_44 = arith.constant 0 : index
    %c0_45 = arith.constant 0 : index
    %c0_46 = arith.constant 0 : index
    %117 = vector.load %arg22[%c0_44, %c0_45, %c0_46] : memref<4x8x1xf32, #tpu.memory_space<vmem>>, vector<4x8x1xf32>
    tpu.vector_store %arg22[%c0_44, %c0_45, %c0_46], %116 {strides = array<i32>} : memref<4x8x1xf32, #tpu.memory_space<vmem>>, vector<4x8x1xf32>,
    %cst_47 = arith.constant 0.000000e+00 : f32
    %118 = vector.broadcast %cst_47 : f32 to vector<4x8x1xf32>
    %c0_48 = arith.constant 0 : index
    %c0_49 = arith.constant 0 : index
    %c0_50 = arith.constant 0 : index
    %119 = vector.load %arg23[%c0_48, %c0_49, %c0_50] : memref<4x8x1xf32, #tpu.memory_space<vmem>>, vector<4x8x1xf32>
    tpu.vector_store %arg23[%c0_48, %c0_49, %c0_50], %118 {strides = array<i32>} : memref<4x8x1xf32, #tpu.memory_space<vmem>>, vector<4x8x1xf32>,
    %cst_51 = arith.constant 0.000000e+00 : f32
    %120 = vector.broadcast %cst_51 : f32 to vector<4x8x8xf32>
    %c0_52 = arith.constant 0 : index
    %c0_53 = arith.constant 0 : index
    %c0_54 = arith.constant 0 : index
    %121 = vector.load %arg24[%c0_52, %c0_53, %c0_54] : memref<4x8x8xf32, #tpu.memory_space<vmem>>, vector<4x8x8xf32>
    tpu.vector_store %arg24[%c0_52, %c0_53, %c0_54], %120 {strides = array<i32>} : memref<4x8x8xf32, #tpu.memory_space<vmem>>, vector<4x8x8xf32>,
    %122 = tpu.iota {dimensions = array<i32: 0>} : vector<8x8xi32>
    %123 = tpu.iota {dimensions = array<i32: 1>} : vector<8x8xi32>
    %c0_i32 = arith.constant 0 : i32
    %c1_i32 = arith.constant 1 : i32
    %124 = arith.muli %c0_i32, %c1_i32 : i32
    %c0_i32_55 = arith.constant 0 : i32
    %125 = arith.addi %c0_i32_55, %124 : i32
    %c8_i32 = arith.constant 8 : i32
    %126 = arith.muli %125, %c8_i32 : i32
    %127 = tpu.assume_multiple %126, 8 : i32
    %c0_56 = arith.constant 0 : index
    %128 = arith.index_cast %127 : i32 to index
    %c0_57 = arith.constant 0 : index
    %129 = vector.load %arg20[%c0_56, %128, %c0_57] : memref<4x8x8xbf16, #tpu.memory_space<vmem>>, vector<4x8x8xbf16>
    %c0_58 = arith.constant 0 : index
    %130 = arith.index_cast %127 : i32 to index
    %c0_59 = arith.constant 0 : index
    %131 = vector.load %arg21[%c0_58, %130, %c0_59] : memref<4x8x8xbf16, #tpu.memory_space<vmem>>, vector<4x8x8xbf16>
    "tpu.trace_start"() <{level = 10 : i32, message = "bqd,bkd->bqk"}> : () -> ()
    %cst_60 = arith.constant dense<0.000000e+00> : vector<4x8x8xf32>
    %132 = tpu.matmul %86, %129, %cst_60 {dimension_numbers = #tpu.dot_dimension_numbers<[2], [2], [1], [1], [0, 0, 0, 1, 1, 1], [0], [0]>} : vector<4x8x8xbf16>, vector<4x8x8xbf16>, vector<4x8x8xf32> -> vector<4x8x8xf32>
    "tpu.trace_stop"() : () -> ()
    %133 = vector.broadcast %127 : i32 to vector<8x8xi32>
    %134 = arith.addi %123, %133 : vector<8x8xi32>
    %135 = arith.cmpi sge, %122, %134 : vector<8x8xi32>
    %cst_61 = arith.constant 0.000000e+00 : f32
    %cst_62 = arith.constant -1.000000e+30 : f32
    %136 = vector.broadcast %cst_61 : f32 to vector<8x8xf32>
    %137 = vector.broadcast %cst_62 : f32 to vector<8x8xf32>
    %138 = arith.select %135, %136, %137 : vector<8x8xi1>, vector<8x8xf32>
    %139 = vector.shape_cast %138 : vector<8x8xf32> to vector<1x8x8xf32>
    %140 = vector.broadcast %139 : vector<1x8x8xf32> to vector<4x8x8xf32>
    %141 = arith.addf %132, %140 : vector<4x8x8xf32>
    %c0_63 = arith.constant 0 : index
    %c0_64 = arith.constant 0 : index
    %c0_65 = arith.constant 0 : index
    %142 = vector.load %arg22[%c0_63, %c0_64, %c0_65] : memref<4x8x1xf32, #tpu.memory_space<vmem>>, vector<4x8x1xf32>
    %cst_66 = arith.constant dense<0xFF800000> : vector<4x8xf32>
    %143 = vector.multi_reduction <maximumf>, %141, %cst_66 [2] : vector<4x8x8xf32> to vector<4x8xf32>
    %144 = vector.shape_cast %143 : vector<4x8xf32> to vector<4x8x1xf32>
    %145 = arith.maximumf %142, %144 : vector<4x8x1xf32>
    %146 = arith.subf %142, %145 : vector<4x8x1xf32>
    %147 = math.exp %146 : vector<4x8x1xf32>
    %148 = vector.broadcast %145 : vector<4x8x1xf32> to vector<4x8x8xf32>
    %149 = arith.subf %141, %148 : vector<4x8x8xf32>
    %150 = math.exp %149 : vector<4x8x8xf32>
    %c0_67 = arith.constant 0 : index
    %c0_68 = arith.constant 0 : index
    %c0_69 = arith.constant 0 : index
    %151 = vector.load %arg23[%c0_67, %c0_68, %c0_69] : memref<4x8x1xf32, #tpu.memory_space<vmem>>, vector<4x8x1xf32>
    %152 = arith.mulf %147, %151 : vector<4x8x1xf32>
    %cst_70 = arith.constant dense<0.000000e+00> : vector<4x8xf32>
    %153 = vector.multi_reduction <add>, %150, %cst_70 [2] : vector<4x8x8xf32> to vector<4x8xf32>
    %154 = vector.shape_cast %153 : vector<4x8xf32> to vector<4x8x1xf32>
    %155 = arith.addf %152, %154 : vector<4x8x1xf32>
    %c0_71 = arith.constant 0 : index
    %c0_72 = arith.constant 0 : index
    %c0_73 = arith.constant 0 : index
    %156 = vector.load %arg23[%c0_71, %c0_72, %c0_73] : memref<4x8x1xf32, #tpu.memory_space<vmem>>, vector<4x8x1xf32>
    tpu.vector_store %arg23[%c0_71, %c0_72, %c0_73], %155 {strides = array<i32>} : memref<4x8x1xf32, #tpu.memory_space<vmem>>, vector<4x8x1xf32>,
    %c0_74 = arith.constant 0 : index
    %c0_75 = arith.constant 0 : index
    %c0_76 = arith.constant 0 : index
    %157 = vector.load %arg24[%c0_74, %c0_75, %c0_76] : memref<4x8x8xf32, #tpu.memory_space<vmem>>, vector<4x8x8xf32>
    %158 = vector.broadcast %147 : vector<4x8x1xf32> to vector<4x8x8xf32>
    %159 = arith.mulf %158, %157 : vector<4x8x8xf32>
    %160 = arith.truncf %150 : vector<4x8x8xf32> to vector<4x8x8xbf16>
    "tpu.trace_start"() <{level = 10 : i32, message = "bqk,bkd->bqd"}> : () -> ()
    %cst_77 = arith.constant dense<0.000000e+00> : vector<4x8x8xf32>
    %161 = tpu.matmul %160, %131, %cst_77 {dimension_numbers = #tpu.dot_dimension_numbers<[2], [1], [1], [2], [0, 0, 0, 1, 1, 2], [0], [0]>} : vector<4x8x8xbf16>, vector<4x8x8xbf16>, vector<4x8x8xf32> -> vector<4x8x8xf32>
    "tpu.trace_stop"() : () -> ()
    %162 = arith.addf %159, %161 : vector<4x8x8xf32>
    %c0_78 = arith.constant 0 : index
    %c0_79 = arith.constant 0 : index
    %c0_80 = arith.constant 0 : index
    %163 = vector.load %arg24[%c0_78, %c0_79, %c0_80] : memref<4x8x8xf32, #tpu.memory_space<vmem>>, vector<4x8x8xf32>
    tpu.vector_store %arg24[%c0_78, %c0_79, %c0_80], %162 {strides = array<i32>} : memref<4x8x8xf32, #tpu.memory_space<vmem>>, vector<4x8x8xf32>,
    %c0_81 = arith.constant 0 : index
    %c0_82 = arith.constant 0 : index
    %c0_83 = arith.constant 0 : index
    %164 = vector.load %arg22[%c0_81, %c0_82, %c0_83] : memref<4x8x1xf32, #tpu.memory_space<vmem>>, vector<4x8x1xf32>
    tpu.vector_store %arg22[%c0_81, %c0_82, %c0_83], %145 {strides = array<i32>} : memref<4x8x1xf32, #tpu.memory_space<vmem>>, vector<4x8x1xf32>,
    %c1_i32_84 = arith.constant 1 : i32
    %c0_85 = arith.constant 0 : index
    %c0_86 = arith.constant 0 : index
    %c0_87 = arith.constant 0 : index
    %165 = vector.load %arg24[%c0_85, %c0_86, %c0_87] : memref<4x8x8xf32, #tpu.memory_space<vmem>>, vector<4x8x8xf32>
    %c0_88 = arith.constant 0 : index
    %c0_89 = arith.constant 0 : index
    %c0_90 = arith.constant 0 : index
    %166 = vector.load %arg23[%c0_88, %c0_89, %c0_90] : memref<4x8x1xf32, #tpu.memory_space<vmem>>, vector<4x8x1xf32>
    %167 = tpu.reciprocal %166 {approx = true} : vector<4x8x1xf32> -> vector<4x8x1xf32>
    %168 = vector.broadcast %167 : vector<4x8x1xf32> to vector<4x8x8xf32>
    %169 = arith.mulf %165, %168 : vector<4x8x8xf32>
    %170 = vector.shape_cast %169 : vector<4x8x8xf32> to vector<1x4x8x8xf32>
    %171 = tpu.transpose %170, [0, 2, 1, 3] : vector<1x4x8x8xf32> -> vector<1x8x4x8xf32>
    %172 = vector.shape_cast %171 : vector<1x8x4x8xf32> to vector<8x32xf32>
    %173 = arith.truncf %172 : vector<8x32xf32> to vector<8x32xbf16>
    %c0_91 = arith.constant 0 : index
    %c0_92 = arith.constant 0 : index
    %174 = vector.load %arg13[%c0_91, %c0_92] : memref<32x32xbf16, #tpu.memory_space<vmem>>, vector<32x32xbf16>
    %cst_93 = arith.constant dense<0.000000e+00> : vector<8x32xf32>
    %175 = tpu.matmul %173, %174, %cst_93 {dimension_numbers = #tpu.dot_dimension_numbers<[1], [0], [0], [1], [0, 0, 1, 1], [], []>} : vector<8x32xbf16>, vector<32x32xbf16>, vector<8x32xf32> -> vector<8x32xf32>
    %c0_94 = arith.constant 0 : index
    %c0_95 = arith.constant 0 : index
    %176 = vector.load %arg14[%c0_94, %c0_95] : memref<1x32xf32, #tpu.memory_space<vmem>>, vector<1x32xf32>
    %177 = vector.broadcast %176 : vector<1x32xf32> to vector<8x32xf32>
    %178 = arith.addf %175, %177 : vector<8x32xf32>
    %179 = vector.shape_cast %178 : vector<8x32xf32> to vector<1x8x32xf32>
    %180 = vector.broadcast %4 : vector<1x1x32xf32> to vector<1x8x32xf32>
    %181 = arith.mulf %180, %179 : vector<1x8x32xf32>
    %182 = arith.addf %0, %181 : vector<1x8x32xf32>
    %c0_96 = arith.constant 0 : index
    %c0_97 = arith.constant 0 : index
    %183 = vector.load %arg5[%c0_96, %c0_97] : memref<1x32xf32, #tpu.memory_space<vmem>>, vector<1x32xf32>
    %c0_98 = arith.constant 0 : index
    %c0_99 = arith.constant 0 : index
    %184 = vector.load %arg6[%c0_98, %c0_99] : memref<1x32xf32, #tpu.memory_space<vmem>>, vector<1x32xf32>
    %cst_100 = arith.constant dense<0.000000e+00> : vector<1x8xf32>
    %185 = vector.multi_reduction <add>, %182, %cst_100 [2] : vector<1x8x32xf32> to vector<1x8xf32>
    %186 = vector.shape_cast %185 : vector<1x8xf32> to vector<1x8x1xf32>
    %cst_101 = arith.constant 3.200000e+01 : f32
    %187 = vector.broadcast %cst_101 : f32 to vector<1x8x1xf32>
    %188 = arith.divf %186, %187 : vector<1x8x1xf32>
    %189 = vector.broadcast %188 : vector<1x8x1xf32> to vector<1x8x32xf32>
    %190 = arith.subf %182, %189 : vector<1x8x32xf32>
    %191 = arith.mulf %190, %190 : vector<1x8x32xf32>
    %cst_102 = arith.constant dense<0.000000e+00> : vector<1x8xf32>
    %192 = vector.multi_reduction <add>, %191, %cst_102 [2] : vector<1x8x32xf32> to vector<1x8xf32>
    %193 = vector.shape_cast %192 : vector<1x8xf32> to vector<1x8x1xf32>
    %cst_103 = arith.constant 3.200000e+01 : f32
    %194 = vector.broadcast %cst_103 : f32 to vector<1x8x1xf32>
    %195 = arith.divf %193, %194 : vector<1x8x1xf32>
    %196 = vector.broadcast %188 : vector<1x8x1xf32> to vector<1x8x32xf32>
    %197 = arith.subf %182, %196 : vector<1x8x32xf32>
    %cst_104 = arith.constant 9.99999974E-6 : f32
    %198 = vector.broadcast %cst_104 : f32 to vector<1x8x1xf32>
    %199 = arith.addf %195, %198 : vector<1x8x1xf32>
    %200 = math.rsqrt %199 : vector<1x8x1xf32>
    %201 = vector.broadcast %200 : vector<1x8x1xf32> to vector<1x8x32xf32>
    %202 = arith.mulf %197, %201 : vector<1x8x32xf32>
    %203 = vector.shape_cast %183 : vector<1x32xf32> to vector<1x1x32xf32>
    %204 = vector.broadcast %203 : vector<1x1x32xf32> to vector<1x8x32xf32>
    %205 = arith.mulf %202, %204 : vector<1x8x32xf32>
    %206 = vector.shape_cast %184 : vector<1x32xf32> to vector<1x1x32xf32>
    %207 = vector.broadcast %206 : vector<1x1x32xf32> to vector<1x8x32xf32>
    %208 = arith.addf %205, %207 : vector<1x8x32xf32>
    %cst_105 = arith.constant 1.000000e+00 : f32
    %209 = vector.broadcast %cst_105 : f32 to vector<1x1x32xf32>
    %210 = arith.addf %209, %6 : vector<1x1x32xf32>
    %211 = vector.broadcast %210 : vector<1x1x32xf32> to vector<1x8x32xf32>
    %212 = arith.mulf %208, %211 : vector<1x8x32xf32>
    %213 = vector.broadcast %5 : vector<1x1x32xf32> to vector<1x8x32xf32>
    %214 = arith.addf %212, %213 : vector<1x8x32xf32>
    %215 = vector.shape_cast %214 : vector<1x8x32xf32> to vector<8x32xf32>
    %216 = arith.truncf %215 : vector<8x32xf32> to vector<8x32xbf16>
    %cst_106 = arith.constant 0.000000e+00 : f32
    %217 = vector.broadcast %cst_106 : f32 to vector<8x32xf32>
    %c0_107 = arith.constant 0 : index
    %c0_108 = arith.constant 0 : index
    %218 = vector.load %arg25[%c0_107, %c0_108] : memref<8x32xf32, #tpu.memory_space<vmem>>, vector<8x32xf32>
    tpu.vector_store %arg25[%c0_107, %c0_108], %217 {strides = array<i32>} : memref<8x32xf32, #tpu.memory_space<vmem>>, vector<8x32xf32>,
    %c0_i32_109 = arith.constant 0 : i32
    %c1_i32_110 = arith.constant 1 : i32
    %219 = arith.muli %c0_i32_109, %c1_i32_110 : i32
    %c0_i32_111 = arith.constant 0 : i32
    %220 = arith.addi %c0_i32_111, %219 : i32
    %c128_i32 = arith.constant 128 : i32
    %221 = arith.muli %220, %c128_i32 : i32
    %222 = tpu.assume_multiple %221, 128 : i32
    %c0_112 = arith.constant 0 : index
    %223 = arith.index_cast %222 : i32 to index
    %224 = vector.load %arg15[%c0_112, %223] : memref<32x128xbf16, #tpu.memory_space<vmem>>, vector<32x128xbf16>
    %c0_113 = arith.constant 0 : index
    %225 = arith.index_cast %222 : i32 to index
    %226 = vector.load %arg16[%c0_113, %225] : memref<1x128xf32, #tpu.memory_space<vmem>>, vector<1x128xf32>
    %cst_114 = arith.constant dense<0.000000e+00> : vector<8x128xf32>
    %227 = tpu.matmul %216, %224, %cst_114 {dimension_numbers = #tpu.dot_dimension_numbers<[1], [0], [0], [1], [0, 0, 1, 1], [], []>} : vector<8x32xbf16>, vector<32x128xbf16>, vector<8x128xf32> -> vector<8x128xf32>
    %228 = vector.broadcast %226 : vector<1x128xf32> to vector<8x128xf32>
    %229 = arith.addf %227, %228 : vector<8x128xf32>
    %cst_115 = arith.constant 5.000000e-01 : f32
    %230 = vector.broadcast %cst_115 : f32 to vector<8x128xf32>
    %231 = arith.mulf %230, %229 : vector<8x128xf32>
    %cst_116 = arith.constant 1.41421354 : f32
    %232 = vector.broadcast %cst_116 : f32 to vector<8x128xf32>
    %233 = arith.divf %229, %232 : vector<8x128xf32>
    %234 = math.erf %233 : vector<8x128xf32>
    %cst_117 = arith.constant 1.000000e+00 : f32
    %235 = vector.broadcast %cst_117 : f32 to vector<8x128xf32>
    %236 = arith.addf %235, %234 : vector<8x128xf32>
    %237 = arith.mulf %231, %236 : vector<8x128xf32>
    %238 = arith.truncf %237 : vector<8x128xf32> to vector<8x128xbf16>
    %239 = arith.index_cast %222 : i32 to index
    %c0_118 = arith.constant 0 : index
    %240 = vector.load %arg17[%239, %c0_118] : memref<128x32xbf16, #tpu.memory_space<vmem>>, vector<128x32xbf16>
    %c0_119 = arith.constant 0 : index
    %c0_120 = arith.constant 0 : index
    %241 = vector.load %arg25[%c0_119, %c0_120] : memref<8x32xf32, #tpu.memory_space<vmem>>, vector<8x32xf32>
    %cst_121 = arith.constant dense<0.000000e+00> : vector<8x32xf32>
    %242 = tpu.matmul %238, %240, %cst_121 {dimension_numbers = #tpu.dot_dimension_numbers<[1], [0], [0], [1], [0, 0, 1, 1], [], []>} : vector<8x128xbf16>, vector<128x32xbf16>, vector<8x32xf32> -> vector<8x32xf32>
    %243 = arith.addf %241, %242 : vector<8x32xf32>
    %c0_122 = arith.constant 0 : index
    %c0_123 = arith.constant 0 : index
    %244 = vector.load %arg25[%c0_122, %c0_123] : memref<8x32xf32, #tpu.memory_space<vmem>>, vector<8x32xf32>
    tpu.vector_store %arg25[%c0_122, %c0_123], %243 {strides = array<i32>} : memref<8x32xf32, #tpu.memory_space<vmem>>, vector<8x32xf32>,
    %c1_i32_124 = arith.constant 1 : i32
    %c0_125 = arith.constant 0 : index
    %c0_126 = arith.constant 0 : index
    %245 = vector.load %arg25[%c0_125, %c0_126] : memref<8x32xf32, #tpu.memory_space<vmem>>, vector<8x32xf32>
    %c0_127 = arith.constant 0 : index
    %c0_128 = arith.constant 0 : index
    %246 = vector.load %arg18[%c0_127, %c0_128] : memref<1x32xf32, #tpu.memory_space<vmem>>, vector<1x32xf32>
    %247 = vector.broadcast %246 : vector<1x32xf32> to vector<8x32xf32>
    %248 = arith.addf %245, %247 : vector<8x32xf32>
    %249 = vector.shape_cast %248 : vector<8x32xf32> to vector<1x8x32xf32>
    %250 = vector.broadcast %7 : vector<1x1x32xf32> to vector<1x8x32xf32>
    %251 = arith.mulf %250, %249 : vector<1x8x32xf32>
    %252 = arith.addf %182, %251 : vector<1x8x32xf32>
    %c0_129 = arith.constant 0 : index
    %c0_130 = arith.constant 0 : index
    %c0_131 = arith.constant 0 : index
    %253 = vector.load %arg19[%c0_129, %c0_130, %c0_131] : memref<1x8x32xf32, #tpu.memory_space<vmem>>, vector<1x8x32xf32>
    tpu.vector_store %arg19[%c0_129, %c0_130, %c0_131], %252 {strides = array<i32>} : memref<1x8x32xf32, #tpu.memory_space<vmem>>, vector<1x8x32xf32>,
    return
  }
  func.func @transform_0(%arg0: i32) -> (i32, i32, i32) {
    %c0_i32 = arith.constant 0 : i32
    %c0_i32_0 = arith.constant 0 : i32
    %c0_i32_1 = arith.constant 0 : i32
    return %arg0, %c0_i32, %c0_i32_0 : i32, i32, i32
  }
  func.func @transform_1(%arg0: i32) -> (i32, i32, i32) {
    %c0_i32 = arith.constant 0 : i32
    %c0_i32_0 = arith.constant 0 : i32
    %c0_i32_1 = arith.constant 0 : i32
    return %arg0, %c0_i32, %c0_i32_0 : i32, i32, i32
  }
  func.func @transform_2(%arg0: i32) -> (i32, i32) {
    %c0_i32 = arith.constant 0 : i32
    %c0_i32_0 = arith.constant 0 : i32
    %c0_i32_1 = arith.constant 0 : i32
    return %c0_i32, %c0_i32_0 : i32, i32
  }
  func.func @transform_3(%arg0: i32) -> (i32, i32) {
    %c0_i32 = arith.constant 0 : i32
    %c0_i32_0 = arith.constant 0 : i32
    %c0_i32_1 = arith.constant 0 : i32
    return %c0_i32, %c0_i32_0 : i32, i32
  }
  func.func @transform_4(%arg0: i32) -> (i32, i32) {
    %c0_i32 = arith.constant 0 : i32
    %c0_i32_0 = arith.constant 0 : i32
    %c0_i32_1 = arith.constant 0 : i32
    return %c0_i32, %c0_i32_0 : i32, i32
  }
  func.func @transform_5(%arg0: i32) -> (i32, i32) {
    %c0_i32 = arith.constant 0 : i32
    %c0_i32_0 = arith.constant 0 : i32
    %c0_i32_1 = arith.constant 0 : i32
    return %c0_i32, %c0_i32_0 : i32, i32
  }
  func.func @transform_6(%arg0: i32) -> (i32, i32) {
    %c0_i32 = arith.constant 0 : i32
    %c0_i32_0 = arith.constant 0 : i32
    %c0_i32_1 = arith.constant 0 : i32
    return %c0_i32, %c0_i32_0 : i32, i32
  }
  func.func @transform_7(%arg0: i32) -> (i32, i32) {
    %c0_i32 = arith.constant 0 : i32
    %c0_i32_0 = arith.constant 0 : i32
    %c0_i32_1 = arith.constant 0 : i32
    return %c0_i32, %c0_i32_0 : i32, i32
  }
  func.func @transform_8(%arg0: i32) -> (i32, i32) {
    %c0_i32 = arith.constant 0 : i32
    %c0_i32_0 = arith.constant 0 : i32
    %c0_i32_1 = arith.constant 0 : i32
    return %c0_i32, %c0_i32_0 : i32, i32
  }
  func.func @transform_9(%arg0: i32) -> (i32, i32) {
    %c0_i32 = arith.constant 0 : i32
    %c0_i32_0 = arith.constant 0 : i32
    %c0_i32_1 = arith.constant 0 : i32
    return %c0_i32, %c0_i32_0 : i32, i32
  }
  func.func @transform_10(%arg0: i32) -> (i32, i32) {
    %c0_i32 = arith.constant 0 : i32
    %c0_i32_0 = arith.constant 0 : i32
    %c0_i32_1 = arith.constant 0 : i32
    return %c0_i32, %c0_i32_0 : i32, i32
  }
  func.func @transform_11(%arg0: i32) -> (i32, i32) {
    %c0_i32 = arith.constant 0 : i32
    %c0_i32_0 = arith.constant 0 : i32
    %c0_i32_1 = arith.constant 0 : i32
    return %c0_i32, %c0_i32_0 : i32, i32
  }
  func.func @transform_12(%arg0: i32) -> (i32, i32) {
    %c0_i32 = arith.constant 0 : i32
    %c0_i32_0 = arith.constant 0 : i32
    %c0_i32_1 = arith.constant 0 : i32
    return %c0_i32, %c0_i32_0 : i32, i32
  }
  func.func @transform_13(%arg0: i32) -> (i32, i32) {
    %c0_i32 = arith.constant 0 : i32
    %c0_i32_0 = arith.constant 0 : i32
    %c0_i32_1 = arith.constant 0 : i32
    return %c0_i32, %c0_i32_0 : i32, i32
  }
  func.func @transform_14(%arg0: i32) -> (i32, i32) {
    %c0_i32 = arith.constant 0 : i32
    %c0_i32_0 = arith.constant 0 : i32
    %c0_i32_1 = arith.constant 0 : i32
    return %c0_i32, %c0_i32_0 : i32, i32
  }
  func.func @transform_15(%arg0: i32) -> (i32, i32) {
    %c0_i32 = arith.constant 0 : i32
    %c0_i32_0 = arith.constant 0 : i32
    %c0_i32_1 = arith.constant 0 : i32
    return %c0_i32, %c0_i32_0 : i32, i32
  }
  func.func @transform_16(%arg0: i32) -> (i32, i32) {
    %c0_i32 = arith.constant 0 : i32
    %c0_i32_0 = arith.constant 0 : i32
    %c0_i32_1 = arith.constant 0 : i32
    return %c0_i32, %c0_i32_0 : i32, i32
  }
  func.func @transform_17(%arg0: i32) -> (i32, i32) {
    %c0_i32 = arith.constant 0 : i32
    %c0_i32_0 = arith.constant 0 : i32
    %c0_i32_1 = arith.constant 0 : i32
    return %c0_i32, %c0_i32_0 : i32, i32
  }
  func.func @transform_18(%arg0: i32) -> (i32, i32, i32) {
    %c0_i32 = arith.constant 0 : i32
    %c0_i32_0 = arith.constant 0 : i32
    %c0_i32_1 = arith.constant 0 : i32
    return %arg0, %c0_i32, %c0_i32_0 : i32, i32, i32
  }
}

module attributes {stable_mosaic.version = 11 : i64} {
  func.func @transformer_block_kernel(%arg0: i32, %arg1: memref<1x8x32xf32, #tpu.memory_space<vmem>>, %arg2: memref<1x6x32xf32, #tpu.memory_space<vmem>>, %arg3: memref<1x32xf32, #tpu.memory_space<vmem>>, %arg4: memref<1x32xf32, #tpu.memory_space<vmem>>, %arg5: memref<1x32xf32, #tpu.memory_space<vmem>>, %arg6: memref<1x32xf32, #tpu.memory_space<vmem>>, %arg7: memref<32x96xbf16, #tpu.memory_space<vmem>>, %arg8: memref<1x96xf32, #tpu.memory_space<vmem>>, %arg9: memref<1x8xf32, #tpu.memory_space<vmem>>, %arg10: memref<1x8xf32, #tpu.memory_space<vmem>>, %arg11: memref<1x8xf32, #tpu.memory_space<vmem>>, %arg12: memref<1x8xf32, #tpu.memory_space<vmem>>, %arg13: memref<32x32xbf16, #tpu.memory_space<vmem>>, %arg14: memref<1x32xf32, #tpu.memory_space<vmem>>, %arg15: memref<32x128xbf16, #tpu.memory_space<vmem>>, %arg16: memref<1x128xf32, #tpu.memory_space<vmem>>, %arg17: memref<128x32xbf16, #tpu.memory_space<vmem>>, %arg18: memref<1x32xf32, #tpu.memory_space<vmem>>, %arg19: memref<1x8x32xf32, #tpu.memory_space<vmem>>, %arg20: memref<4x8x8xbf16, #tpu.memory_space<vmem>>, %arg21: memref<4x8x8xbf16, #tpu.memory_space<vmem>>, %arg22: memref<4x8x1xf32, #tpu.memory_space<vmem>>, %arg23: memref<4x8x1xf32, #tpu.memory_space<vmem>>, %arg24: memref<4x8x8xf32, #tpu.memory_space<vmem>>, %arg25: memref<8x32xf32, #tpu.memory_space<vmem>>) attributes {dimension_semantics = [#tpu.dimension_semantics<parallel>], iteration_bounds = array<i64: 2>, scalar_prefetch = 0 : i64, scratch_operands = 6 : i64, tpu.core_type = #tpu.core_type<tc>, window_params = [{transform_indices = @transform_0, window_bounds = array<i64: 1, 8, 32>}, {transform_indices = @transform_1, window_bounds = array<i64: 1, 6, 32>}, {pipeline_mode = #tpu.pipeline_mode<synchronous>, transform_indices = @transform_2, window_bounds = array<i64: 1, 32>}, {pipeline_mode = #tpu.pipeline_mode<synchronous>, transform_indices = @transform_3, window_bounds = array<i64: 1, 32>}, {pipeline_mode = #tpu.pipeline_mode<synchronous>, transform_indices = @transform_4, window_bounds = array<i64: 1, 32>}, {pipeline_mode = #tpu.pipeline_mode<synchronous>, transform_indices = @transform_5, window_bounds = array<i64: 1, 32>}, {pipeline_mode = #tpu.pipeline_mode<synchronous>, transform_indices = @transform_6, window_bounds = array<i64: 32, 96>}, {pipeline_mode = #tpu.pipeline_mode<synchronous>, transform_indices = @transform_7, window_bounds = array<i64: 1, 96>}, {pipeline_mode = #tpu.pipeline_mode<synchronous>, transform_indices = @transform_8, window_bounds = array<i64: 1, 8>}, {pipeline_mode = #tpu.pipeline_mode<synchronous>, transform_indices = @transform_9, window_bounds = array<i64: 1, 8>}, {pipeline_mode = #tpu.pipeline_mode<synchronous>, transform_indices = @transform_10, window_bounds = array<i64: 1, 8>}, {pipeline_mode = #tpu.pipeline_mode<synchronous>, transform_indices = @transform_11, window_bounds = array<i64: 1, 8>}, {pipeline_mode = #tpu.pipeline_mode<synchronous>, transform_indices = @transform_12, window_bounds = array<i64: 32, 32>}, {pipeline_mode = #tpu.pipeline_mode<synchronous>, transform_indices = @transform_13, window_bounds = array<i64: 1, 32>}, {pipeline_mode = #tpu.pipeline_mode<synchronous>, transform_indices = @transform_14, window_bounds = array<i64: 32, 128>}, {pipeline_mode = #tpu.pipeline_mode<synchronous>, transform_indices = @transform_15, window_bounds = array<i64: 1, 128>}, {pipeline_mode = #tpu.pipeline_mode<synchronous>, transform_indices = @transform_16, window_bounds = array<i64: 128, 32>}, {pipeline_mode = #tpu.pipeline_mode<synchronous>, transform_indices = @transform_17, window_bounds = array<i64: 1, 32>}, {transform_indices = @transform_18, window_bounds = array<i64: 1, 8, 32>}]} {
    %c0 = arith.constant 0 : index
    %c0_0 = arith.constant 0 : index
    %c0_1 = arith.constant 0 : index
    %0 = vector.load %arg1[%c0, %c0_0, %c0_1] : memref<1x8x32xf32, #tpu.memory_space<vmem>>, vector<1x8x32xf32>
    %c0_2 = arith.constant 0 : index
    %c0_3 = arith.constant 0 : index
    %c0_4 = arith.constant 0 : index
    %1 = vector.load %arg2[%c0_2, %c0_3, %c0_4] : memref<1x6x32xf32, #tpu.memory_space<vmem>>, vector<1x6x32xf32>
    %2 = vector.extract_strided_slice %1 {offsets = [0, 0, 0], sizes = [1, 1, 32], strides = [1, 1, 1]} : vector<1x6x32xf32> to vector<1x1x32xf32>
    %3 = vector.extract_strided_slice %1 {offsets = [0, 1, 0], sizes = [1, 1, 32], strides = [1, 1, 1]} : vector<1x6x32xf32> to vector<1x1x32xf32>
    %4 = vector.extract_strided_slice %1 {offsets = [0, 2, 0], sizes = [1, 1, 32], strides = [1, 1, 1]} : vector<1x6x32xf32> to vector<1x1x32xf32>
    %5 = vector.extract_strided_slice %1 {offsets = [0, 3, 0], sizes = [1, 1, 32], strides = [1, 1, 1]} : vector<1x6x32xf32> to vector<1x1x32xf32>
    %6 = vector.extract_strided_slice %1 {offsets = [0, 4, 0], sizes = [1, 1, 32], strides = [1, 1, 1]} : vector<1x6x32xf32> to vector<1x1x32xf32>
    %7 = vector.extract_strided_slice %1 {offsets = [0, 5, 0], sizes = [1, 1, 32], strides = [1, 1, 1]} : vector<1x6x32xf32> to vector<1x1x32xf32>
    %c0_5 = arith.constant 0 : index
    %c0_6 = arith.constant 0 : index
    %8 = vector.load %arg3[%c0_5, %c0_6] : memref<1x32xf32, #tpu.memory_space<vmem>>, vector<1x32xf32>
    %c0_7 = arith.constant 0 : index
    %c0_8 = arith.constant 0 : index
    %9 = vector.load %arg4[%c0_7, %c0_8] : memref<1x32xf32, #tpu.memory_space<vmem>>, vector<1x32xf32>
    %cst = arith.constant dense<0.000000e+00> : vector<1x8xf32>
    %10 = vector.multi_reduction <add>, %0, %cst [2] : vector<1x8x32xf32> to vector<1x8xf32>
    %11 = vector.shape_cast %10 : vector<1x8xf32> to vector<1x8x1xf32>
    %cst_9 = arith.constant 3.200000e+01 : f32
    %12 = vector.broadcast %cst_9 : f32 to vector<1x8x1xf32>
    %13 = arith.divf %11, %12 : vector<1x8x1xf32>
    %14 = vector.broadcast %13 : vector<1x8x1xf32> to vector<1x8x32xf32>
    %15 = arith.subf %0, %14 : vector<1x8x32xf32>
    %16 = arith.mulf %15, %15 : vector<1x8x32xf32>
    %cst_10 = arith.constant dense<0.000000e+00> : vector<1x8xf32>
    %17 = vector.multi_reduction <add>, %16, %cst_10 [2] : vector<1x8x32xf32> to vector<1x8xf32>
    %18 = vector.shape_cast %17 : vector<1x8xf32> to vector<1x8x1xf32>
    %cst_11 = arith.constant 3.200000e+01 : f32
    %19 = vector.broadcast %cst_11 : f32 to vector<1x8x1xf32>
    %20 = arith.divf %18, %19 : vector<1x8x1xf32>
    %21 = vector.broadcast %13 : vector<1x8x1xf32> to vector<1x8x32xf32>
    %22 = arith.subf %0, %21 : vector<1x8x32xf32>
    %cst_12 = arith.constant 9.99999974E-6 : f32
    %23 = vector.broadcast %cst_12 : f32 to vector<1x8x1xf32>
    %24 = arith.addf %20, %23 : vector<1x8x1xf32>
    %25 = math.rsqrt %24 : vector<1x8x1xf32>
    %26 = vector.broadcast %25 : vector<1x8x1xf32> to vector<1x8x32xf32>
    %27 = arith.mulf %22, %26 : vector<1x8x32xf32>
    %28 = vector.shape_cast %8 : vector<1x32xf32> to vector<1x1x32xf32>
    %29 = vector.broadcast %28 : vector<1x1x32xf32> to vector<1x8x32xf32>
    %30 = arith.mulf %27, %29 : vector<1x8x32xf32>
    %31 = vector.shape_cast %9 : vector<1x32xf32> to vector<1x1x32xf32>
    %32 = vector.broadcast %31 : vector<1x1x32xf32> to vector<1x8x32xf32>
    %33 = arith.addf %30, %32 : vector<1x8x32xf32>
    %cst_13 = arith.constant 1.000000e+00 : f32
    %34 = vector.broadcast %cst_13 : f32 to vector<1x1x32xf32>
    %35 = arith.addf %34, %3 : vector<1x1x32xf32>
    %36 = vector.broadcast %35 : vector<1x1x32xf32> to vector<1x8x32xf32>
    %37 = arith.mulf %33, %36 : vector<1x8x32xf32>
    %38 = vector.broadcast %2 : vector<1x1x32xf32> to vector<1x8x32xf32>
    %39 = arith.addf %37, %38 : vector<1x8x32xf32>
    %40 = vector.shape_cast %39 : vector<1x8x32xf32> to vector<8x32xf32>
    %41 = arith.truncf %40 : vector<8x32xf32> to vector<8x32xbf16>
    %c0_14 = arith.constant 0 : index
    %c0_15 = arith.constant 0 : index
    %42 = vector.load %arg7[%c0_14, %c0_15] : memref<32x96xbf16, #tpu.memory_space<vmem>>, vector<32x96xbf16>
    %cst_16 = arith.constant dense<0.000000e+00> : vector<8x96xf32>
    %43 = tpu.matmul %41, %42, %cst_16 {dimension_numbers = #tpu.dot_dimension_numbers<[1], [0], [0], [1], [0, 0, 1, 1], [], []>} : vector<8x32xbf16>, vector<32x96xbf16>, vector<8x96xf32> -> vector<8x96xf32>
    %c0_17 = arith.constant 0 : index
    %c0_18 = arith.constant 0 : index
    %44 = vector.load %arg8[%c0_17, %c0_18] : memref<1x96xf32, #tpu.memory_space<vmem>>, vector<1x96xf32>
    %45 = vector.broadcast %44 : vector<1x96xf32> to vector<8x96xf32>
    %46 = arith.addf %43, %45 : vector<8x96xf32>
    %47 = vector.extract_strided_slice %46 {offsets = [0, 0], sizes = [8, 32], strides = [1, 1]} : vector<8x96xf32> to vector<8x32xf32>
    %48 = vector.shape_cast %47 : vector<8x32xf32> to vector<1x8x4x8xf32>
    %49 = vector.extract_strided_slice %46 {offsets = [0, 32], sizes = [8, 32], strides = [1, 1]} : vector<8x96xf32> to vector<8x32xf32>
    %50 = vector.shape_cast %49 : vector<8x32xf32> to vector<1x8x4x8xf32>
    %51 = vector.extract_strided_slice %46 {offsets = [0, 64], sizes = [8, 32], strides = [1, 1]} : vector<8x96xf32> to vector<8x32xf32>
    %52 = vector.shape_cast %51 : vector<8x32xf32> to vector<1x8x4x8xf32>
    %53 = arith.truncf %52 : vector<1x8x4x8xf32> to vector<1x8x4x8xbf16>
    %54 = tpu.transpose %48, [0, 2, 1, 3] : vector<1x8x4x8xf32> -> vector<1x4x8x8xf32>
    %55 = vector.shape_cast %54 : vector<1x4x8x8xf32> to vector<4x8x8xf32>
    %56 = tpu.transpose %50, [0, 2, 1, 3] : vector<1x8x4x8xf32> -> vector<1x4x8x8xf32>
    %57 = vector.shape_cast %56 : vector<1x4x8x8xf32> to vector<4x8x8xf32>
    %58 = tpu.transpose %53, [0, 2, 1, 3] : vector<1x8x4x8xbf16> -> vector<1x4x8x8xbf16>
    %59 = vector.shape_cast %58 : vector<1x4x8x8xbf16> to vector<4x8x8xbf16>
    %c0_19 = arith.constant 0 : index
    %c0_20 = arith.constant 0 : index
    %60 = vector.load %arg9[%c0_19, %c0_20] : memref<1x8xf32, #tpu.memory_space<vmem>>, vector<1x8xf32>
    %c0_21 = arith.constant 0 : index
    %c0_22 = arith.constant 0 : index
    %61 = vector.load %arg10[%c0_21, %c0_22] : memref<1x8xf32, #tpu.memory_space<vmem>>, vector<1x8xf32>
    %cst_23 = arith.constant dense<0.000000e+00> : vector<4x8xf32>
    %62 = vector.multi_reduction <add>, %55, %cst_23 [2] : vector<4x8x8xf32> to vector<4x8xf32>
    %63 = vector.shape_cast %62 : vector<4x8xf32> to vector<4x8x1xf32>
    %cst_24 = arith.constant 8.000000e+00 : f32
    %64 = vector.broadcast %cst_24 : f32 to vector<4x8x1xf32>
    %65 = arith.divf %63, %64 : vector<4x8x1xf32>
    %66 = vector.broadcast %65 : vector<4x8x1xf32> to vector<4x8x8xf32>
    %67 = arith.subf %55, %66 : vector<4x8x8xf32>
    %68 = arith.mulf %67, %67 : vector<4x8x8xf32>
    %cst_25 = arith.constant dense<0.000000e+00> : vector<4x8xf32>
    %69 = vector.multi_reduction <add>, %68, %cst_25 [2] : vector<4x8x8xf32> to vector<4x8xf32>
    %70 = vector.shape_cast %69 : vector<4x8xf32> to vector<4x8x1xf32>
    %cst_26 = arith.constant 8.000000e+00 : f32
    %71 = vector.broadcast %cst_26 : f32 to vector<4x8x1xf32>
    %72 = arith.divf %70, %71 : vector<4x8x1xf32>
    %73 = vector.broadcast %65 : vector<4x8x1xf32> to vector<4x8x8xf32>
    %74 = arith.subf %55, %73 : vector<4x8x8xf32>
    %cst_27 = arith.constant 9.99999974E-6 : f32
    %75 = vector.broadcast %cst_27 : f32 to vector<4x8x1xf32>
    %76 = arith.addf %72, %75 : vector<4x8x1xf32>
    %77 = math.rsqrt %76 : vector<4x8x1xf32>
    %78 = vector.broadcast %77 : vector<4x8x1xf32> to vector<4x8x8xf32>
    %79 = arith.mulf %74, %78 : vector<4x8x8xf32>
    %80 = vector.shape_cast %60 : vector<1x8xf32> to vector<1x1x8xf32>
    %81 = vector.broadcast %80 : vector<1x1x8xf32> to vector<4x8x8xf32>
    %82 = arith.mulf %79, %81 : vector<4x8x8xf32>
    %83 = vector.shape_cast %61 : vector<1x8xf32> to vector<1x1x8xf32>
    %84 = vector.broadcast %83 : vector<1x1x8xf32> to vector<4x8x8xf32>
    %85 = arith.addf %82, %84 : vector<4x8x8xf32>
    %86 = arith.truncf %85 : vector<4x8x8xf32> to vector<4x8x8xbf16>
    %c0_28 = arith.constant 0 : index
    %c0_29 = arith.constant 0 : index
    %87 = vector.load %arg11[%c0_28, %c0_29] : memref<1x8xf32, #tpu.memory_space<vmem>>, vector<1x8xf32>
    %c0_30 = arith.constant 0 : index
    %c0_31 = arith.constant 0 : index
    %88 = vector.load %arg12[%c0_30, %c0_31] : memref<1x8xf32, #tpu.memory_space<vmem>>, vector<1x8xf32>
    %cst_32 = arith.constant dense<0.000000e+00> : vector<4x8xf32>
    %89 = vector.multi_reduction <add>, %57, %cst_32 [2] : vector<4x8x8xf32> to vector<4x8xf32>
    %90 = vector.shape_cast %89 : vector<4x8xf32> to vector<4x8x1xf32>
    %cst_33 = arith.constant 8.000000e+00 : f32
    %91 = vector.broadcast %cst_33 : f32 to vector<4x8x1xf32>
    %92 = arith.divf %90, %91 : vector<4x8x1xf32>
    %93 = vector.broadcast %92 : vector<4x8x1xf32> to vector<4x8x8xf32>
    %94 = arith.subf %57, %93 : vector<4x8x8xf32>
    %95 = arith.mulf %94, %94 : vector<4x8x8xf32>
    %cst_34 = arith.constant dense<0.000000e+00> : vector<4x8xf32>
    %96 = vector.multi_reduction <add>, %95, %cst_34 [2] : vector<4x8x8xf32> to vector<4x8xf32>
    %97 = vector.shape_cast %96 : vector<4x8xf32> to vector<4x8x1xf32>
    %cst_35 = arith.constant 8.000000e+00 : f32
    %98 = vector.broadcast %cst_35 : f32 to vector<4x8x1xf32>
    %99 = arith.divf %97, %98 : vector<4x8x1xf32>
    %100 = vector.broadcast %92 : vector<4x8x1xf32> to vector<4x8x8xf32>
    %101 = arith.subf %57, %100 : vector<4x8x8xf32>
    %cst_36 = arith.constant 9.99999974E-6 : f32
    %102 = vector.broadcast %cst_36 : f32 to vector<4x8x1xf32>
    %103 = arith.addf %99, %102 : vector<4x8x1xf32>
    %104 = math.rsqrt %103 : vector<4x8x1xf32>
    %105 = vector.broadcast %104 : vector<4x8x1xf32> to vector<4x8x8xf32>
    %106 = arith.mulf %101, %105 : vector<4x8x8xf32>
    %107 = vector.shape_cast %87 : vector<1x8xf32> to vector<1x1x8xf32>
    %108 = vector.broadcast %107 : vector<1x1x8xf32> to vector<4x8x8xf32>
    %109 = arith.mulf %106, %108 : vector<4x8x8xf32>
    %110 = vector.shape_cast %88 : vector<1x8xf32> to vector<1x1x8xf32>
    %111 = vector.broadcast %110 : vector<1x1x8xf32> to vector<4x8x8xf32>
    %112 = arith.addf %109, %111 : vector<4x8x8xf32>
    %113 = arith.truncf %112 : vector<4x8x8xf32> to vector<4x8x8xbf16>
    %c0_37 = arith.constant 0 : index
    %c0_38 = arith.constant 0 : index
    %c0_39 = arith.constant 0 : index
    %114 = vector.load %arg20[%c0_37, %c0_38, %c0_39] : memref<4x8x8xbf16, #tpu.memory_space<vmem>>, vector<4x8x8xbf16>
    tpu.vector_store %arg20[%c0_37, %c0_38, %c0_39], %113 {strides = array<i32>} : memref<4x8x8xbf16, #tpu.memory_space<vmem>>, vector<4x8x8xbf16>,
    %c0_40 = arith.constant 0 : index
    %c0_41 = arith.constant 0 : index
    %c0_42 = arith.constant 0 : index
    %115 = vector.load %arg21[%c0_40, %c0_41, %c0_42] : memref<4x8x8xbf16, #tpu.memory_space<vmem>>, vector<4x8x8xbf16>
    tpu.vector_store %arg21[%c0_40, %c0_41, %c0_42], %59 {strides = array<i32>} : memref<4x8x8xbf16, #tpu.memory_space<vmem>>, vector<4x8x8xbf16>,
    %cst_43 = arith.constant 0xFF800000 : f32
    %116 = vector.broadcast %cst_43 : f32 to vector<4x8x1xf32>
    %c0_44 = arith.constant 0 : index
    %c0_45 = arith.constant 0 : index
    %c0_46 = arith.constant 0 : index
    %117 = vector.load %arg22[%c0_44, %c0_45, %c0_46] : memref<4x8x1xf32, #tpu.memory_space<vmem>>, vector<4x8x1xf32>
    tpu.vector_store %arg22[%c0_44, %c0_45, %c0_46], %116 {strides = array<i32>} : memref<4x8x1xf32, #tpu.memory_space<vmem>>, vector<4x8x1xf32>,
    %cst_47 = arith.constant 0.000000e+00 : f32
    %118 = vector.broadcast %cst_47 : f32 to vector<4x8x1xf32>
    %c0_48 = arith.constant 0 : index
    %c0_49 = arith.constant 0 : index
    %c0_50 = arith.constant 0 : index
    %119 = vector.load %arg23[%c0_48, %c0_49, %c0_50] : memref<4x8x1xf32, #tpu.memory_space<vmem>>, vector<4x8x1xf32>
    tpu.vector_store %arg23[%c0_48, %c0_49, %c0_50], %118 {strides = array<i32>} : memref<4x8x1xf32, #tpu.memory_space<vmem>>, vector<4x8x1xf32>,
    %cst_51 = arith.constant 0.000000e+00 : f32
    %120 = vector.broadcast %cst_51 : f32 to vector<4x8x8xf32>
    %c0_52 = arith.constant 0 : index
    %c0_53 = arith.constant 0 : index
    %c0_54 = arith.constant 0 : index
    %121 = vector.load %arg24[%c0_52, %c0_53, %c0_54] : memref<4x8x8xf32, #tpu.memory_space<vmem>>, vector<4x8x8xf32>
    tpu.vector_store %arg24[%c0_52, %c0_53, %c0_54], %120 {strides = array<i32>} : memref<4x8x8xf32, #tpu.memory_space<vmem>>, vector<4x8x8xf32>,
    %122 = tpu.iota {dimensions = array<i32: 0>} : vector<8x8xi32>
    %123 = tpu.iota {dimensions = array<i32: 1>} : vector<8x8xi32>
    %c0_i32 = arith.constant 0 : i32
    %c1_i32 = arith.constant 1 : i32
    %124 = arith.muli %c0_i32, %c1_i32 : i32
    %c0_i32_55 = arith.constant 0 : i32
    %125 = arith.addi %c0_i32_55, %124 : i32
    %c8_i32 = arith.constant 8 : i32
    %126 = arith.muli %125, %c8_i32 : i32
    %127 = tpu.assume_multiple %126, 8 : i32
    %c0_56 = arith.constant 0 : index
    %128 = arith.index_cast %127 : i32 to index
    %c0_57 = arith.constant 0 : index
    %129 = vector.load %arg20[%c0_56, %128, %c0_57] : memref<4x8x8xbf16, #tpu.memory_space<vmem>>, vector<4x8x8xbf16>
    %c0_58 = arith.constant 0 : index
    %130 = arith.index_cast %127 : i32 to index
    %c0_59 = arith.constant 0 : index
    %131 = vector.load %arg21[%c0_58, %130, %c0_59] : memref<4x8x8xbf16, #tpu.memory_space<vmem>>, vector<4x8x8xbf16>
    "tpu.trace_start"() <{level = 10 : i32, message = "bqd,bkd->bqk"}> : () -> ()
    %cst_60 = arith.constant dense<0.000000e+00> : vector<4x8x8xf32>
    %132 = tpu.matmul %86, %129, %cst_60 {dimension_numbers = #tpu.dot_dimension_numbers<[2], [2], [1], [1], [0, 0, 0, 1, 1, 1], [0], [0]>} : vector<4x8x8xbf16>, vector<4x8x8xbf16>, vector<4x8x8xf32> -> vector<4x8x8xf32>
    "tpu.trace_stop"() : () -> ()
    %133 = vector.broadcast %127 : i32 to vector<8x8xi32>
    %134 = arith.addi %123, %133 : vector<8x8xi32>
    %135 = arith.cmpi sge, %122, %134 : vector<8x8xi32>
    %cst_61 = arith.constant 0.000000e+00 : f32
    %cst_62 = arith.constant -1.000000e+30 : f32
    %136 = vector.broadcast %cst_61 : f32 to vector<8x8xf32>
    %137 = vector.broadcast %cst_62 : f32 to vector<8x8xf32>
    %138 = arith.select %135, %136, %137 : vector<8x8xi1>, vector<8x8xf32>
    %139 = vector.shape_cast %138 : vector<8x8xf32> to vector<1x8x8xf32>
    %140 = vector.broadcast %139 : vector<1x8x8xf32> to vector<4x8x8xf32>
    %141 = arith.addf %132, %140 : vector<4x8x8xf32>
    %c0_63 = arith.constant 0 : index
    %c0_64 = arith.constant 0 : index
    %c0_65 = arith.constant 0 : index
    %142 = vector.load %arg22[%c0_63, %c0_64, %c0_65] : memref<4x8x1xf32, #tpu.memory_space<vmem>>, vector<4x8x1xf32>
    %cst_66 = arith.constant dense<0xFF800000> : vector<4x8xf32>
    %143 = vector.multi_reduction <maximumf>, %141, %cst_66 [2] : vector<4x8x8xf32> to vector<4x8xf32>
    %144 = vector.shape_cast %143 : vector<4x8xf32> to vector<4x8x1xf32>
    %145 = arith.maximumf %142, %144 : vector<4x8x1xf32>
    %146 = arith.subf %142, %145 : vector<4x8x1xf32>
    %147 = math.exp %146 : vector<4x8x1xf32>
    %148 = vector.broadcast %145 : vector<4x8x1xf32> to vector<4x8x8xf32>
    %149 = arith.subf %141, %148 : vector<4x8x8xf32>
    %150 = math.exp %149 : vector<4x8x8xf32>
    %c0_67 = arith.constant 0 : index
    %c0_68 = arith.constant 0 : index
    %c0_69 = arith.constant 0 : index
    %151 = vector.load %arg23[%c0_67, %c0_68, %c0_69] : memref<4x8x1xf32, #tpu.memory_space<vmem>>, vector<4x8x1xf32>
    %152 = arith.mulf %147, %151 : vector<4x8x1xf32>
    %cst_70 = arith.constant dense<0.000000e+00> : vector<4x8xf32>
    %153 = vector.multi_reduction <add>, %150, %cst_70 [2] : vector<4x8x8xf32> to vector<4x8xf32>
    %154 = vector.shape_cast %153 : vector<4x8xf32> to vector<4x8x1xf32>
    %155 = arith.addf %152, %154 : vector<4x8x1xf32>
    %c0_71 = arith.constant 0 : index
    %c0_72 = arith.constant 0 : index
    %c0_73 = arith.constant 0 : index
    %156 = vector.load %arg23[%c0_71, %c0_72, %c0_73] : memref<4x8x1xf32, #tpu.memory_space<vmem>>, vector<4x8x1xf32>
    tpu.vector_store %arg23[%c0_71, %c0_72, %c0_73], %155 {strides = array<i32>} : memref<4x8x1xf32, #tpu.memory_space<vmem>>, vector<4x8x1xf32>,
    %c0_74 = arith.constant 0 : index
    %c0_75 = arith.constant 0 : index
    %c0_76 = arith.constant 0 : index
    %157 = vector.load %arg24[%c0_74, %c0_75, %c0_76] : memref<4x8x8xf32, #tpu.memory_space<vmem>>, vector<4x8x8xf32>
    %158 = vector.broadcast %147 : vector<4x8x1xf32> to vector<4x8x8xf32>
    %159 = arith.mulf %158, %157 : vector<4x8x8xf32>
    %160 = arith.truncf %150 : vector<4x8x8xf32> to vector<4x8x8xbf16>
    "tpu.trace_start"() <{level = 10 : i32, message = "bqk,bkd->bqd"}> : () -> ()
    %cst_77 = arith.constant dense<0.000000e+00> : vector<4x8x8xf32>
    %161 = tpu.matmul %160, %131, %cst_77 {dimension_numbers = #tpu.dot_dimension_numbers<[2], [1], [1], [2], [0, 0, 0, 1, 1, 2], [0], [0]>} : vector<4x8x8xbf16>, vector<4x8x8xbf16>, vector<4x8x8xf32> -> vector<4x8x8xf32>
    "tpu.trace_stop"() : () -> ()
    %162 = arith.addf %159, %161 : vector<4x8x8xf32>
    %c0_78 = arith.constant 0 : index
    %c0_79 = arith.constant 0 : index
    %c0_80 = arith.constant 0 : index
    %163 = vector.load %arg24[%c0_78, %c0_79, %c0_80] : memref<4x8x8xf32, #tpu.memory_space<vmem>>, vector<4x8x8xf32>
    tpu.vector_store %arg24[%c0_78, %c0_79, %c0_80], %162 {strides = array<i32>} : memref<4x8x8xf32, #tpu.memory_space<vmem>>, vector<4x8x8xf32>,
    %c0_81 = arith.constant 0 : index
    %c0_82 = arith.constant 0 : index
    %c0_83 = arith.constant 0 : index
    %164 = vector.load %arg22[%c0_81, %c0_82, %c0_83] : memref<4x8x1xf32, #tpu.memory_space<vmem>>, vector<4x8x1xf32>
    tpu.vector_store %arg22[%c0_81, %c0_82, %c0_83], %145 {strides = array<i32>} : memref<4x8x1xf32, #tpu.memory_space<vmem>>, vector<4x8x1xf32>,
    %c1_i32_84 = arith.constant 1 : i32
    %c0_85 = arith.constant 0 : index
    %c0_86 = arith.constant 0 : index
    %c0_87 = arith.constant 0 : index
    %165 = vector.load %arg24[%c0_85, %c0_86, %c0_87] : memref<4x8x8xf32, #tpu.memory_space<vmem>>, vector<4x8x8xf32>
    %c0_88 = arith.constant 0 : index
    %c0_89 = arith.constant 0 : index
    %c0_90 = arith.constant 0 : index
    %166 = vector.load %arg23[%c0_88, %c0_89, %c0_90] : memref<4x8x1xf32, #tpu.memory_space<vmem>>, vector<4x8x1xf32>
    %167 = tpu.reciprocal %166 {approx = true} : vector<4x8x1xf32> -> vector<4x8x1xf32>
    %168 = vector.broadcast %167 : vector<4x8x1xf32> to vector<4x8x8xf32>
    %169 = arith.mulf %165, %168 : vector<4x8x8xf32>
    %170 = vector.shape_cast %169 : vector<4x8x8xf32> to vector<1x4x8x8xf32>
    %171 = tpu.transpose %170, [0, 2, 1, 3] : vector<1x4x8x8xf32> -> vector<1x8x4x8xf32>
    %172 = vector.shape_cast %171 : vector<1x8x4x8xf32> to vector<8x32xf32>
    %173 = arith.truncf %172 : vector<8x32xf32> to vector<8x32xbf16>
    %c0_91 = arith.constant 0 : index
    %c0_92 = arith.constant 0 : index
    %174 = vector.load %arg13[%c0_91, %c0_92] : memref<32x32xbf16, #tpu.memory_space<vmem>>, vector<32x32xbf16>
    %cst_93 = arith.constant dense<0.000000e+00> : vector<8x32xf32>
    %175 = tpu.matmul %173, %174, %cst_93 {dimension_numbers = #tpu.dot_dimension_numbers<[1], [0], [0], [1], [0, 0, 1, 1], [], []>} : vector<8x32xbf16>, vector<32x32xbf16>, vector<8x32xf32> -> vector<8x32xf32>
    %c0_94 = arith.constant 0 : index
    %c0_95 = arith.constant 0 : index
    %176 = vector.load %arg14[%c0_94, %c0_95] : memref<1x32xf32, #tpu.memory_space<vmem>>, vector<1x32xf32>
    %177 = vector.broadcast %176 : vector<1x32xf32> to vector<8x32xf32>
    %178 = arith.addf %175, %177 : vector<8x32xf32>
    %179 = vector.shape_cast %178 : vector<8x32xf32> to vector<1x8x32xf32>
    %180 = vector.broadcast %4 : vector<1x1x32xf32> to vector<1x8x32xf32>
    %181 = arith.mulf %180, %179 : vector<1x8x32xf32>
    %182 = arith.addf %0, %181 : vector<1x8x32xf32>
    %c0_96 = arith.constant 0 : index
    %c0_97 = arith.constant 0 : index
    %183 = vector.load %arg5[%c0_96, %c0_97] : memref<1x32xf32, #tpu.memory_space<vmem>>, vector<1x32xf32>
    %c0_98 = arith.constant 0 : index
    %c0_99 = arith.constant 0 : index
    %184 = vector.load %arg6[%c0_98, %c0_99] : memref<1x32xf32, #tpu.memory_space<vmem>>, vector<1x32xf32>
    %cst_100 = arith.constant dense<0.000000e+00> : vector<1x8xf32>
    %185 = vector.multi_reduction <add>, %182, %cst_100 [2] : vector<1x8x32xf32> to vector<1x8xf32>
    %186 = vector.shape_cast %185 : vector<1x8xf32> to vector<1x8x1xf32>
    %cst_101 = arith.constant 3.200000e+01 : f32
    %187 = vector.broadcast %cst_101 : f32 to vector<1x8x1xf32>
    %188 = arith.divf %186, %187 : vector<1x8x1xf32>
    %189 = vector.broadcast %188 : vector<1x8x1xf32> to vector<1x8x32xf32>
    %190 = arith.subf %182, %189 : vector<1x8x32xf32>
    %191 = arith.mulf %190, %190 : vector<1x8x32xf32>
    %cst_102 = arith.constant dense<0.000000e+00> : vector<1x8xf32>
    %192 = vector.multi_reduction <add>, %191, %cst_102 [2] : vector<1x8x32xf32> to vector<1x8xf32>
    %193 = vector.shape_cast %192 : vector<1x8xf32> to vector<1x8x1xf32>
    %cst_103 = arith.constant 3.200000e+01 : f32
    %194 = vector.broadcast %cst_103 : f32 to vector<1x8x1xf32>
    %195 = arith.divf %193, %194 : vector<1x8x1xf32>
    %196 = vector.broadcast %188 : vector<1x8x1xf32> to vector<1x8x32xf32>
    %197 = arith.subf %182, %196 : vector<1x8x32xf32>
    %cst_104 = arith.constant 9.99999974E-6 : f32
    %198 = vector.broadcast %cst_104 : f32 to vector<1x8x1xf32>
    %199 = arith.addf %195, %198 : vector<1x8x1xf32>
    %200 = math.rsqrt %199 : vector<1x8x1xf32>
    %201 = vector.broadcast %200 : vector<1x8x1xf32> to vector<1x8x32xf32>
    %202 = arith.mulf %197, %201 : vector<1x8x32xf32>
    %203 = vector.shape_cast %183 : vector<1x32xf32> to vector<1x1x32xf32>
    %204 = vector.broadcast %203 : vector<1x1x32xf32> to vector<1x8x32xf32>
    %205 = arith.mulf %202, %204 : vector<1x8x32xf32>
    %206 = vector.shape_cast %184 : vector<1x32xf32> to vector<1x1x32xf32>
    %207 = vector.broadcast %206 : vector<1x1x32xf32> to vector<1x8x32xf32>
    %208 = arith.addf %205, %207 : vector<1x8x32xf32>
    %cst_105 = arith.constant 1.000000e+00 : f32
    %209 = vector.broadcast %cst_105 : f32 to vector<1x1x32xf32>
    %210 = arith.addf %209, %6 : vector<1x1x32xf32>
    %211 = vector.broadcast %210 : vector<1x1x32xf32> to vector<1x8x32xf32>
    %212 = arith.mulf %208, %211 : vector<1x8x32xf32>
    %213 = vector.broadcast %5 : vector<1x1x32xf32> to vector<1x8x32xf32>
    %214 = arith.addf %212, %213 : vector<1x8x32xf32>
    %215 = vector.shape_cast %214 : vector<1x8x32xf32> to vector<8x32xf32>
    %216 = arith.truncf %215 : vector<8x32xf32> to vector<8x32xbf16>
    %cst_106 = arith.constant 0.000000e+00 : f32
    %217 = vector.broadcast %cst_106 : f32 to vector<8x32xf32>
    %c0_107 = arith.constant 0 : index
    %c0_108 = arith.constant 0 : index
    %218 = vector.load %arg25[%c0_107, %c0_108] : memref<8x32xf32, #tpu.memory_space<vmem>>, vector<8x32xf32>
    tpu.vector_store %arg25[%c0_107, %c0_108], %217 {strides = array<i32>} : memref<8x32xf32, #tpu.memory_space<vmem>>, vector<8x32xf32>,
    %c0_i32_109 = arith.constant 0 : i32
    %c1_i32_110 = arith.constant 1 : i32
    %219 = arith.muli %c0_i32_109, %c1_i32_110 : i32
    %c0_i32_111 = arith.constant 0 : i32
    %220 = arith.addi %c0_i32_111, %219 : i32
    %c128_i32 = arith.constant 128 : i32
    %221 = arith.muli %220, %c128_i32 : i32
    %222 = tpu.assume_multiple %221, 128 : i32
    %c0_112 = arith.constant 0 : index
    %223 = arith.index_cast %222 : i32 to index
    %224 = vector.load %arg15[%c0_112, %223] : memref<32x128xbf16, #tpu.memory_space<vmem>>, vector<32x128xbf16>
    %c0_113 = arith.constant 0 : index
    %225 = arith.index_cast %222 : i32 to index
    %226 = vector.load %arg16[%c0_113, %225] : memref<1x128xf32, #tpu.memory_space<vmem>>, vector<1x128xf32>
    %cst_114 = arith.constant dense<0.000000e+00> : vector<8x128xf32>
    %227 = tpu.matmul %216, %224, %cst_114 {dimension_numbers = #tpu.dot_dimension_numbers<[1], [0], [0], [1], [0, 0, 1, 1], [], []>} : vector<8x32xbf16>, vector<32x128xbf16>, vector<8x128xf32> -> vector<8x128xf32>
    %228 = vector.broadcast %226 : vector<1x128xf32> to vector<8x128xf32>
    %229 = arith.addf %227, %228 : vector<8x128xf32>
    %cst_115 = arith.constant 5.000000e-01 : f32
    %230 = vector.broadcast %cst_115 : f32 to vector<8x128xf32>
    %231 = arith.mulf %230, %229 : vector<8x128xf32>
    %cst_116 = arith.constant 1.41421354 : f32
    %232 = vector.broadcast %cst_116 : f32 to vector<8x128xf32>
    %233 = arith.divf %229, %232 : vector<8x128xf32>
    %234 = math.erf %233 : vector<8x128xf32>
    %cst_117 = arith.constant 1.000000e+00 : f32
    %235 = vector.broadcast %cst_117 : f32 to vector<8x128xf32>
    %236 = arith.addf %235, %234 : vector<8x128xf32>
    %237 = arith.mulf %231, %236 : vector<8x128xf32>
    %238 = arith.truncf %237 : vector<8x128xf32> to vector<8x128xbf16>
    %239 = arith.index_cast %222 : i32 to index
    %c0_118 = arith.constant 0 : index
    %240 = vector.load %arg17[%239, %c0_118] : memref<128x32xbf16, #tpu.memory_space<vmem>>, vector<128x32xbf16>
    %c0_119 = arith.constant 0 : index
    %c0_120 = arith.constant 0 : index
    %241 = vector.load %arg25[%c0_119, %c0_120] : memref<8x32xf32, #tpu.memory_space<vmem>>, vector<8x32xf32>
    %cst_121 = arith.constant dense<0.000000e+00> : vector<8x32xf32>
    %242 = tpu.matmul %238, %240, %cst_121 {dimension_numbers = #tpu.dot_dimension_numbers<[1], [0], [0], [1], [0, 0, 1, 1], [], []>} : vector<8x128xbf16>, vector<128x32xbf16>, vector<8x32xf32> -> vector<8x32xf32>
    %243 = arith.addf %241, %242 : vector<8x32xf32>
    %c0_122 = arith.constant 0 : index
    %c0_123 = arith.constant 0 : index
    %244 = vector.load %arg25[%c0_122, %c0_123] : memref<8x32xf32, #tpu.memory_space<vmem>>, vector<8x32xf32>
    tpu.vector_store %arg25[%c0_122, %c0_123], %243 {strides = array<i32>} : memref<8x32xf32, #tpu.memory_space<vmem>>, vector<8x32xf32>,
    %c1_i32_124 = arith.constant 1 : i32
    %c0_125 = arith.constant 0 : index
    %c0_126 = arith.constant 0 : index
    %245 = vector.load %arg25[%c0_125, %c0_126] : memref<8x32xf32, #tpu.memory_space<vmem>>, vector<8x32xf32>
    %c0_127 = arith.constant 0 : index
    %c0_128 = arith.constant 0 : index
    %246 = vector.load %arg18[%c0_127, %c0_128] : memref<1x32xf32, #tpu.memory_space<vmem>>, vector<1x32xf32>
    %247 = vector.broadcast %246 : vector<1x32xf32> to vector<8x32xf32>
    %248 = arith.addf %245, %247 : vector<8x32xf32>
    %249 = vector.shape_cast %248 : vector<8x32xf32> to vector<1x8x32xf32>
    %250 = vector.broadcast %7 : vector<1x1x32xf32> to vector<1x8x32xf32>
    %251 = arith.mulf %250, %249 : vector<1x8x32xf32>
    %252 = arith.addf %182, %251 : vector<1x8x32xf32>
    %c0_129 = arith.constant 0 : index
    %c0_130 = arith.constant 0 : index
    %c0_131 = arith.constant 0 : index
    %253 = vector.load %arg19[%c0_129, %c0_130, %c0_131] : memref<1x8x32xf32, #tpu.memory_space<vmem>>, vector<1x8x32xf32>
    tpu.vector_store %arg19[%c0_129, %c0_130, %c0_131], %252 {strides = array<i32>} : memref<1x8x32xf32, #tpu.memory_space<vmem>>, vector<1x8x32xf32>,
    return
  }
  func.func @transform_0(%arg0: i32) -> (i32, i32, i32) {
    %c0_i32 = arith.constant 0 : i32
    %c0_i32_0 = arith.constant 0 : i32
    %c0_i32_1 = arith.constant 0 : i32
    return %arg0, %c0_i32, %c0_i32_0 : i32, i32, i32
  }
  func.func @transform_1(%arg0: i32) -> (i32, i32, i32) {
    %c0_i32 = arith.constant 0 : i32
    %c0_i32_0 = arith.constant 0 : i32
    %c0_i32_1 = arith.constant 0 : i32
    return %arg0, %c0_i32, %c0_i32_0 : i32, i32, i32
  }
  func.func @transform_2(%arg0: i32) -> (i32, i32) {
    %c0_i32 = arith.constant 0 : i32
    %c0_i32_0 = arith.constant 0 : i32
    %c0_i32_1 = arith.constant 0 : i32
    return %c0_i32, %c0_i32_0 : i32, i32
  }
  func.func @transform_3(%arg0: i32) -> (i32, i32) {
    %c0_i32 = arith.constant 0 : i32
    %c0_i32_0 = arith.constant 0 : i32
    %c0_i32_1 = arith.constant 0 : i32
    return %c0_i32, %c0_i32_0 : i32, i32
  }
  func.func @transform_4(%arg0: i32) -> (i32, i32) {
    %c0_i32 = arith.constant 0 : i32
    %c0_i32_0 = arith.constant 0 : i32
    %c0_i32_1 = arith.constant 0 : i32
    return %c0_i32, %c0_i32_0 : i32, i32
  }
  func.func @transform_5(%arg0: i32) -> (i32, i32) {
    %c0_i32 = arith.constant 0 : i32
    %c0_i32_0 = arith.constant 0 : i32
    %c0_i32_1 = arith.constant 0 : i32
    return %c0_i32, %c0_i32_0 : i32, i32
  }
  func.func @transform_6(%arg0: i32) -> (i32, i32) {
    %c0_i32 = arith.constant 0 : i32
    %c0_i32_0 = arith.constant 0 : i32
    %c0_i32_1 = arith.constant 0 : i32
    return %c0_i32, %c0_i32_0 : i32, i32
  }
  func.func @transform_7(%arg0: i32) -> (i32, i32) {
    %c0_i32 = arith.constant 0 : i32
    %c0_i32_0 = arith.constant 0 : i32
    %c0_i32_1 = arith.constant 0 : i32
    return %c0_i32, %c0_i32_0 : i32, i32
  }
  func.func @transform_8(%arg0: i32) -> (i32, i32) {
    %c0_i32 = arith.constant 0 : i32
    %c0_i32_0 = arith.constant 0 : i32
    %c0_i32_1 = arith.constant 0 : i32
    return %c0_i32, %c0_i32_0 : i32, i32
  }
  func.func @transform_9(%arg0: i32) -> (i32, i32) {
    %c0_i32 = arith.constant 0 : i32
    %c0_i32_0 = arith.constant 0 : i32
    %c0_i32_1 = arith.constant 0 : i32
    return %c0_i32, %c0_i32_0 : i32, i32
  }
  func.func @transform_10(%arg0: i32) -> (i32, i32) {
    %c0_i32 = arith.constant 0 : i32
    %c0_i32_0 = arith.constant 0 : i32
    %c0_i32_1 = arith.constant 0 : i32
    return %c0_i32, %c0_i32_0 : i32, i32
  }
  func.func @transform_11(%arg0: i32) -> (i32, i32) {
    %c0_i32 = arith.constant 0 : i32
    %c0_i32_0 = arith.constant 0 : i32
    %c0_i32_1 = arith.constant 0 : i32
    return %c0_i32, %c0_i32_0 : i32, i32
  }
  func.func @transform_12(%arg0: i32) -> (i32, i32) {
    %c0_i32 = arith.constant 0 : i32
    %c0_i32_0 = arith.constant 0 : i32
    %c0_i32_1 = arith.constant 0 : i32
    return %c0_i32, %c0_i32_0 : i32, i32
  }
  func.func @transform_13(%arg0: i32) -> (i32, i32) {
    %c0_i32 = arith.constant 0 : i32
    %c0_i32_0 = arith.constant 0 : i32
    %c0_i32_1 = arith.constant 0 : i32
    return %c0_i32, %c0_i32_0 : i32, i32
  }
  func.func @transform_14(%arg0: i32) -> (i32, i32) {
    %c0_i32 = arith.constant 0 : i32
    %c0_i32_0 = arith.constant 0 : i32
    %c0_i32_1 = arith.constant 0 : i32
    return %c0_i32, %c0_i32_0 : i32, i32
  }
  func.func @transform_15(%arg0: i32) -> (i32, i32) {
    %c0_i32 = arith.constant 0 : i32
    %c0_i32_0 = arith.constant 0 : i32
    %c0_i32_1 = arith.constant 0 : i32
    return %c0_i32, %c0_i32_0 : i32, i32
  }
  func.func @transform_16(%arg0: i32) -> (i32, i32) {
    %c0_i32 = arith.constant 0 : i32
    %c0_i32_0 = arith.constant 0 : i32
    %c0_i32_1 = arith.constant 0 : i32
    return %c0_i32, %c0_i32_0 : i32, i32
  }
  func.func @transform_17(%arg0: i32) -> (i32, i32) {
    %c0_i32 = arith.constant 0 : i32
    %c0_i32_0 = arith.constant 0 : i32
    %c0_i32_1 = arith.constant 0 : i32
    return %c0_i32, %c0_i32_0 : i32, i32
  }
  func.func @transform_18(%arg0: i32) -> (i32, i32, i32) {
    %c0_i32 = arith.constant 0 : i32
    %c0_i32_0 = arith.constant 0 : i32
    %c0_i32_1 = arith.constant 0 : i32
    return %arg0, %c0_i32, %c0_i32_0 : i32, i32, i32
  }
}

</mosaic_0001>

<bundles_post_ra>
// kernel: tpu_custom_call.1
= control target key start
LH: loop header
LB: loop body
LE: loop exit
PB: predicated region body
PF: predicated region fallthrough
CT: control target
= control target key end

     0   :  { %s3461_s0 = inlined_call_operand.vmem [shape: f32[2,8,32], index: 0, kind: input, shape index: {}]   ;;  %s3462_s1 = inlined_call_operand.vmem [shape: f32[2,6,32], index: 1, kind: input, shape index: {}]   ;;  %s3463_s2 = inlined_call_operand.vmem [shape: f32[1,32], index: 2, kind: input, shape index: {}]   ;;  %s3464_s3 = inlined_call_operand.vmem [shape: f32[1,32], index: 3, kind: input, shape index: {}]   ;;  %s3465_s4 = inlined_call_operand.vmem [shape: f32[1,32], index: 4, kind: input, shape index: {}]   ;;  %s3466_s5 = inlined_call_operand.vmem [shape: f32[1,32], index: 5, kind: input, shape index: {}]   ;;  %s3467_s6 = inlined_call_operand.vmem [shape: bf16[32,96], index: 6, kind: input, shape index: {}]   ;;  %s3468_s7 = inlined_call_operand.vmem [shape: f32[1,96], index: 7, kind: input, shape index: {}]   ;;  %s3469_s8 = inlined_call_operand.vmem [shape: f32[1,8], index: 8, kind: input, shape index: {}]   ;;  %s3470_s9 = inlined_call_operand.vmem [shape: f32[1,8], index: 9, kind: input, shape index: {}]   ;;  %s3471_s10 = inlined_call_operand.vmem [shape: f32[1,8], index: 10, kind: input, shape index: {}]   ;;  %s3472_s11 = inlined_call_operand.vmem [shape: f32[1,8], index: 11, kind: input, shape index: {}]   ;;  %s3473_s12 = inlined_call_operand.vmem [shape: bf16[32,32], index: 12, kind: input, shape index: {}]   ;;  %s3474_s13 = inlined_call_operand.vmem [shape: f32[1,32], index: 13, kind: input, shape index: {}]   ;;  %s3475_s14 = inlined_call_operand.vmem [shape: bf16[32,128], index: 14, kind: input, shape index: {}]   ;;  %s3476_s15 = inlined_call_operand.vmem [shape: f32[1,128], index: 15, kind: input, shape index: {}]   ;;  %s3477_s16 = inlined_call_operand.vmem [shape: bf16[128,32], index: 16, kind: input, shape index: {}]   ;;  %s3478_s17 = inlined_call_operand.vmem [shape: f32[1,32], index: 17, kind: input, shape index: {}]   ;;  %s3479_s18 = inlined_call_operand.hbm [shape: f32[2,8,32], index: 18, kind: output, shape index: {}]  }
   0x1   :  { %3483 = sst [smem:[#allocation14_spill]] %s3461_s0 }
   0x2   :  { %3484 = sst [smem:[#allocation15_spill]] %s3462_s1 }
   0x3   :  { %3485 = sst [smem:[#allocation16_spill]] %s3463_s2 }
   0x4   :  { %3486 = sst [smem:[#allocation17_spill]] %s3464_s3 }
   0x5   :  { %3487 = sst [smem:[#allocation18_spill]] %s3465_s4 }
   0x6   :  { %3488 = sst [smem:[#allocation19_spill]] %s3467_s6 }
   0x7   :  { %23 = vsyncpa [#allocation9], 0 }
   0x8   :  { %25 = vsyncpa [#allocation9 + $0x1], 0  ;;  %s2908_s27 = smov 0   ;;  %s2910_s28 = smov 0  }
   0x9   :  { %s2912_s29 = smov 0   ;;  %s2914_s30 = smov 0  }
   0xa LB: > { %3489 = sst [smem:[#allocation11_spill]] %s2791_s29  ;;  %s2929_s0 = sadd.s32 4294967295, %s2795_s30   ;;  %s2795_s30 = sphi %s2914_s30, %s3500_s30   ;;  %s2791_s29 = sphi %s2912_s29, %s3502_s29   ;;  %s2787_s28 = sphi %s2910_s28, %s3504_s28   ;;  %s2783_s27 = sphi %s2908_s27, %s3503_s27  }
   0xb   : > { %s2433_s19 = sadd.s32 4294967294, %s2795_s30   ;;  %s2933_s1 = sadd.s32 1, %s2795_s30  }
   0xc   : > { %3490 = sst [smem:[#allocation12_spill]] %s2933_s1  ;;  %s426_s20 = sadd.s32 1, %s2791_s29 }
   0xd   : > { %s423_s21 = ssub.s32 %s2795_s30, %s2933_s1  ;;  %p436_p0 = scmp.ne.s32.totalorder %s2791_s29, %s2787_s28 }
   0xe   : > { %p424_p1 = scmp.eq.s32.totalorder %s423_s21, 0  ;;  %p437_p2 = scmp.eq.s32.totalorder %s2929_s0, 1 }
   0xf   : > { %p442_p3 = scmp.ne.s32.totalorder %s2787_s28, %s2783_s27  ;;  %p443_p4 = scmp.eq.s32.totalorder %s2433_s19, 1 }
  0x10   : > { %s2944_s22 = scalar_select %p424_p1, %s2791_s29, %s426_s20  }
  0x11   : > { %p2946_p5 = por %p437_p2, %p436_p0  ;;  %p2950_p6 = por %p443_p4, %p442_p3 }
  0x12   : > { %3491 = sst [smem:[#allocation13_spill]] %s2944_s22  ;;  %p2436_p7 = scmp.ge.s32.totalorder %s2795_s30, 1 }
  0x13   : > { %p523_p8 = scmp.lt.s32.totalorder %s2795_s30, 3 }
  0x15   : > { %p524_p9 = pnand %p2436_p7, %p523_p8 }
  0x16   : > { %p580_p10 = scmp.lt.s32.totalorder (!%p524_p9), %s2929_s0, 1  ;;  %s3494_s20 = sld [smem:[#allocation14_spill]] (!%p524_p9) }
  0x17   : > { %527 = sbr.rel (%p524_p9) target bundleno = 3000 (0xbb8), region = 92  ;;  %s3495_s6 = sld [smem:[#allocation19_spill]] (!%p524_p9) }
  0x18   : > { %s3497_s1 = sld [smem:[#allocation16_spill]] (!%p524_p9)  ;;  %s2799_s29 = smov (!%p524_p9), 104  }
  0x19   : > { %s3498_s3 = sld [smem:[#allocation17_spill]] (!%p524_p9)  ;;  %s2800_s22 = smov (!%p524_p9), 120  }
  0x1a   : > { %s2802_s19 = smov (!%p524_p9), 96   ;;  %s3499_s4 = sld [smem:[#allocation18_spill]] (!%p524_p9) }
  0x1c   : > { %s2958_s24 = scalar_select %p580_p10, %s2929_s0, 1  ;;  %vm593_vm0 = vcmask 261120   ;;  %v2797_v8 = vmov 0.0   ;;  %vm2798_vm1 = vmmov 0   ;;  %v623_v13 = vlaneseq  ;;  %v2442_v30 = vld [vmem:[%s3468_s7] ss:$0 sm:$0xff] }
  0x1d   : > { %v2673_v7 = vld [vmem:[%s3495_s6 + $0x8] sm:$0xff]   ;;  %2525 = vmatprep.subr.bf16.mxu0 %v2797_v8  ;;  %2151 = vst.msk [vmem:[#allocation7] sm:$0xff] %vm593_vm0, %v2797_v8  ;;  %2529 = vmatprep.mubr.msk.bf16.mxu0 %vm2798_vm1, %v2797_v8  ;;  %v2674_v9 = vld [vmem:[%s3495_s6] sm:$0xff]   ;;  %vm1150_vm2 = vcmask 64512   ;;  %v2803_v39 = vmov 1983009808  }
  0x1e   : > { %s2438_s25 = sshll.u32 %s2958_s24, 3  ;;  %2526 = vmatpush3.bf16.msra.mxu0 %v2673_v7  ;;  %2545 = vmatprep.subr.bf16.mxu1 %v2797_v8  ;;  %v2995_v14 = vshrl.u32 %v623_v13, 7  ;;  %v2440_v19 = vld [vmem:[%s3497_s1] ss:$0 sm:$0xff]  ;;  %1324 = vst.msk [vmem:[#allocation6] sm:$0xff] %vm1150_vm2, %v2797_v8  ;;  %1325 = vst.msk [vmem:[#allocation6 + $0x8] sm:$0xff] %vm1150_vm2, %v2797_v8  ;;  %v713_v40 = vunpack.c.l.s4 %v2803_v39 }
  0x1f   : > { %s2966_s21 = scalar_lea.vmem %s3494_s20, %s2438_s25  ;;  %2527 = vmatprep.subr.bf16.mxu0 %v2797_v8  ;;  %2547 = vmatprep.mubr.msk.bf16.mxu1 %vm2798_vm1, %v2797_v8  ;;  %s3496_s20 = sld [smem:[#allocation15_spill]]  ;;  %v2441_v22 = vld [vmem:[%s3498_s3] ss:$0 sm:$0xff]  ;;  %1326 = vst.msk [vmem:[#allocation6 + $0x10] sm:$0xff] %vm1150_vm2, %v2797_v8  ;;  %1327 = vst.msk [vmem:[#allocation6 + $0x18] sm:$0xff] %vm1150_vm2, %v2797_v8  ;;  %vm1306_vm3 = vcmask 60416  }
  0x20   : > { %v589_v0 = vld [vmem:[%s2966_s21] sm:$0xff]  ;;  %v625_v17 = vsub.s32 1, %v2995_v14  ;;  %v630_v21 = vsub.s32 0, %v2995_v14  ;;  %v714_v41 = vunpack.c.0.s8 %v713_v40  ;;  %v2804_v42 = vmov 1934713408   ;;  %s2808_s24 = smov 64  }
  0x21   : > { %v594_v1 = vsel %vm593_vm0, %v589_v0, 0.0  ;;  %v745_v43 = vunpack.c.l.s4 %v2804_v42  ;;  %vm1315_vm4 = vcmask 7168   ;;  %vm1655_vm6 = vcmask 1043456   ;;  %s2812_s3 = smov [#allocation8]  }
  0x22   : > { %595 = vadd.xlane.f32.xlu0 %v594_v1  ;;  %2528 = vmatpush3.bf16.msra.mxu0 %v2674_v9  ;;  %v3043_v46 = vsub.s32 %v714_v41, %v2995_v14  ;;  %1320 = vst.msk [vmem:[#allocation5] sm:$0xff] %vm1315_vm4, %v2797_v8  ;;  %1321 = vst.msk [vmem:[#allocation5 + $0x8] sm:$0xff] %vm1315_vm4, %v2797_v8  ;;  %vm2034_vm7 = vcmask 130048   ;;  %vm2036_vm8 = vcmask 195584  }
  0x23   : > { %2533 = vmatprep.subr.bf16.mxu0 %v2797_v8  ;;  %v746_v50 = vunpack.c.0.s8 %v745_v43  ;;  %1322 = vst.msk [vmem:[#allocation5 + $0x10] sm:$0xff] %vm1315_vm4, %v2797_v8  ;;  %1323 = vst.msk [vmem:[#allocation5 + $0x18] sm:$0xff] %vm1315_vm4, %v2797_v8 }
  0x25   : > { %s2992_s26 = scalar_lea.vmem %s3496_s20, %s2438_s25  ;;  %s2801_s20 = smov 112   ;;  %v3054_v56 = vsub.s32 %v746_v50, %v2995_v14 }
  0x26   : > { %v590_v15 = vld [vmem:[%s2992_s26] sm:$0x3f] }
  0x27   : > { %v2998_v16 = vadd.f32 1.0, %v590_v15  ;;  %v631_v26 = vrot.slane %v590_v15, %v630_v21 }
  0x29   : > { %v626_v24 = vrot.slane %v2998_v16, %v625_v17 }
  0xab   : > { %v596_v2 = vpop.xlane.xlu0 %595 }
  0xac   : > { %v598_v3 = vmul.f32 0.03125, %v596_v2 }
  0xae   : > { %v599_v4 = vsub.f32 %v589_v0, %v598_v3 }
  0xb0   : > { %v600_v5 = vmul.f32 %v599_v4, %v599_v4 }
  0xb2   : > { %v601_v6 = vsel %vm593_vm0, %v600_v5, 0.0 }
  0xb3   : > { %602 = vadd.xlane.f32.xlu0 %v601_v6 }
 0x13c   : > { %v603_v10 = vpop.xlane.xlu0 %602 }
 0x13d   : > { %v604_v11 = vmul.f32 0.03125, %v603_v10 }
 0x13f   : > { %v605_v12 = vadd.f32 1e-05, %v604_v11 }
 0x141   : > { %2687 = vrsqrt.f32 %v605_v12 }
 0x14e   : > { %v2688_v18 = vpop.eup %2687 }
 0x14f   : > { %v607_v20 = vmul.f32 %v2688_v18, %v599_v4 }
 0x151   : > { %v614_v23 = vmul.f32 %v2440_v19, %v607_v20 }
 0x153   : > { %v621_v25 = vadd.f32 %v2441_v22, %v614_v23 }
 0x155   : > { %v627_v27 = vmul.f32 %v626_v24, %v621_v25 }
 0x157   : > { %v632_v28 = vadd.f32 %v631_v26, %v627_v27 }
 0x159   : > { %v633_v29 = vpack.c.bf16 %v632_v28, %v632_v28 }
 0x15b   : > { %2530 = vmatmul.mubr.msk.bf16.vlgmr.msra.gmra.mxu0 %vm593_vm0, %v633_v29 }
 0x15c   : > { %2535 = vmatprep.mubr.msk.bf16.mxu0 %vm2798_vm1, %v2797_v8 }
 0x21b   : > { %v694_v31 = vpop.f32.mrf.mxu0 }
 0x21c   : > { %v3015_v32 = vadd.f32 %v2442_v30, %v694_v31 }
 0x21d   : > { %v2531_v33 = vpop.f32.mrf.mxu0 }
 0x21e   : > { %707 = vrot.lane.b32.xlu0 %v3015_v32, %s2799_s29  ;;  %701 = vrot.lane.b32.xlu1 %v3015_v32, %s2800_s22  ;;  %s2809_s22 = smov 16  }
 0x21f   : > { %v697_v34 = vpop.f32.mrf.mxu0 }
 0x221   : > { %v2532_v35 = vpop.f32.mrf.mxu0 }
 0x222   : > { %704 = vrot.lane.b32.xlu1 %v3015_v32, %s2801_s20  ;;  %s2810_s20 = smov 8  }
 0x226   : > { %778 = vrot.lane.b32.xlu1 %v3015_v32, %s2802_s19 }
 0x290   : > { %v3029_v36 = vpop.permute.xlu1 %701  ;;  %v3035_v38 = vpop.permute.xlu0 %707 }
 0x291   : > { %780 = vrot.lane.b32.xlu1 %v3029_v36, %s2802_s19  ;;  %v726_v47 = vcombine.low %v3029_v36, %v3035_v38  ;;  %v727_v48 = vcombine.high %v3029_v36, %v3035_v38 }
 0x293   : > { %v734_v53 = vrot.slane %v726_v47, %v3043_v46  ;;  %v741_v54 = vrot.slane %v727_v48, %v3043_v46 }
 0x294   : > { %v3032_v37 = vpop.permute.xlu1 %704 }
 0x295   : > { %782 = vrot.lane.b32.xlu1 %v3032_v37, %s2802_s19  ;;  %v710_v44 = vcombine.low %v3015_v32, %v3032_v37  ;;  %v711_v45 = vcombine.high %v3015_v32, %v3032_v37 }
 0x297   : > { %v718_v51 = vrot.slane %v710_v44, %v3043_v46  ;;  %v725_v52 = vrot.slane %v711_v45, %v3043_v46 }
 0x298   : > { %v779_v49 = vpop.permute.xlu1 %778 }
 0x299   : > { %784 = vrot.lane.b32.xlu1 %v3035_v38, %s2802_s19  ;;  %v742_v57 = vcombine.low %v718_v51, %v734_v53  ;;  %v743_v58 = vcombine.high %v718_v51, %v734_v53  ;;  %v758_v59 = vcombine.low %v725_v52, %v741_v54  ;;  %v759_v60 = vcombine.high %v725_v52, %v741_v54  ;;  %s2811_s19 = smov 24  }
 0x29b   : > { %v750_v62 = vrot.slane %v742_v57, %v3054_v56  ;;  %v757_v63 = vrot.slane %v743_v58, %v3054_v56  ;;  %v766_v0 = vrot.slane %v758_v59, %v3054_v56  ;;  %v773_v1 = vrot.slane %v759_v60, %v3054_v56 }
 0x29d   : > { %v946_v7 = vcombine.low %v750_v62, %v757_v63  ;;  %v2446_v9 = vcombine.high %v750_v62, %v757_v63  ;;  %v962_v10 = vcombine.low %v766_v0, %v773_v1  ;;  %v2447_v11 = vcombine.high %v766_v0, %v773_v1 }
 0x29f   : > { %v953_v23 = vrot.slane %v946_v7, %v3043_v46  ;;  %v961_v24 = vrot.slane %v2446_v9, %v3043_v46  ;;  %v969_v25 = vrot.slane %v962_v10, %v3043_v46  ;;  %v977_v26 = vrot.slane %v2447_v11, %v3043_v46 }
 0x2a1   : > { %v978_v39 = vcombine.low %v953_v23, %v961_v24  ;;  %v994_v40 = vcombine.low %v969_v25, %v977_v26  ;;  %v979_v59 = vcombine.high %v953_v23, %v961_v24  ;;  %v995_v60 = vcombine.high %v969_v25, %v977_v26 }
 0x2a3   : > { %v986_v50 = vrot.slane %v978_v39, %v3054_v56  ;;  %v1002_v51 = vrot.slane %v994_v40, %v3054_v56  ;;  %v993_v1 = vrot.slane %v979_v59, %v3054_v56 }
 0x2a5   : > { %v1010_v0 = vcombine.low %v986_v50, %v1002_v51 }
 0x303   : > { %v781_v55 = vpop.permute.xlu1 %780 }
 0x307   : > { %v783_v61 = vpop.permute.xlu1 %782 }
 0x308   : > { %v790_v2 = vcombine.low %v779_v49, %v783_v61  ;;  %v791_v3 = vcombine.high %v779_v49, %v783_v61 }
 0x30a   : > { %v798_v12 = vrot.slane %v790_v2, %v3043_v46  ;;  %v805_v15 = vrot.slane %v791_v3, %v3043_v46  ;;  %v1009_v2 = vrot.slane %v995_v60, %v3054_v56 }
 0x30b   : > { %v785_v4 = vpop.permute.xlu1 %784 }
 0x30c   : > { %v806_v5 = vcombine.low %v781_v55, %v785_v4  ;;  %v807_v6 = vcombine.high %v781_v55, %v785_v4  ;;  %v1151_v4 = vsel %vm1150_vm2, %v1010_v0, 0.0  ;;  %v1013_v10 = vcombine.high %v993_v1, %v1009_v2 }
 0x30d   : > { %v1012_v11 = vcombine.low %v993_v1, %v1009_v2 }
 0x30e   : > { %v814_v17 = vrot.slane %v806_v5, %v3043_v46  ;;  %v821_v18 = vrot.slane %v807_v6, %v3043_v46  ;;  %v1011_v5 = vcombine.high %v986_v50, %v1002_v51 }
 0x310   : > { %v822_v19 = vcombine.low %v798_v12, %v814_v17  ;;  %v823_v20 = vcombine.high %v798_v12, %v814_v17  ;;  %v838_v21 = vcombine.low %v805_v15, %v821_v18  ;;  %v839_v22 = vcombine.high %v805_v15, %v821_v18 }
 0x311   : > { %v1154_v7 = vsel %vm1150_vm2, %v1011_v5, 0.0  ;;  %v1160_v12 = vsel %vm1150_vm2, %v1013_v10, 0.0  ;;  %v1157_v15 = vsel %vm1150_vm2, %v1012_v11, 0.0 }
 0x312   : > { %v830_v27 = vrot.slane %v822_v19, %v3054_v56  ;;  %v837_v28 = vrot.slane %v823_v20, %v3054_v56  ;;  %v846_v29 = vrot.slane %v838_v21, %v3054_v56  ;;  %v853_v30 = vrot.slane %v839_v22, %v3054_v56 }
 0x314   : > { %v1014_v31 = vcombine.low %v830_v27, %v837_v28  ;;  %v2448_v33 = vcombine.high %v830_v27, %v837_v28  ;;  %v1030_v34 = vcombine.low %v846_v29, %v853_v30  ;;  %v2449_v35 = vcombine.high %v846_v29, %v853_v30 }
 0x316   : > { %v1021_v41 = vrot.slane %v1014_v31, %v3043_v46  ;;  %v1029_v42 = vrot.slane %v2448_v33, %v3043_v46  ;;  %v1037_v43 = vrot.slane %v1030_v34, %v3043_v46  ;;  %v1045_v44 = vrot.slane %v2449_v35, %v3043_v46 }
 0x318   : > { %v1046_v45 = vcombine.low %v1021_v41, %v1029_v42  ;;  %v1062_v47 = vcombine.low %v1037_v43, %v1045_v44  ;;  %v1047_v48 = vcombine.high %v1021_v41, %v1029_v42  ;;  %v1063_v49 = vcombine.high %v1037_v43, %v1045_v44 }
 0x31a   : > { %v1054_v52 = vrot.slane %v1046_v45, %v3054_v56  ;;  %v1070_v53 = vrot.slane %v1062_v47, %v3054_v56  ;;  %v1061_v54 = vrot.slane %v1047_v48, %v3054_v56  ;;  %v1077_v55 = vrot.slane %v1063_v49, %v3054_v56 }
 0x31c   : > { %v1079_v57 = vcombine.high %v1054_v52, %v1070_v53  ;;  %v1078_v58 = vcombine.low %v1054_v52, %v1070_v53  ;;  %v1080_v63 = vcombine.low %v1061_v54, %v1077_v55  ;;  %v1081_v6 = vcombine.high %v1061_v54, %v1077_v55 }
 0x31e   : > { %v1233_v61 = vsel %vm1150_vm2, %v1079_v57, 0.0  ;;  %v1230_v62 = vsel %vm1150_vm2, %v1078_v58, 0.0  ;;  %v1236_v3 = vsel %vm1150_vm2, %v1080_v63, 0.0  ;;  %v1239_v9 = vsel %vm1150_vm2, %v1081_v6, 0.0 }
 0x31f   : > { %1234 = vadd.xlane.f32.xlu0 %v1233_v61  ;;  %1231 = vadd.xlane.f32.xlu1 %v1230_v62 }
 0x323   : > { %1237 = vadd.xlane.f32.xlu0 %v1236_v3  ;;  %1152 = vadd.xlane.f32.xlu1 %v1151_v4 }
 0x327   : > { %1155 = vadd.xlane.f32.xlu0 %v1154_v7  ;;  %1240 = vadd.xlane.f32.xlu1 %v1239_v9 }
 0x32b   : > { %1161 = vadd.xlane.f32.xlu0 %v1160_v12  ;;  %1158 = vadd.xlane.f32.xlu1 %v1157_v15 }
 0x3a8   : > { %v1235_v17 = vpop.xlane.xlu0 %1234  ;;  %v1232_v18 = vpop.xlane.xlu1 %1231 }
 0x3a9   : > { %v1243_v19 = vmul.f32 0.125, %v1235_v17  ;;  %v1242_v20 = vmul.f32 0.125, %v1232_v18 }
 0x3ab   : > { %v3092_v21 = vsub.f32 %v1079_v57, %v1243_v19  ;;  %v3094_v22 = vsub.f32 %v1078_v58, %v1242_v20 }
 0x3ac   : > { %v1238_v23 = vpop.xlane.xlu0 %1237  ;;  %v1153_v24 = vpop.xlane.xlu1 %1152 }
 0x3ad   : > { %v1244_v25 = vmul.f32 0.125, %v1238_v23  ;;  %v1164_v26 = vmul.f32 0.125, %v1153_v24  ;;  %v1251_v27 = vmul.f32 %v3092_v21, %v3092_v21  ;;  %v1250_v28 = vmul.f32 %v3094_v22, %v3094_v22 }
 0x3af   : > { %v3100_v29 = vsub.f32 %v1080_v63, %v1244_v25  ;;  %v3102_v30 = vsub.f32 %v1010_v0, %v1164_v26  ;;  %v1257_v31 = vsel %vm1150_vm2, %v1251_v27, 0.0  ;;  %v1254_v33 = vsel %vm1150_vm2, %v1250_v28, 0.0  ;;  %v2456_v26 = vld [vmem:[%s3471_s10] ss:$0 sm:$0xff] }
 0x3b0   : > { %1258 = vadd.xlane.f32.xlu0 %v1257_v31  ;;  %v1156_v34 = vpop.xlane.xlu0 %1155  ;;  %1255 = vadd.xlane.f32.xlu1 %v1254_v33  ;;  %v1241_v35 = vpop.xlane.xlu1 %1240 }
 0x3b1   : > { %v1165_v39 = vmul.f32 0.125, %v1156_v34  ;;  %v1245_v40 = vmul.f32 0.125, %v1241_v35  ;;  %v1252_v41 = vmul.f32 %v3100_v29, %v3100_v29  ;;  %v1172_v42 = vmul.f32 %v3102_v30, %v3102_v30  ;;  %v2457_v34 = vld [vmem:[%s3472_s11] ss:$0 sm:$0xff] }
 0x3b3   : > { %v3110_v43 = vsub.f32 %v1011_v5, %v1165_v39  ;;  %v3112_v44 = vsub.f32 %v1081_v6, %v1245_v40  ;;  %v1260_v45 = vsel %vm1150_vm2, %v1252_v41, 0.0  ;;  %v1176_v47 = vsel %vm1150_vm2, %v1172_v42, 0.0 }
 0x3b4   : > { %1261 = vadd.xlane.f32.xlu0 %v1260_v45  ;;  %v1162_v48 = vpop.xlane.xlu0 %1161  ;;  %1177 = vadd.xlane.f32.xlu1 %v1176_v47  ;;  %v1159_v49 = vpop.xlane.xlu1 %1158 }
 0x3b5   : > { %v1167_v50 = vmul.f32 0.125, %v1162_v48  ;;  %v1166_v51 = vmul.f32 0.125, %v1159_v49  ;;  %v1173_v52 = vmul.f32 %v3110_v43, %v3110_v43  ;;  %v1253_v53 = vmul.f32 %v3112_v44, %v3112_v44 }
 0x3b7   : > { %v3120_v54 = vsub.f32 %v1013_v10, %v1167_v50  ;;  %v3122_v55 = vsub.f32 %v1012_v11, %v1166_v51  ;;  %v1179_v57 = vsel %vm1150_vm2, %v1173_v52, 0.0  ;;  %v1263_v58 = vsel %vm1150_vm2, %v1253_v53, 0.0 }
 0x3b8   : > { %1180 = vadd.xlane.f32.xlu0 %v1179_v57  ;;  %1264 = vadd.xlane.f32.xlu1 %v1263_v58 }
 0x3b9   : > { %v1175_v59 = vmul.f32 %v3120_v54, %v3120_v54  ;;  %v1174_v60 = vmul.f32 %v3122_v55, %v3122_v55 }
 0x3bb   : > { %v1185_v61 = vsel %vm1150_vm2, %v1175_v59, 0.0  ;;  %v1182_v62 = vsel %vm1150_vm2, %v1174_v60, 0.0 }
 0x3bc   : > { %1186 = vadd.xlane.f32.xlu0 %v1185_v61  ;;  %1183 = vadd.xlane.f32.xlu1 %v1182_v62  ;;  %v2454_v61 = vld [vmem:[%s3469_s8] ss:$0 sm:$0xff] }
 0x439   : > { %v1259_v63 = vpop.xlane.xlu0 %1258  ;;  %v1256_v0 = vpop.xlane.xlu1 %1255 }
 0x43a   : > { %v1267_v1 = vmul.f32 0.125, %v1259_v63  ;;  %v1266_v2 = vmul.f32 0.125, %v1256_v0 }
 0x43c   : > { %v1271_v3 = vadd.f32 1e-05, %v1267_v1  ;;  %v1270_v4 = vadd.f32 1e-05, %v1266_v2 }
 0x43d   : > { %v1262_v5 = vpop.xlane.xlu0 %1261  ;;  %v1178_v6 = vpop.xlane.xlu1 %1177 }
 0x43e   : > { %2689 = vrsqrt.f32 %v1271_v3  ;;  %v1268_v7 = vmul.f32 0.125, %v1262_v5  ;;  %v1188_v9 = vmul.f32 0.125, %v1178_v6 }
 0x43f   : > { %2691 = vrsqrt.f32 %v1270_v4 }
 0x440   : > { %v1272_v10 = vadd.f32 1e-05, %v1268_v7  ;;  %v1192_v12 = vadd.f32 1e-05, %v1188_v9 }
 0x441   : > { %v1265_v11 = vpop.xlane.xlu1 %1264  ;;  %v1181_v17 = vpop.xlane.xlu0 %1180 }
 0x442   : > { %2693 = vrsqrt.f32 %v1272_v10  ;;  %v1269_v15 = vmul.f32 0.125, %v1265_v11  ;;  %v1189_v23 = vmul.f32 0.125, %v1181_v17 }
 0x443   : > { %2695 = vrsqrt.f32 %v1192_v12 }
 0x444   : > { %v1273_v18 = vadd.f32 1e-05, %v1269_v15  ;;  %v1193_v27 = vadd.f32 1e-05, %v1189_v23 }
 0x445   : > { %v1184_v19 = vpop.xlane.xlu1 %1183  ;;  %v1187_v33 = vpop.xlane.xlu0 %1186 }
 0x446   : > { %v1190_v20 = vmul.f32 0.125, %v1184_v19  ;;  %2697 = vrsqrt.f32 %v1273_v18  ;;  %v1191_v42 = vmul.f32 0.125, %v1187_v33 }
 0x448   : > { %v1194_v24 = vadd.f32 1e-05, %v1190_v20  ;;  %v1195_v52 = vadd.f32 1e-05, %v1191_v42 }
 0x44a   : > { %2699 = vrsqrt.f32 %v1194_v24 }
 0x44b   : > { %v2690_v25 = vpop.eup %2689  ;;  %2701 = vrsqrt.f32 %v1193_v27  ;;  %v2805_v27 = vmov -inf  }
 0x44c   : > { %v2692_v28 = vpop.eup %2691  ;;  %v1279_v31 = vmul.f32 %v2690_v25, %v3092_v21  ;;  %2703 = vrsqrt.f32 %v1195_v52  ;;  %1316 = vst.msk [vmem:[#allocation4] sm:$0xff] %vm1315_vm4, %v2805_v27  ;;  %1317 = vst.msk [vmem:[#allocation4 + $0x8] sm:$0xff] %vm1315_vm4, %v2805_v27 }
 0x44d   : > { %v1278_v35 = vmul.f32 %v2692_v28, %v3094_v22  ;;  %1318 = vst.msk [vmem:[#allocation4 + $0x10] sm:$0xff] %vm1315_vm4, %v2805_v27  ;;  %1319 = vst.msk [vmem:[#allocation4 + $0x18] sm:$0xff] %vm1315_vm4, %v2805_v27  ;;  %v1331_v28 = vand.u32 127, %v623_v13 }
 0x44e   : > { %v1289_v39 = vmul.f32 %v2456_v26, %v1279_v31  ;;  %v2806_v31 = vmov -1e+30  }
 0x44f   : > { %v2694_v40 = vpop.eup %2693  ;;  %v1288_v41 = vmul.f32 %v2456_v26, %v1278_v35  ;;  %vm1342_vm5 = vcmp.ge.s32.totalorder %v2995_v14, %v1331_v28 }
 0x450   : > { %v1299_v45 = vadd.f32 %v2457_v34, %v1289_v39  ;;  %v1280_v47 = vmul.f32 %v2694_v40, %v3100_v29  ;;  %v2696_v21 = vpop.eup %2695  ;;  %v1343_v33 = vsel %vm1342_vm5, 0.0, %v2806_v31 }
 0x451   : > { %v1298_v48 = vadd.f32 %v2457_v34, %v1288_v41  ;;  %v1200_v59 = vmul.f32 %v2696_v21, %v3102_v30  ;;  %v2455_v30 = vld [vmem:[%s3470_s9] ss:$0 sm:$0xff] }
 0x452   : > { %v1303_v49 = vpack.c.bf16 %v1299_v45, %v1299_v45  ;;  %v1290_v50 = vmul.f32 %v2456_v26, %v1280_v47 }
 0x453   : > { %v1302_v51 = vpack.c.bf16 %v1298_v48, %v1298_v48  ;;  %v2698_v53 = vpop.eup %2697  ;;  %v1210_v1 = vmul.f32 %v2454_v61, %v1200_v59 }
 0x454   : > { %1308 = vst.msk [vmem:[#allocation2 + $0x4] sm:$0xf] %vm1306_vm3, %v1303_v49  ;;  %v1300_v57 = vadd.f32 %v2457_v34, %v1290_v50  ;;  %v1281_v22 = vmul.f32 %v2698_v53, %v3112_v44 }
 0x455   : > { %1307 = vst.msk [vmem:[#allocation2] sm:$0xf] %vm1306_vm3, %v1302_v51  ;;  %v1220_v7 = vadd.f32 %v2455_v30, %v1210_v1 }
 0x456   : > { %v1304_v58 = vpack.c.bf16 %v1300_v57, %v1300_v57  ;;  %v1291_v60 = vmul.f32 %v2456_v26, %v1281_v22 }
 0x457   : > { %v2700_v29 = vpop.eup %2699  ;;  %v1224_v11 = vpack.c.bf16 %v1220_v7, %v1220_v7 }
 0x458   : > { %1309 = vst.msk [vmem:[#allocation2 + $0x8] sm:$0xf] %vm1306_vm3, %v1304_v58  ;;  %v1301_v62 = vadd.f32 %v2457_v34, %v1291_v60  ;;  %v1202_v63 = vmul.f32 %v2700_v29, %v3122_v55  ;;  %v2702_v2 = vpop.eup %2701  ;;  %v2807_v58 = vmov 0  }
 0x459   : > { %v1201_v5 = vmul.f32 %v2702_v2, %v3110_v43  ;;  %v2704_v15 = vpop.eup %2703  ;;  %2671 = vset.pattern.permute.xlu0 %v2807_v58  ;;  %2672 = vset.pattern.permute.xlu1 %v2807_v58 }
 0x45a   : > { %v1305_v0 = vpack.c.bf16 %v1301_v62, %v1301_v62  ;;  %v1212_v4 = vmul.f32 %v2454_v61, %v1202_v63  ;;  %v1203_v18 = vmul.f32 %v2704_v15, %v3120_v54 }
 0x45b   : > { %v1333_v9 = vld [vmem:[#allocation2 + $0x4] sm:$0xf]  ;;  %v1211_v12 = vmul.f32 %v2454_v61, %v1201_v5 }
 0x45c   : > { %v1332_v3 = vld [vmem:[#allocation2] sm:$0xf]  ;;  %1310 = vst.msk [vmem:[#allocation2 + $0xc] sm:$0xf] %vm1306_vm3, %v1305_v0  ;;  %v1222_v10 = vadd.f32 %v2455_v30, %v1212_v4  ;;  %v1394_v17 = vsel %vm1150_vm2, %v1333_v9, 0  ;;  %v1213_v24 = vmul.f32 %v2454_v61, %v1203_v18 }
 0x45d   : > { %v1348_v44 = vsel %vm1150_vm2, %v1332_v3, 0  ;;  %v1221_v19 = vadd.f32 %v2455_v30, %v1211_v12  ;;  %v3212_v0 = vld [vmem:[#allocation4] sm:$0xff]  ;;  %v3217_v3 = vld [vmem:[#allocation4 + $0x10] sm:$0xff] }
 0x45e   : > { %2534 = vmatpush3.bf16.xpose.msra.mxu0 %v1348_v44  ;;  %v1226_v43 = vpack.c.bf16 %v1222_v10, %v1222_v10  ;;  %v1223_v54 = vadd.f32 %v2455_v30, %v1213_v24 }
 0x45f   : > { %v1334_v6 = vld [vmem:[#allocation2 + $0x8] sm:$0xf]  ;;  %2539 = vmatprep.subr.bf16.mxu0 %v2797_v8  ;;  %v1225_v23 = vpack.c.bf16 %v1221_v19, %v1221_v19 }
 0x460   : > { %v1440_v55 = vsel %vm1150_vm2, %v1334_v6, 0  ;;  %v1227_v26 = vpack.c.bf16 %v1223_v54, %v1223_v54 }
 0x461   : > { %2546 = vmatpush3.bf16.xpose.msra.mxu1 %v1440_v55  ;;  %v3241_v55 = vld [vmem:[#allocation4 + $0x18] sm:$0xff] }
 0x462   : > { %2557 = vmatprep.subr.bf16.mxu1 %v2797_v8 }
 0x463   : > { %v1335_v20 = vld [vmem:[#allocation2 + $0xc] sm:$0xf] }
 0x464   : > { %v1486_v25 = vsel %vm1150_vm2, %v1335_v20, 0 }
 0x465   : > { %2536 = vmatmul.mubr.msk.bf16.vlgmr.msra.gmra.mxu0 %vm1150_vm2, %v1224_v11 }
 0x466   : > { %2540 = vmatpush3.bf16.xpose.msra.mxu0 %v1394_v17  ;;  %2541 = vmatprep.mubr.msk.bf16.mxu0 %vm2798_vm1, %v2797_v8 }
 0x467   : > { %2551 = vmatprep.subr.bf16.mxu0 %v2797_v8 }
 0x468   : > { %2548 = vmatmul.mubr.msk.bf16.vlgmr.msra.gmra.mxu1 %vm1150_vm2, %v1226_v43 }
 0x469   : > { %2559 = vmatprep.mubr.msk.bf16.mxu1 %vm2798_vm1, %v2797_v8 }
 0x46d   : > { %2542 = vmatmul.mubr.msk.bf16.vlgmr.msra.gmra.mxu0 %vm1150_vm2, %v1225_v23 }
 0x46e   : > { %2552 = vmatpush3.bf16.xpose.msra.mxu0 %v1486_v25  ;;  %2553 = vmatprep.mubr.msk.bf16.mxu0 %vm2798_vm1, %v2797_v8 }
 0x46f   : > { %2563 = vmatprep.subr.bf16.mxu0 %v2797_v8 }
 0x475   : > { %2554 = vmatmul.mubr.msk.bf16.vlgmr.msra.gmra.mxu0 %vm1150_vm2, %v1227_v26 }
 0x476   : > { %2565 = vmatprep.mubr.msk.bf16.mxu0 %vm2798_vm1, %v2797_v8 }
 0x525   : > { %v1384_v34 = vpop.f32.mrf.mxu0 }
 0x526   : > { %v3190_v35 = vadd.f32 %v1384_v34, %v1343_v33 }
 0x527   : > { %v2537_v39 = vpop.f32.mrf.mxu0 }
 0x528   : > { %v1476_v40 = vpop.f32.mrf.mxu1  ;;  %v1532_v41 = vsel %vm1150_vm2, %v3190_v35, -inf }
 0x529   : > { %v3194_v42 = vadd.f32 %v1476_v40, %v1343_v33  ;;  %1533 = vmax.xlane.f32.xlu1 %v1532_v41  ;;  %v1387_v45 = vpop.f32.mrf.mxu0 }
 0x52a   : > { %v2549_v47 = vpop.f32.mrf.mxu1 }
 0x52b   : > { %v2538_v48 = vpop.f32.mrf.mxu0  ;;  %v1538_v13 = vsel %vm1150_vm2, %v3194_v42, -inf }
 0x52c   : > { %v1479_v49 = vpop.f32.mrf.mxu1 }
 0x52d   : > { %1539 = vmax.xlane.f32.xlu1 %v1538_v13  ;;  %v1430_v50 = vpop.f32.mrf.mxu0 }
 0x52e   : > { %v3198_v21 = vadd.f32 %v1430_v50, %v1343_v33  ;;  %v2550_v51 = vpop.f32.mrf.mxu1 }
 0x52f   : > { %v2543_v52 = vpop.f32.mrf.mxu0 }
 0x530   : > { %v1535_v53 = vsel %vm1150_vm2, %v3198_v21, -inf }
 0x531   : > { %1536 = vmax.xlane.f32.xlu0 %v1535_v53  ;;  %v1433_v57 = vpop.f32.mrf.mxu0 }
 0x533   : > { %v2544_v22 = vpop.f32.mrf.mxu0 }
 0x535   : > { %v1522_v59 = vpop.f32.mrf.mxu0 }
 0x536   : > { %v3204_v60 = vadd.f32 %v1522_v59, %v1343_v33 }
 0x537   : > { %v2555_v29 = vpop.f32.mrf.mxu0 }
 0x538   : > { %v1541_v61 = vsel %vm1150_vm2, %v3204_v60, -inf }
 0x539   : > { %1542 = vmax.xlane.f32.xlu0 %v1541_v61  ;;  %v1525_v62 = vpop.f32.mrf.mxu0 }
 0x53b   : > { %v2556_v63 = vpop.f32.mrf.mxu0 }
 0x53e   : > { %858 = vrot.lane.b32.xlu1 %v3015_v32, %s2808_s24 }
 0x542   : > { %862 = vrot.lane.b32.xlu1 %v3032_v37, %s2808_s24 }
 0x546   : > { %864 = vrot.lane.b32.xlu1 %v3035_v38, %s2808_s24 }
 0x54f   : > { %860 = vrot.lane.b32.xlu0 %v3029_v36, %s2808_s24  ;;  %v3227_v36 = vld [vmem:[#allocation4 + $0x8] sm:$0xff] }
 0x5b2   : > { %v1534_v1 = vpop.xlane.xlu1 %1533 }
 0x5b3   : > { %v3215_v2 = vmax.f32 %v3212_v0, %v1534_v1 }
 0x5b5   : > { %v1548_v30 = vsub.f32 %v3212_v0, %v3215_v2  ;;  %1845 = vst.msk [vmem:[#allocation4] sm:$0xff] %vm1315_vm4, %v3215_v2  ;;  %1562 = vperm.xlu0 %2671, %v3215_v2  }
 0x5b6   : > { %v1540_v32 = vpop.xlane.xlu1 %1539 }
 0x5b7   : > { %v3225_v37 = vmax.f32 %v3217_v3, %v1540_v32 }
 0x5b9   : > { %v1550_v38 = vsub.f32 %v3217_v3, %v3225_v37  ;;  %1847 = vst.msk [vmem:[#allocation4 + $0x10] sm:$0xff] %vm1315_vm4, %v3225_v37 }
 0x5ba   : > { %v859_v44 = vpop.permute.xlu1 %858  ;;  %v1537_v4 = vpop.xlane.xlu0 %1536 }
 0x5bb   : > { %v3234_v5 = vmax.f32 %v3227_v36, %v1537_v4 }
 0x5bd   : > { %v1549_v6 = vsub.f32 %v3227_v36, %v3234_v5  ;;  %1846 = vst.msk [vmem:[#allocation4 + $0x8] sm:$0xff] %vm1315_vm4, %v3234_v5  ;;  %1567 = vperm.xlu1 %2672, %v3234_v5  }
 0x5be   : > { %v863_v7 = vpop.permute.xlu1 %862 }
 0x5bf   : > { %v870_v11 = vcombine.low %v859_v44, %v863_v7  ;;  %v871_v12 = vcombine.high %v859_v44, %v863_v7 }
 0x5c1   : > { %1572 = vperm.xlu1 %2672, %v3225_v37   ;;  %v878_v20 = vrot.slane %v870_v11, %v3043_v46  ;;  %v885_v23 = vrot.slane %v871_v12, %v3043_v46 }
 0x5c2   : > { %v1543_v9 = vpop.xlane.xlu0 %1542  ;;  %v865_v17 = vpop.permute.xlu1 %864 }
 0x5c3   : > { %v3245_v10 = vmax.f32 %v3241_v55, %v1543_v9 }
 0x5c5   : > { %v1551_v15 = vsub.f32 %v3241_v55, %v3245_v10  ;;  %1848 = vst.msk [vmem:[#allocation4 + $0x18] sm:$0xff] %vm1315_vm4, %v3245_v10  ;;  %1577 = vperm.xlu0 %2671, %v3245_v10   ;;  %v1594_v10 = vld [vmem:[#allocation5 + $0x10] sm:$0xff] }
 0x5c6   : > { %v861_v43 = vpop.permute.xlu0 %860 }
 0x5c7   : > { %v886_v18 = vcombine.low %v861_v43, %v865_v17  ;;  %v887_v19 = vcombine.high %v861_v43, %v865_v17  ;;  %v1558_v36 = vmul.f32 1.442695, %v1551_v15 }
 0x5c9   : > { %v894_v24 = vrot.slane %v886_v18, %v3043_v46  ;;  %v901_v25 = vrot.slane %v887_v19, %v3043_v46 }
 0x5cb   : > { %v902_v54 = vcombine.low %v878_v20, %v894_v24  ;;  %v903_v26 = vcombine.high %v878_v20, %v894_v24  ;;  %v918_v27 = vcombine.low %v885_v23, %v901_v25  ;;  %v919_v28 = vcombine.high %v885_v23, %v901_v25 }
 0x5cd   : > { %v910_v31 = vrot.slane %v902_v54, %v3054_v56  ;;  %v917_v33 = vrot.slane %v903_v26, %v3054_v56  ;;  %v926_v34 = vrot.slane %v918_v27, %v3054_v56  ;;  %v933_v39 = vrot.slane %v919_v28, %v3054_v56 }
 0x5cf   : > { %v934_v40 = vcombine.high %v910_v31, %v2797_v8  ;;  %v935_v41 = vcombine.high %v917_v33, %v2797_v8  ;;  %v936_v45 = vcombine.high %v926_v34, %v2797_v8  ;;  %v937_v47 = vcombine.high %v933_v39, %v2797_v8 }
 0x5d0   : > { %v2450_v48 = vpack.c.bf16 %v926_v34, %v910_v31  ;;  %v2451_v13 = vpack.c.bf16 %v933_v39, %v917_v33 }
 0x5d1   : > { %v2452_v49 = vpack.c.bf16 %v936_v45, %v934_v40  ;;  %v2453_v50 = vpack.c.bf16 %v937_v47, %v935_v41 }
 0x5d2   : > { %v1089_v51 = vrot.slane %v2450_v48, %v3043_v46  ;;  %v1097_v52 = vrot.slane %v2451_v13, %v3043_v46 }
 0x5d3   : > { %v1114_v53 = vrot.slane %v2452_v49, %v3043_v46  ;;  %v1122_v57 = vrot.slane %v2453_v50, %v3043_v46 }
 0x5d4   : > { %v1098_v22 = vcombine.low %v1089_v51, %v1097_v52  ;;  %v1554_v52 = vmul.f32 1.442695, %v1549_v6  ;;  %v1592_v6 = vld [vmem:[#allocation5] sm:$0xff] }
 0x5d5   : > { %v1123_v59 = vcombine.low %v1114_v53, %v1122_v57 }
 0x5d6   : > { %v1105_v29 = vrot.slane %v1098_v22, %v3054_v56  ;;  %v1552_v22 = vmul.f32 1.442695, %v1548_v30 }
 0x5d7   : > { %v1130_v61 = vrot.slane %v1123_v59, %v3054_v56  ;;  %v1556_v59 = vmul.f32 1.442695, %v1550_v38  ;;  %v1593_v38 = vld [vmem:[#allocation5 + $0x8] sm:$0xff] }
 0x5d8   : > { %v1106_v62 = vcombine.high %v1105_v29, %v2807_v58  ;;  %v1136_v32 = vshrl.u32 %v1105_v29, 16 }
 0x5d9   : > { %v1131_v63 = vcombine.high %v1130_v61, %v2807_v58  ;;  %v1134_v1 = vpack.i.b16 %v1130_v61, %v1105_v29  ;;  %v1137_v44 = vshrl.u32 %v1130_v61, 16 }
 0x5da   : > { %v1144_v9 = vshrl.u32 %v1106_v62, 16 }
 0x5db   : > { %v1138_v4 = vpack.i.b16 %v1137_v44, %v1136_v32  ;;  %v1142_v7 = vpack.i.b16 %v1131_v63, %v1106_v62  ;;  %v1145_v11 = vshrl.u32 %v1131_v63, 16  ;;  %1311 = vst.msk [vmem:[#allocation3] sm:$0xf] %vm1306_vm3, %v1134_v1  ;;  %v1595_v32 = vld [vmem:[#allocation5 + $0x18] sm:$0xff] }
 0x5dd   : > { %v1146_v12 = vpack.i.b16 %v1145_v11, %v1144_v9  ;;  %1312 = vst.msk [vmem:[#allocation3 + $0x4] sm:$0xf] %vm1306_vm3, %v1138_v4  ;;  %1313 = vst.msk [vmem:[#allocation3 + $0x8] sm:$0xf] %vm1306_vm3, %v1142_v7 }
 0x5df   : > { %1314 = vst.msk [vmem:[#allocation3 + $0xc] sm:$0xf] %vm1306_vm3, %v1146_v12 }
 0x5e2   : > { %v1336_v17 = vld [vmem:[#allocation3] sm:$0xf] }
 0x5e3   : > { %v1657_v58 = vsel %vm1655_vm6, %v1336_v17, 0 }
 0x5e4   : > { %2558 = vmatpush3.bf16.msra.mxu1 %v1657_v58  ;;  %v1337_v43 = vld [vmem:[#allocation3 + $0x4] sm:$0xf]  ;;  %v1338_v39 = vld [vmem:[#allocation3 + $0x8] sm:$0xf] }
 0x5e5   : > { %v1703_v18 = vsel %vm1655_vm6, %v1337_v43, 0  ;;  %2569 = vmatprep.subr.bf16.mxu1 %v2797_v8 }
 0x5e6   : > { %2564 = vmatpush3.bf16.msra.mxu0 %v1703_v18 }
 0x5e7   : > { %2575 = vmatprep.subr.bf16.mxu0 %v2797_v8 }
 0x630   : > { %v1563_v19 = vpop.permute.xlu0 %1562 }
 0x631   : > { %v1580_v20 = vsub.f32 %v3190_v35, %v1563_v19 }
 0x633   : > { %v1584_v23 = vmul.f32 1.442695, %v1580_v20  ;;  %v1620_v20 = vld [vmem:[#allocation6] sm:$0xff] }
 0x635   : > { %2705 = vpow2.f32 %v1584_v23 }
 0x638   : > { %v1568_v24 = vpop.permute.xlu1 %1567 }
 0x639   : > { %v1581_v25 = vsub.f32 %v3198_v21, %v1568_v24  ;;  %v1749_v21 = vsel %vm1655_vm6, %v1338_v39, 0  ;;  %v1622_v39 = vld [vmem:[#allocation6 + $0x10] sm:$0xff] }
 0x63b   : > { %v1586_v54 = vmul.f32 1.442695, %v1581_v25 }
 0x63c   : > { %v1573_v26 = vpop.permute.xlu1 %1572 }
 0x63d   : > { %2707 = vpow2.f32 %v1586_v54  ;;  %v1582_v27 = vsub.f32 %v3194_v42, %v1573_v26 }
 0x63f   : > { %v1588_v28 = vmul.f32 1.442695, %v1582_v27 }
 0x640   : > { %v1578_v31 = vpop.permute.xlu0 %1577 }
 0x641   : > { %2709 = vpow2.f32 %v1588_v28  ;;  %v1583_v33 = vsub.f32 %v3204_v60, %v1578_v31  ;;  %v1339_v60 = vld [vmem:[#allocation3 + $0xc] sm:$0xf]  ;;  %v1621_v28 = vld [vmem:[#allocation6 + $0x8] sm:$0xff] }
 0x642   : > { %v2706_v34 = vpop.eup %2705  ;;  %v1795_v48 = vsel %vm1655_vm6, %v1339_v60, 0 }
 0x643   : > { %v1590_v40 = vmul.f32 1.442695, %v1583_v33  ;;  %v1600_v35 = vsel %vm1150_vm2, %v2706_v34, 0.0  ;;  %v1648_v41 = vpack.c.bf16 %v2706_v34, %v2706_v34 }
 0x644   : > { %1601 = vadd.xlane.f32.xlu1 %v1600_v35 }
 0x645   : > { %2711 = vpow2.f32 %v1590_v40  ;;  %2560 = vmatmul.mubr.msk.bf16.vlgmr.msra.gmra.mxu1 %vm1150_vm2, %v1648_v41 }
 0x646   : > { %2570 = vmatpush3.bf16.msra.mxu1 %v1749_v21  ;;  %2571 = vmatprep.mubr.msk.bf16.mxu1 %vm2798_vm1, %v2797_v8  ;;  %2713 = vpow2.f32 %v1554_v52 }
 0x647   : > { %2581 = vmatprep.subr.bf16.mxu1 %v2797_v8  ;;  %2715 = vpow2.f32 %v1552_v22 }
 0x648   : > { %2717 = vpow2.f32 %v1556_v59 }
 0x649   : > { %2719 = vpow2.f32 %v1558_v36 }
 0x64a   : > { %v2708_v42 = vpop.eup %2707 }
 0x64b   : > { %v1603_v45 = vsel %vm1150_vm2, %v2708_v42, 0.0  ;;  %v1649_v47 = vpack.c.bf16 %v2708_v42, %v2708_v42 }
 0x64c   : > { %1604 = vadd.xlane.f32.xlu0 %v1603_v45  ;;  %v1623_v45 = vld [vmem:[#allocation6 + $0x18] sm:$0xff] }
 0x64d   : > { %2566 = vmatmul.mubr.msk.bf16.vlgmr.msra.gmra.mxu0 %vm1150_vm2, %v1649_v47 }
 0x64e   : > { %v2710_v13 = vpop.eup %2709  ;;  %2576 = vmatpush3.bf16.msra.mxu0 %v1795_v48  ;;  %2577 = vmatprep.mubr.msk.bf16.mxu0 %vm2798_vm1, %v2797_v8 }
 0x64f   : > { %v1606_v49 = vsel %vm1150_vm2, %v2710_v13, 0.0  ;;  %v1650_v50 = vpack.c.bf16 %v2710_v13, %v2710_v13  ;;  %2589 = vmatprep.subr.bf16.mxu0 %v2797_v8 }
 0x650   : > { %1607 = vadd.xlane.f32.xlu0 %v1606_v49 }
 0x651   : > { %2572 = vmatmul.mubr.msk.bf16.vlgmr.msra.gmra.mxu1 %vm1150_vm2, %v1650_v50 }
 0x652   : > { %v2712_v51 = vpop.eup %2711  ;;  %2585 = vmatprep.mubr.msk.bf16.mxu1 %vm2798_vm1, %v2797_v8 }
 0x653   : > { %v1609_v53 = vsel %vm1150_vm2, %v2712_v51, 0.0  ;;  %v1651_v57 = vpack.c.bf16 %v2712_v51, %v2712_v51  ;;  %v2714_v0 = vpop.eup %2713 }
 0x654   : > { %1610 = vadd.xlane.f32.xlu1 %v1609_v53  ;;  %v2716_v2 = vpop.eup %2715  ;;  %v1597_v61 = vmul.f32 %v2714_v0, %v1593_v38 }
 0x655   : > { %2578 = vmatmul.mubr.msk.bf16.vlgmr.msra.gmra.mxu0 %vm1150_vm2, %v1651_v57  ;;  %v2718_v30 = vpop.eup %2717  ;;  %v1596_v29 = vmul.f32 %v2716_v2, %v1592_v6 }
 0x656   : > { %2593 = vmatprep.mubr.msk.bf16.mxu0 %vm2798_vm1, %v2797_v8  ;;  %v2720_v5 = vpop.eup %2719  ;;  %v1598_v63 = vmul.f32 %v2718_v30, %v1594_v10 }
 0x657   : > { %v1599_v4 = vmul.f32 %v2720_v5, %v1595_v32 }
 0x665   : > { %1631 = vperm.xlu1 %2672, %v2714_v0  }
 0x666   : > { %1626 = vperm.xlu0 %2671, %v2716_v2  }
 0x669   : > { %1636 = vperm.xlu1 %2672, %v2718_v30  }
 0x66a   : > { %1641 = vperm.xlu0 %2671, %v2720_v5  }
 0x6cd   : > { %v1602_v3 = vpop.xlane.xlu1 %1601 }
 0x6ce   : > { %v1612_v37 = vadd.f32 %v1602_v3, %v1596_v29 }
 0x6d0   : > { %1616 = vst.msk [vmem:[#allocation5] sm:$0xff] %vm1315_vm4, %v1612_v37 }
 0x6d5   : > { %v1605_v55 = vpop.xlane.xlu0 %1604 }
 0x6d6   : > { %v1613_v15 = vadd.f32 %v1605_v55, %v1597_v61 }
 0x6d7   : > { %v1853_v62 = vld [vmem:[#allocation5] sm:$0xff] }
 0x6d8   : > { %1617 = vst.msk [vmem:[#allocation5 + $0x8] sm:$0xff] %vm1315_vm4, %v1613_v15  ;;  %2721 = vrcp.f32 %v1853_v62 }
 0x6d9   : > { %v1608_v1 = vpop.xlane.xlu0 %1607 }
 0x6da   : > { %v1614_v44 = vadd.f32 %v1608_v1, %v1598_v63 }
 0x6dc   : > { %1618 = vst.msk [vmem:[#allocation5 + $0x10] sm:$0xff] %vm1315_vm4, %v1614_v44 }
 0x6dd   : > { %v1611_v7 = vpop.xlane.xlu1 %1610 }
 0x6de   : > { %v1615_v9 = vadd.f32 %v1611_v7, %v1599_v4 }
 0x6df   : > { %v1854_v11 = vld [vmem:[#allocation5 + $0x8] sm:$0xff] }
 0x6e0   : > { %1619 = vst.msk [vmem:[#allocation5 + $0x18] sm:$0xff] %vm1315_vm4, %v1615_v9  ;;  %2723 = vrcp.f32 %v1854_v11 }
 0x6e1   : > { %v1627_v23 = vpop.permute.xlu0 %1626  ;;  %v1632_v26 = vpop.permute.xlu1 %1631 }
 0x6e2   : > { %v1644_v24 = vmul.f32 %v1627_v23, %v1620_v20  ;;  %v1645_v34 = vmul.f32 %v1632_v26, %v1621_v28 }
 0x6e3   : > { %v1855_v12 = vld [vmem:[#allocation5 + $0x10] sm:$0xff] }
 0x6e4   : > { %2725 = vrcp.f32 %v1855_v12 }
 0x6e5   : > { %v2722_v17 = vpop.eup %2721  ;;  %v1637_v40 = vpop.permute.xlu1 %1636 }
 0x6e6   : > { %1863 = vperm.xlu1 %2672, %v2722_v17   ;;  %v1646_v42 = vmul.f32 %v1637_v40, %v1622_v39  ;;  %v1642_v60 = vpop.permute.xlu0 %1641 }
 0x6e7   : > { %v1856_v58 = vld [vmem:[#allocation5 + $0x18] sm:$0xff]  ;;  %v1647_v51 = vmul.f32 %v1642_v60, %v1623_v45 }
 0x6e8   : > { %2727 = vrcp.f32 %v1856_v58 }
 0x6ed   : > { %v2724_v43 = vpop.eup %2723 }
 0x6ee   : > { %1868 = vperm.xlu0 %2671, %v2724_v43   ;;  %v2675_v43 = vld [vmem:[%s3473_s12 + $0x8] sm:$0xff]  }
 0x6ef   : > { %2582 = vmatpush3.bf16.msra.mxu1 %v2675_v43  ;;  %v2147_v43 = vsub.s32 3, %v2995_v14 }
 0x6f0   : > { %2583 = vmatprep.subr.bf16.mxu1 %v2797_v8 }
 0x6f1   : > { %v2726_v18 = vpop.eup %2725 }
 0x6f2   : > { %1873 = vperm.xlu1 %2672, %v2726_v18  }
 0x6f5   : > { %v2728_v19 = vpop.eup %2727 }
 0x6f6   : > { %1878 = vperm.xlu0 %2671, %v2728_v19  }
 0x705   : > { %v1693_v25 = vpop.f32.mrf.mxu1 }
 0x706   : > { %v1837_v54 = vadd.f32 %v1693_v25, %v1644_v24 }
 0x707   : > { %v2561_v27 = vpop.f32.mrf.mxu1 }
 0x708   : > { %1841 = vst.msk [vmem:[#allocation6] sm:$0xff] %vm1150_vm2, %v1837_v54  ;;  %v2676_v27 = vld [vmem:[%s3473_s12] sm:$0xff]  }
 0x709   : > { %v1696_v31 = vpop.f32.mrf.mxu1  ;;  %2584 = vmatpush3.bf16.msra.mxu1 %v2676_v27 }
 0x70a   : > { %2597 = vmatprep.subr.bf16.mxu1 %v2797_v8 }
 0x70b   : > { %v2562_v33 = vpop.f32.mrf.mxu1 }
 0x70d   : > { %v1739_v35 = vpop.f32.mrf.mxu0 }
 0x70e   : > { %v1838_v41 = vadd.f32 %v1739_v35, %v1645_v34 }
 0x70f   : > { %v2567_v21 = vpop.f32.mrf.mxu0  ;;  %v1849_v3 = vld [vmem:[#allocation6] sm:$0xff] }
 0x710   : > { %1842 = vst.msk [vmem:[#allocation6 + $0x8] sm:$0xff] %vm1150_vm2, %v1838_v41 }
 0x711   : > { %v1742_v47 = vpop.f32.mrf.mxu0  ;;  %v1785_v48 = vpop.f32.mrf.mxu1 }
 0x712   : > { %v1839_v13 = vadd.f32 %v1785_v48, %v1646_v42 }
 0x713   : > { %v2568_v49 = vpop.f32.mrf.mxu0  ;;  %v2573_v50 = vpop.f32.mrf.mxu1 }
 0x714   : > { %1843 = vst.msk [vmem:[#allocation6 + $0x10] sm:$0xff] %vm1150_vm2, %v1839_v13 }
 0x715   : > { %v1788_v52 = vpop.f32.mrf.mxu1  ;;  %v1831_v53 = vpop.f32.mrf.mxu0 }
 0x716   : > { %v1840_v57 = vadd.f32 %v1831_v53, %v1647_v51 }
 0x717   : > { %v2574_v22 = vpop.f32.mrf.mxu1  ;;  %v2579_v59 = vpop.f32.mrf.mxu0  ;;  %v1850_v38 = vld [vmem:[#allocation6 + $0x8] sm:$0xff] }
 0x718   : > { %1844 = vst.msk [vmem:[#allocation6 + $0x18] sm:$0xff] %vm1150_vm2, %v1840_v57  ;;  %v2107_v22 = vsub.s32 2, %v2995_v14  ;;  %v2468_v59 = vld [vmem:[%s3474_s13] ss:$0 sm:$0xff] }
 0x719   : > { %v1834_v36 = vpop.f32.mrf.mxu0 }
 0x71a   : > { %v3357_v36 = vld [vmem:[%s2992_s26] sm:$0x3f]  ;;  %s2488_s26 = sshll.u32 %s2929_s0, 7  ;;  %s2739_s0 = sshll.u32 %s2812_s3, 4  ;;  %s2740_s0 = int_to_ptr.vmem [resolvable:$false] %s2739_s0 }
 0x71b   : > { %v2580_v0 = vpop.f32.mrf.mxu0  ;;  %v1851_v5 = vld [vmem:[#allocation6 + $0x10] sm:$0xff] }
 0x71c   : > { %v2108_v0 = vrot.slane %v3357_v36, %v2107_v22  ;;  %v2486_v22 = vld [vmem:[%s3478_s17] ss:$0 sm:$0xff] }
 0x71f   : > { %v1852_v55 = vld [vmem:[#allocation6 + $0x18] sm:$0xff] }
 0x761   : > { %v1864_v2 = vpop.permute.xlu1 %1863 }
 0x762   : > { %v1881_v37 = vmul.f32 %v1864_v2, %v1849_v3  ;;  %v2734_v3 = vld [vmem:[%s2966_s21] sm:$0xff] }
 0x769   : > { %v1869_v30 = vpop.permute.xlu0 %1868 }
 0x76a   : > { %v1882_v10 = vmul.f32 %v1869_v30, %v1850_v38 }
 0x76d   : > { %v1874_v6 = vpop.permute.xlu1 %1873 }
 0x76e   : > { %v1883_v29 = vmul.f32 %v1874_v6, %v1851_v5 }
 0x770   : > { %v1885_v15 = vcombine.low %v1881_v37, %v1883_v29  ;;  %v1886_v62 = vcombine.high %v1881_v37, %v1883_v29 }
 0x771   : > { %v1879_v61 = vpop.permute.xlu0 %1878 }
 0x772   : > { %v1884_v63 = vmul.f32 %v1879_v61, %v1852_v55  ;;  %v1893_v44 = vrot.slane %v1885_v15, %v3043_v46  ;;  %v1900_v4 = vrot.slane %v1886_v62, %v3043_v46 }
 0x774   : > { %v1901_v1 = vcombine.low %v1882_v10, %v1884_v63  ;;  %v1902_v32 = vcombine.high %v1882_v10, %v1884_v63 }
 0x776   : > { %v1909_v7 = vrot.slane %v1901_v1, %v3043_v46  ;;  %v1916_v9 = vrot.slane %v1902_v32, %v3043_v46  ;;  %v2677_v1 = vld [vmem:[%s3475_s14 + $0x8] sm:$0xff]   ;;  %v2678_v32 = vld [vmem:[%s3475_s14] sm:$0xff]  }
 0x777   : > { %2590 = vmatpush3.bf16.msra.mxu0 %v2677_v1 }
 0x778   : > { %v1917_v11 = vcombine.low %v1893_v44, %v1909_v7  ;;  %v1918_v12 = vcombine.high %v1893_v44, %v1909_v7  ;;  %v1933_v17 = vcombine.low %v1900_v4, %v1916_v9  ;;  %v1934_v58 = vcombine.high %v1900_v4, %v1916_v9  ;;  %2591 = vmatprep.subr.bf16.mxu0 %v2797_v8  ;;  %v2679_v44 = vld [vmem:[%s3477_s16 + $0x38] sm:$0xff]   ;;  %v2680_v4 = vld [vmem:[%s3477_s16 + $0x30] sm:$0xff]  }
 0x77a   : > { %v1925_v18 = vrot.slane %v1917_v11, %v3054_v56  ;;  %v1932_v19 = vrot.slane %v1918_v12, %v3054_v56  ;;  %v1941_v20 = vrot.slane %v1933_v17, %v3054_v56  ;;  %v1948_v23 = vrot.slane %v1934_v58, %v3054_v56  ;;  %v2472_v58 = vld [vmem:[%s3499_s4] ss:$0 sm:$0xff] }
 0x77b   : > { %2592 = vmatpush3.bf16.msra.mxu0 %v2678_v32  ;;  %v2142_v12 = vsub.s32 4, %v2995_v14 }
 0x77c   : > { %v1953_v24 = vcombine.low %v1925_v18, %v1932_v19  ;;  %v2466_v25 = vcombine.high %v1925_v18, %v1932_v19  ;;  %v1969_v54 = vcombine.low %v1941_v20, %v1948_v23  ;;  %v2467_v26 = vcombine.high %v1941_v20, %v1948_v23  ;;  %v2473_v19 = vld [vmem:[%s3466_s5] ss:$0 sm:$0xff] }
 0x77d   : > { %v2143_v20 = vrot.slane %v2998_v16, %v2142_v12  ;;  %v2682_v16 = vld [vmem:[%s3477_s16 + $0x20] sm:$0xff]  }
 0x77e   : > { %v1960_v28 = vrot.slane %v1953_v24, %v3043_v46  ;;  %v1968_v31 = vrot.slane %v2466_v25, %v3043_v46  ;;  %v1976_v33 = vrot.slane %v1969_v54, %v3043_v46  ;;  %v1984_v34 = vrot.slane %v2467_v26, %v3043_v46 }
 0x77f   : > { %v2148_v24 = vrot.slane %v3357_v36, %v2147_v43 }
 0x780   : > { %v1986_v39 = vcombine.high %v1960_v28, %v1968_v31  ;;  %v2002_v40 = vcombine.high %v1976_v33, %v1984_v34  ;;  %v1985_v35 = vcombine.low %v1960_v28, %v1968_v31  ;;  %v2001_v41 = vcombine.low %v1976_v33, %v1984_v34  ;;  %v2681_v28 = vld [vmem:[%s3477_s16 + $0x28] sm:$0xff]   ;;  %v2683_v31 = vld [vmem:[%s3477_s16 + $0x18] sm:$0xff]   ;;  %v2684_v33 = vld [vmem:[%s3477_s16 + $0x10] sm:$0xff]  }
 0x781   : > { %v2685_v34 = vld [vmem:[%s3477_s16 + $0x8] sm:$0xff]  }
 0x782   : > { %v2000_v21 = vrot.slane %v1986_v39, %v3054_v56  ;;  %v2016_v42 = vrot.slane %v2002_v40, %v3054_v56  ;;  %v1993_v60 = vrot.slane %v1985_v35, %v3054_v56  ;;  %v2009_v45 = vrot.slane %v2001_v41, %v3054_v56  ;;  %v2686_v39 = vld [vmem:[%s3477_s16] sm:$0xff]  }
 0x783   : > { %v2474_v40 = vld [vmem:[%s3476_s15] ss:$0 sm:$0xff] }
 0x784   : > { %v2019_v47 = vcombine.low %v2000_v21, %v2016_v42  ;;  %v2018_v48 = vcombine.high %v1993_v60, %v2009_v45  ;;  %v2017_v13 = vcombine.low %v1993_v60, %v2009_v45  ;;  %v2020_v46 = vcombine.high %v2000_v21, %v2016_v42 }
 0x786   : > { %2026 = vrot.lane.b32.xlu0 %v2019_v47, %s2809_s22  ;;  %2022 = vrot.lane.b32.xlu1 %v2018_v48, %s2810_s20  ;;  %s577_s20 = sand.u32 1, %s2787_s28   ;;  %s2360_s22 = scalar_lea.hbm %s3479_s18, %s2488_s26 }
 0x787   : > { %s2349_s24 = scalar_lea.sflag [#allocation9], %s577_s20 }
 0x78a   : > { %2030 = vrot.lane.b32.xlu1 %v2020_v46, %s2811_s19  ;;  %s2437_s19 = sshll.u32 %s577_s20, 3 }
 0x78b   : > { %s579_s6 = scalar_lea.vmem [#allocation8], %s2437_s19  ;;  %s2741_s19 = scalar_lea.vmem %s2740_s0, 256 }
 0x78c   : > { %s2362_s21 = sshll.u32 %s579_s6, 4  ;;  %s2363_s21 = int_to_ptr.vmem [resolvable:$true] %s2362_s21 }
 0x78d   : > { %s2735_s25 = scalar_lea.vmem %s2363_s21, 128  ;;  %p2742_p0 = scmp.lt.s32.totalorder %s2363_s21, %s2740_s0 }
 0x78e   : > { %p2736_p11 = scmp.ne.s32.totalorder %s2363_s21, %s2735_s25  ;;  %p2743_p1 = scmp.lt.s32.totalorder %s2741_s19, %s2735_s25 }
 0x790   : > { %p2737_p12 = pnand %p2736_p11, %p2946_p5  ;;  %p2744_p2 = por %p2743_p1, %p2742_p0 }
 0x792   : > { %p2738_p13 = pneg %p2737_p12 }
 0x794   : > { %p2745_p3 = pnand %p2744_p2, %p2738_p13 }
 0x7f8   : > { %v2023_v49 = vpop.permute.xlu1 %2022  ;;  %v2027_v50 = vpop.permute.xlu0 %2026 }
 0x7f9   : > { %v2033_v51 = vsel %vm1150_vm2, %v2017_v13, %v2023_v49  ;;  %v2241_v49 = vld [vmem:[#allocation7] sm:$0xff] }
 0x7fa   : > { %v2035_v56 = vsel %vm2034_vm7, %v2033_v51, %v2027_v50 }
 0x7fc   : > { %v2031_v52 = vpop.permute.xlu1 %2030 }
 0x7fd   : > { %v2037_v53 = vsel %vm2036_vm8, %v2035_v56, %v2031_v52 }
 0x7fe   : > { %v2038_v57 = vpack.c.bf16 %v2037_v53, %v2037_v53  ;;  %v2343_v53 = vsub.s32 5, %v2995_v14 }
 0x800   : > { %2586 = vmatmul.mubr.msk.bf16.vlgmr.msra.gmra.mxu1 %vm593_vm0, %v2038_v57 }
 0x801   : > { %2613 = vmatprep.mubr.msk.bf16.mxu1 %vm2798_vm1, %v2797_v8  ;;  %2598 = vmatpush3.bf16.msra.mxu1 %v2679_v44 }
 0x802   : > { %2599 = vmatprep.subr.bf16.mxu1 %v2797_v8 }
 0x805   : > { %2600 = vmatpush3.bf16.msra.mxu1 %v2680_v4 }
 0x806   : > { %2601 = vmatprep.subr.bf16.mxu1 %v2797_v8 }
 0x809   : > { %2602 = vmatpush3.bf16.msra.mxu1 %v2681_v28 }
 0x80a   : > { %2603 = vmatprep.subr.bf16.mxu1 %v2797_v8 }
 0x80d   : > { %2604 = vmatpush3.bf16.msra.mxu1 %v2682_v16 }
 0x80e   : > { %2605 = vmatprep.subr.bf16.mxu1 %v2797_v8 }
 0x811   : > { %2606 = vmatpush3.bf16.msra.mxu1 %v2683_v31 }
 0x812   : > { %2607 = vmatprep.subr.bf16.mxu1 %v2797_v8 }
 0x815   : > { %2608 = vmatpush3.bf16.msra.mxu1 %v2684_v33 }
 0x816   : > { %2609 = vmatprep.subr.bf16.mxu1 %v2797_v8 }
 0x819   : > { %2610 = vmatpush3.bf16.msra.mxu1 %v2685_v34 }
 0x81a   : > { %2611 = vmatprep.subr.bf16.mxu1 %v2797_v8 }
 0x81d   : > { %2612 = vmatpush3.bf16.msra.mxu1 %v2686_v39 }
 0x8c0   : > { %v2099_v2 = vpop.f32.mrf.mxu1 }
 0x8c1   : > { %v2100_v30 = vadd.f32 %v2468_v59, %v2099_v2  ;;  %v2344_v59 = vrot.slane %v3357_v36, %v2343_v53 }
 0x8c2   : > { %v2587_v5 = vpop.f32.mrf.mxu1 }
 0x8c3   : > { %v2109_v6 = vmul.f32 %v2108_v0, %v2100_v30 }
 0x8c4   : > { %v2102_v29 = vpop.f32.mrf.mxu1 }
 0x8c5   : > { %v3361_v37 = vadd.f32 %v2734_v3, %v2109_v6 }
 0x8c6   : > { %v2588_v38 = vpop.f32.mrf.mxu1 }
 0x8c7   : > { %v2113_v61 = vsel %vm593_vm0, %v3361_v37, 0.0 }
 0x8c8   : > { %2114 = vadd.xlane.f32.xlu0 %v2113_v61 }
 0x951   : > { %v2115_v55 = vpop.xlane.xlu0 %2114 }
 0x952   : > { %v2116_v10 = vmul.f32 0.03125, %v2115_v55 }
 0x954   : > { %v2117_v15 = vsub.f32 %v3361_v37, %v2116_v10 }
 0x956   : > { %v2118_v62 = vmul.f32 %v2117_v15, %v2117_v15 }
 0x958   : > { %v2119_v63 = vsel %vm593_vm0, %v2118_v62, 0.0 }
 0x959   : > { %2120 = vadd.xlane.f32.xlu1 %v2119_v63 }
 0x9e2   : > { %v2121_v7 = vpop.xlane.xlu1 %2120 }
 0x9e3   : > { %v2122_v9 = vmul.f32 0.03125, %v2121_v7 }
 0x9e5   : > { %v2123_v11 = vadd.f32 1e-05, %v2122_v9 }
 0x9e7   : > { %2729 = vrsqrt.f32 %v2123_v11 }
 0x9f4   : > { %v2730_v17 = vpop.eup %2729 }
 0x9f5   : > { %v2125_v18 = vmul.f32 %v2730_v17, %v2117_v15 }
 0x9f7   : > { %v2132_v23 = vmul.f32 %v2472_v58, %v2125_v18 }
 0x9f9   : > { %v2139_v25 = vadd.f32 %v2473_v19, %v2132_v23 }
 0x9fb   : > { %v2144_v54 = vmul.f32 %v2143_v20, %v2139_v25 }
 0x9fd   : > { %v2149_v26 = vadd.f32 %v2148_v24, %v2144_v54 }
 0x9ff   : > { %v2150_v27 = vpack.c.bf16 %v2149_v26, %v2149_v26 }
 0xa01   : > { %2594 = vmatmul.mubr.msk.bf16.vlgmr.msra.gmra.mxu0 %vm593_vm0, %v2150_v27 }
 0xac1   : > { %v2212_v35 = vpop.f32.mrf.mxu0 }
 0xac2   : > { %v2213_v41 = vadd.f32 %v2474_v40, %v2212_v35 }
 0xac3   : > { %v2595_v21 = vpop.f32.mrf.mxu0 }
 0xac4   : > { %v2220_v42 = vmul.f32 0.70710677, %v2213_v41  ;;  %v2218_v48 = vmul.f32 0.5, %v2213_v41 }
 0xac5   : > { %v2215_v60 = vpop.f32.mrf.mxu0 }
 0xac6   : > { %2731 = verf.f32 %v2220_v42 }
 0xac7   : > { %v2596_v45 = vpop.f32.mrf.mxu0 }
 0xad3   : > { %v2732_v47 = vpop.eup %2731 }
 0xad4   : > { %v2222_v8 = vadd.f32 1.0, %v2732_v47 }
 0xad6   : > { %v2223_v13 = vmul.f32 %v2222_v8, %v2218_v48 }
 0xad8   : > { %v2224_v46 = vpack.c.bf16 %v2223_v13, %v2223_v13 }
 0xada   : > { %2614 = vmatmul.mubr.bf16.vlgmr.msra.gmra.mxu1 %v2224_v46 }
 0xb9a   : > { %v2324_v50 = vpop.f32.mrf.mxu1 }
 0xb9b   : > { %v2330_v51 = vadd.f32 %v2324_v50, %v2241_v49 }
 0xb9c   : > { %v2615_v52 = vpop.f32.mrf.mxu1 }
 0xb9d   : > { %2331 = vst.msk [vmem:[#allocation7] sm:$0xff] %vm593_vm0, %v2330_v51 }
 0xb9e   : > { %v2327_v56 = vpop.f32.mrf.mxu1 }
 0xba0   : > { %v2616_v57 = vpop.f32.mrf.mxu1 }
 0xba4   : > { %v2332_v0 = vld [vmem:[#allocation7] sm:$0xff] }
 0xba5   : > { %v2340_v2 = vadd.f32 %v2486_v22, %v2332_v0 }
 0xba7   : > { %v2345_v30 = vmul.f32 %v2344_v59, %v2340_v2 }
 0xba9   : > { %v2346_v5 = vadd.f32 %v2345_v30, %v3361_v37 }
 0xbab   : > { %2347 = vst.msk [vmem:[%s579_s6] sm:$0xff] %vm593_vm0, %v2346_v5 }
 0xbac   : > { %2748 = shalt.err (!%p2745_p3)
}
 0xbad   : > { %s2749_s1 = scalar_lea.hbm %s2360_s22, 128  ;;  %s2753_s6 = scalar_lea.hbm %s3479_s18, 256 }
 0xbae   : > { %p2750_p4 = scmp.ne.s32.totalorder %s2360_s22, %s2749_s1  ;;  %p2754_p9 = scmp.lt.s32.totalorder %s2360_s22, %s3479_s18 }
 0xbaf   : > { %p2755_p10 = scmp.lt.s32.totalorder %s2753_s6, %s2749_s1 }
 0xbb0   : > { %p2751_p7 = pnand %p2750_p4, %p2946_p5 }
 0xbb1   : > { %p2756_p11 = por %p2755_p10, %p2754_p9 }
 0xbb2   : > { %p2752_p8 = pneg %p2751_p7 }
 0xbb4   : > { %p2757_p12 = pnand %p2756_p11, %p2752_p8 }
 0xbb6   : > { %2760 = shalt.err (!%p2757_p12)
}
 0xbb7   : > { %2617 = dma.vmem_to_hbm [thread:$0]  (%p2946_p5), %s2363_s21, 128, %s2360_s22, %s2349_s24  }
 0xbb8 PF: > { %p2623_p13 = scmp.ge.s32.totalorder %s2795_s30, 2  ;;  %s2374_s3 = sand.u32 1, %s2783_s27  }
 0xbb9   : > { %s2375_s25 = scalar_lea.sflag [#allocation9], %s2374_s3 }
 0xbba   : > { %p2620_p0 = pnand %p2623_p13, %p2950_p6 }
 0xbbc   : > { %p2621_p1 = pneg %p2620_p0 }
 0xbbe   : > { %2778 = dma.done.wait (%p2621_p1), %s2375_s25, 128  }
 0xbbf   : > { %2780 = vsyncadd (%p2621_p1), %s2375_s25, 4294967168  ;;  %s3500_s30 = sld [smem:[#allocation12_spill]]  ;;  %s3503_s27 = smov %s2787_s28 }
 0xbc0   : > { %s3501_s4 = sld [smem:[#allocation11_spill]] }
 0xbc1   : > { %s3502_s29 = sld [smem:[#allocation13_spill]] }
 0xbc5   : > { %p28_p2 = scmp.ge.s32.totalorder %s3500_s30, 4  }
 0xbc6   : > { %s3504_s28 = smov %s3501_s4 }
 0xbc7   :  { %30 = sbr.rel (!%p28_p2) target bundleno = 10 (0xa), region = 130 }
 0xbcc   :  { %2380 = vsyncpa [#allocation9], 1 }
 0xbcd   :  { %2382 = vsyncpa [#allocation9 + $0x1], 1 }

// kernel: tpu_custom_call.1
= control target key start
LH: loop header
LB: loop body
LE: loop exit
PB: predicated region body
PF: predicated region fallthrough
CT: control target
= control target key end

     0   :  { %s3461_s0 = inlined_call_operand.vmem [shape: f32[2,8,32], index: 0, kind: input, shape index: {}]   ;;  %s3462_s1 = inlined_call_operand.vmem [shape: f32[2,6,32], index: 1, kind: input, shape index: {}]   ;;  %s3463_s2 = inlined_call_operand.vmem [shape: f32[1,32], index: 2, kind: input, shape index: {}]   ;;  %s3464_s3 = inlined_call_operand.vmem [shape: f32[1,32], index: 3, kind: input, shape index: {}]   ;;  %s3465_s4 = inlined_call_operand.vmem [shape: f32[1,32], index: 4, kind: input, shape index: {}]   ;;  %s3466_s5 = inlined_call_operand.vmem [shape: f32[1,32], index: 5, kind: input, shape index: {}]   ;;  %s3467_s6 = inlined_call_operand.vmem [shape: bf16[32,96], index: 6, kind: input, shape index: {}]   ;;  %s3468_s7 = inlined_call_operand.vmem [shape: f32[1,96], index: 7, kind: input, shape index: {}]   ;;  %s3469_s8 = inlined_call_operand.vmem [shape: f32[1,8], index: 8, kind: input, shape index: {}]   ;;  %s3470_s9 = inlined_call_operand.vmem [shape: f32[1,8], index: 9, kind: input, shape index: {}]   ;;  %s3471_s10 = inlined_call_operand.vmem [shape: f32[1,8], index: 10, kind: input, shape index: {}]   ;;  %s3472_s11 = inlined_call_operand.vmem [shape: f32[1,8], index: 11, kind: input, shape index: {}]   ;;  %s3473_s12 = inlined_call_operand.vmem [shape: bf16[32,32], index: 12, kind: input, shape index: {}]   ;;  %s3474_s13 = inlined_call_operand.vmem [shape: f32[1,32], index: 13, kind: input, shape index: {}]   ;;  %s3475_s14 = inlined_call_operand.vmem [shape: bf16[32,128], index: 14, kind: input, shape index: {}]   ;;  %s3476_s15 = inlined_call_operand.vmem [shape: f32[1,128], index: 15, kind: input, shape index: {}]   ;;  %s3477_s16 = inlined_call_operand.vmem [shape: bf16[128,32], index: 16, kind: input, shape index: {}]   ;;  %s3478_s17 = inlined_call_operand.vmem [shape: f32[1,32], index: 17, kind: input, shape index: {}]   ;;  %s3479_s18 = inlined_call_operand.hbm [shape: f32[2,8,32], index: 18, kind: output, shape index: {}]  }
   0x1   :  { %3483 = sst [smem:[#allocation14_spill]] %s3461_s0 }
   0x2   :  { %3484 = sst [smem:[#allocation15_spill]] %s3462_s1 }
   0x3   :  { %3485 = sst [smem:[#allocation16_spill]] %s3463_s2 }
   0x4   :  { %3486 = sst [smem:[#allocation17_spill]] %s3464_s3 }
   0x5   :  { %3487 = sst [smem:[#allocation18_spill]] %s3465_s4 }
   0x6   :  { %3488 = sst [smem:[#allocation19_spill]] %s3467_s6 }
   0x7   :  { %23 = vsyncpa [#allocation9], 0 }
   0x8   :  { %25 = vsyncpa [#allocation9 + $0x1], 0  ;;  %s2908_s27 = smov 0   ;;  %s2910_s28 = smov 0  }
   0x9   :  { %s2912_s29 = smov 0   ;;  %s2914_s30 = smov 0  }
   0xa LB: > { %3489 = sst [smem:[#allocation11_spill]] %s2791_s29  ;;  %s2929_s0 = sadd.s32 4294967295, %s2795_s30   ;;  %s2795_s30 = sphi %s2914_s30, %s3500_s30   ;;  %s2791_s29 = sphi %s2912_s29, %s3502_s29   ;;  %s2787_s28 = sphi %s2910_s28, %s3504_s28   ;;  %s2783_s27 = sphi %s2908_s27, %s3503_s27  }
   0xb   : > { %s2433_s19 = sadd.s32 4294967294, %s2795_s30   ;;  %s2933_s1 = sadd.s32 1, %s2795_s30  }
   0xc   : > { %3490 = sst [smem:[#allocation12_spill]] %s2933_s1  ;;  %s426_s20 = sadd.s32 1, %s2791_s29 }
   0xd   : > { %s423_s21 = ssub.s32 %s2795_s30, %s2933_s1  ;;  %p436_p0 = scmp.ne.s32.totalorder %s2791_s29, %s2787_s28 }
   0xe   : > { %p424_p1 = scmp.eq.s32.totalorder %s423_s21, 0  ;;  %p437_p2 = scmp.eq.s32.totalorder %s2929_s0, 1 }
   0xf   : > { %p442_p3 = scmp.ne.s32.totalorder %s2787_s28, %s2783_s27  ;;  %p443_p4 = scmp.eq.s32.totalorder %s2433_s19, 1 }
  0x10   : > { %s2944_s22 = scalar_select %p424_p1, %s2791_s29, %s426_s20  }
  0x11   : > { %p2946_p5 = por %p437_p2, %p436_p0  ;;  %p2950_p6 = por %p443_p4, %p442_p3 }
  0x12   : > { %3491 = sst [smem:[#allocation13_spill]] %s2944_s22  ;;  %p2436_p7 = scmp.ge.s32.totalorder %s2795_s30, 1 }
  0x13   : > { %p523_p8 = scmp.lt.s32.totalorder %s2795_s30, 3 }
  0x15   : > { %p524_p9 = pnand %p2436_p7, %p523_p8 }
  0x16   : > { %p580_p10 = scmp.lt.s32.totalorder (!%p524_p9), %s2929_s0, 1  ;;  %s3494_s20 = sld [smem:[#allocation14_spill]] (!%p524_p9) }
  0x17   : > { %527 = sbr.rel (%p524_p9) target bundleno = 3000 (0xbb8), region = 92  ;;  %s3495_s6 = sld [smem:[#allocation19_spill]] (!%p524_p9) }
  0x18   : > { %s3497_s1 = sld [smem:[#allocation16_spill]] (!%p524_p9)  ;;  %s2799_s29 = smov (!%p524_p9), 104  }
  0x19   : > { %s3498_s3 = sld [smem:[#allocation17_spill]] (!%p524_p9)  ;;  %s2800_s22 = smov (!%p524_p9), 120  }
  0x1a   : > { %s2802_s19 = smov (!%p524_p9), 96   ;;  %s3499_s4 = sld [smem:[#allocation18_spill]] (!%p524_p9) }
  0x1c   : > { %s2958_s24 = scalar_select %p580_p10, %s2929_s0, 1  ;;  %vm593_vm0 = vcmask 261120   ;;  %v2797_v8 = vmov 0.0   ;;  %vm2798_vm1 = vmmov 0   ;;  %v623_v13 = vlaneseq  ;;  %v2442_v30 = vld [vmem:[%s3468_s7] ss:$0 sm:$0xff] }
  0x1d   : > { %v2673_v7 = vld [vmem:[%s3495_s6 + $0x8] sm:$0xff]   ;;  %2525 = vmatprep.subr.bf16.mxu0 %v2797_v8  ;;  %2151 = vst.msk [vmem:[#allocation7] sm:$0xff] %vm593_vm0, %v2797_v8  ;;  %2529 = vmatprep.mubr.msk.bf16.mxu0 %vm2798_vm1, %v2797_v8  ;;  %v2674_v9 = vld [vmem:[%s3495_s6] sm:$0xff]   ;;  %vm1150_vm2 = vcmask 64512   ;;  %v2803_v39 = vmov 1983009808  }
  0x1e   : > { %s2438_s25 = sshll.u32 %s2958_s24, 3  ;;  %2526 = vmatpush3.bf16.msra.mxu0 %v2673_v7  ;;  %2545 = vmatprep.subr.bf16.mxu1 %v2797_v8  ;;  %v2995_v14 = vshrl.u32 %v623_v13, 7  ;;  %v2440_v19 = vld [vmem:[%s3497_s1] ss:$0 sm:$0xff]  ;;  %1324 = vst.msk [vmem:[#allocation6] sm:$0xff] %vm1150_vm2, %v2797_v8  ;;  %1325 = vst.msk [vmem:[#allocation6 + $0x8] sm:$0xff] %vm1150_vm2, %v2797_v8  ;;  %v713_v40 = vunpack.c.l.s4 %v2803_v39 }
  0x1f   : > { %s2966_s21 = scalar_lea.vmem %s3494_s20, %s2438_s25  ;;  %2527 = vmatprep.subr.bf16.mxu0 %v2797_v8  ;;  %2547 = vmatprep.mubr.msk.bf16.mxu1 %vm2798_vm1, %v2797_v8  ;;  %s3496_s20 = sld [smem:[#allocation15_spill]]  ;;  %v2441_v22 = vld [vmem:[%s3498_s3] ss:$0 sm:$0xff]  ;;  %1326 = vst.msk [vmem:[#allocation6 + $0x10] sm:$0xff] %vm1150_vm2, %v2797_v8  ;;  %1327 = vst.msk [vmem:[#allocation6 + $0x18] sm:$0xff] %vm1150_vm2, %v2797_v8  ;;  %vm1306_vm3 = vcmask 60416  }
  0x20   : > { %v589_v0 = vld [vmem:[%s2966_s21] sm:$0xff]  ;;  %v625_v17 = vsub.s32 1, %v2995_v14  ;;  %v630_v21 = vsub.s32 0, %v2995_v14  ;;  %v714_v41 = vunpack.c.0.s8 %v713_v40  ;;  %v2804_v42 = vmov 1934713408   ;;  %s2808_s24 = smov 64  }
  0x21   : > { %v594_v1 = vsel %vm593_vm0, %v589_v0, 0.0  ;;  %v745_v43 = vunpack.c.l.s4 %v2804_v42  ;;  %vm1315_vm4 = vcmask 7168   ;;  %vm1655_vm6 = vcmask 1043456   ;;  %s2812_s3 = smov [#allocation8]  }
  0x22   : > { %595 = vadd.xlane.f32.xlu0 %v594_v1  ;;  %2528 = vmatpush3.bf16.msra.mxu0 %v2674_v9  ;;  %v3043_v46 = vsub.s32 %v714_v41, %v2995_v14  ;;  %1320 = vst.msk [vmem:[#allocation5] sm:$0xff] %vm1315_vm4, %v2797_v8  ;;  %1321 = vst.msk [vmem:[#allocation5 + $0x8] sm:$0xff] %vm1315_vm4, %v2797_v8  ;;  %vm2034_vm7 = vcmask 130048   ;;  %vm2036_vm8 = vcmask 195584  }
  0x23   : > { %2533 = vmatprep.subr.bf16.mxu0 %v2797_v8  ;;  %v746_v50 = vunpack.c.0.s8 %v745_v43  ;;  %1322 = vst.msk [vmem:[#allocation5 + $0x10] sm:$0xff] %vm1315_vm4, %v2797_v8  ;;  %1323 = vst.msk [vmem:[#allocation5 + $0x18] sm:$0xff] %vm1315_vm4, %v2797_v8 }
  0x25   : > { %s2992_s26 = scalar_lea.vmem %s3496_s20, %s2438_s25  ;;  %s2801_s20 = smov 112   ;;  %v3054_v56 = vsub.s32 %v746_v50, %v2995_v14 }
  0x26   : > { %v590_v15 = vld [vmem:[%s2992_s26] sm:$0x3f] }
  0x27   : > { %v2998_v16 = vadd.f32 1.0, %v590_v15  ;;  %v631_v26 = vrot.slane %v590_v15, %v630_v21 }
  0x29   : > { %v626_v24 = vrot.slane %v2998_v16, %v625_v17 }
  0xab   : > { %v596_v2 = vpop.xlane.xlu0 %595 }
  0xac   : > { %v598_v3 = vmul.f32 0.03125, %v596_v2 }
  0xae   : > { %v599_v4 = vsub.f32 %v589_v0, %v598_v3 }
  0xb0   : > { %v600_v5 = vmul.f32 %v599_v4, %v599_v4 }
  0xb2   : > { %v601_v6 = vsel %vm593_vm0, %v600_v5, 0.0 }
  0xb3   : > { %602 = vadd.xlane.f32.xlu0 %v601_v6 }
 0x13c   : > { %v603_v10 = vpop.xlane.xlu0 %602 }
 0x13d   : > { %v604_v11 = vmul.f32 0.03125, %v603_v10 }
 0x13f   : > { %v605_v12 = vadd.f32 1e-05, %v604_v11 }
 0x141   : > { %2687 = vrsqrt.f32 %v605_v12 }
 0x14e   : > { %v2688_v18 = vpop.eup %2687 }
 0x14f   : > { %v607_v20 = vmul.f32 %v2688_v18, %v599_v4 }
 0x151   : > { %v614_v23 = vmul.f32 %v2440_v19, %v607_v20 }
 0x153   : > { %v621_v25 = vadd.f32 %v2441_v22, %v614_v23 }
 0x155   : > { %v627_v27 = vmul.f32 %v626_v24, %v621_v25 }
 0x157   : > { %v632_v28 = vadd.f32 %v631_v26, %v627_v27 }
 0x159   : > { %v633_v29 = vpack.c.bf16 %v632_v28, %v632_v28 }
 0x15b   : > { %2530 = vmatmul.mubr.msk.bf16.vlgmr.msra.gmra.mxu0 %vm593_vm0, %v633_v29 }
 0x15c   : > { %2535 = vmatprep.mubr.msk.bf16.mxu0 %vm2798_vm1, %v2797_v8 }
 0x21b   : > { %v694_v31 = vpop.f32.mrf.mxu0 }
 0x21c   : > { %v3015_v32 = vadd.f32 %v2442_v30, %v694_v31 }
 0x21d   : > { %v2531_v33 = vpop.f32.mrf.mxu0 }
 0x21e   : > { %707 = vrot.lane.b32.xlu0 %v3015_v32, %s2799_s29  ;;  %701 = vrot.lane.b32.xlu1 %v3015_v32, %s2800_s22  ;;  %s2809_s22 = smov 16  }
 0x21f   : > { %v697_v34 = vpop.f32.mrf.mxu0 }
 0x221   : > { %v2532_v35 = vpop.f32.mrf.mxu0 }
 0x222   : > { %704 = vrot.lane.b32.xlu1 %v3015_v32, %s2801_s20  ;;  %s2810_s20 = smov 8  }
 0x226   : > { %778 = vrot.lane.b32.xlu1 %v3015_v32, %s2802_s19 }
 0x290   : > { %v3029_v36 = vpop.permute.xlu1 %701  ;;  %v3035_v38 = vpop.permute.xlu0 %707 }
 0x291   : > { %780 = vrot.lane.b32.xlu1 %v3029_v36, %s2802_s19  ;;  %v726_v47 = vcombine.low %v3029_v36, %v3035_v38  ;;  %v727_v48 = vcombine.high %v3029_v36, %v3035_v38 }
 0x293   : > { %v734_v53 = vrot.slane %v726_v47, %v3043_v46  ;;  %v741_v54 = vrot.slane %v727_v48, %v3043_v46 }
 0x294   : > { %v3032_v37 = vpop.permute.xlu1 %704 }
 0x295   : > { %782 = vrot.lane.b32.xlu1 %v3032_v37, %s2802_s19  ;;  %v710_v44 = vcombine.low %v3015_v32, %v3032_v37  ;;  %v711_v45 = vcombine.high %v3015_v32, %v3032_v37 }
 0x297   : > { %v718_v51 = vrot.slane %v710_v44, %v3043_v46  ;;  %v725_v52 = vrot.slane %v711_v45, %v3043_v46 }
 0x298   : > { %v779_v49 = vpop.permute.xlu1 %778 }
 0x299   : > { %784 = vrot.lane.b32.xlu1 %v3035_v38, %s2802_s19  ;;  %v742_v57 = vcombine.low %v718_v51, %v734_v53  ;;  %v743_v58 = vcombine.high %v718_v51, %v734_v53  ;;  %v758_v59 = vcombine.low %v725_v52, %v741_v54  ;;  %v759_v60 = vcombine.high %v725_v52, %v741_v54  ;;  %s2811_s19 = smov 24  }
 0x29b   : > { %v750_v62 = vrot.slane %v742_v57, %v3054_v56  ;;  %v757_v63 = vrot.slane %v743_v58, %v3054_v56  ;;  %v766_v0 = vrot.slane %v758_v59, %v3054_v56  ;;  %v773_v1 = vrot.slane %v759_v60, %v3054_v56 }
 0x29d   : > { %v946_v7 = vcombine.low %v750_v62, %v757_v63  ;;  %v2446_v9 = vcombine.high %v750_v62, %v757_v63  ;;  %v962_v10 = vcombine.low %v766_v0, %v773_v1  ;;  %v2447_v11 = vcombine.high %v766_v0, %v773_v1 }
 0x29f   : > { %v953_v23 = vrot.slane %v946_v7, %v3043_v46  ;;  %v961_v24 = vrot.slane %v2446_v9, %v3043_v46  ;;  %v969_v25 = vrot.slane %v962_v10, %v3043_v46  ;;  %v977_v26 = vrot.slane %v2447_v11, %v3043_v46 }
 0x2a1   : > { %v978_v39 = vcombine.low %v953_v23, %v961_v24  ;;  %v994_v40 = vcombine.low %v969_v25, %v977_v26  ;;  %v979_v59 = vcombine.high %v953_v23, %v961_v24  ;;  %v995_v60 = vcombine.high %v969_v25, %v977_v26 }
 0x2a3   : > { %v986_v50 = vrot.slane %v978_v39, %v3054_v56  ;;  %v1002_v51 = vrot.slane %v994_v40, %v3054_v56  ;;  %v993_v1 = vrot.slane %v979_v59, %v3054_v56 }
 0x2a5   : > { %v1010_v0 = vcombine.low %v986_v50, %v1002_v51 }
 0x303   : > { %v781_v55 = vpop.permute.xlu1 %780 }
 0x307   : > { %v783_v61 = vpop.permute.xlu1 %782 }
 0x308   : > { %v790_v2 = vcombine.low %v779_v49, %v783_v61  ;;  %v791_v3 = vcombine.high %v779_v49, %v783_v61 }
 0x30a   : > { %v798_v12 = vrot.slane %v790_v2, %v3043_v46  ;;  %v805_v15 = vrot.slane %v791_v3, %v3043_v46  ;;  %v1009_v2 = vrot.slane %v995_v60, %v3054_v56 }
 0x30b   : > { %v785_v4 = vpop.permute.xlu1 %784 }
 0x30c   : > { %v806_v5 = vcombine.low %v781_v55, %v785_v4  ;;  %v807_v6 = vcombine.high %v781_v55, %v785_v4  ;;  %v1151_v4 = vsel %vm1150_vm2, %v1010_v0, 0.0  ;;  %v1013_v10 = vcombine.high %v993_v1, %v1009_v2 }
 0x30d   : > { %v1012_v11 = vcombine.low %v993_v1, %v1009_v2 }
 0x30e   : > { %v814_v17 = vrot.slane %v806_v5, %v3043_v46  ;;  %v821_v18 = vrot.slane %v807_v6, %v3043_v46  ;;  %v1011_v5 = vcombine.high %v986_v50, %v1002_v51 }
 0x310   : > { %v822_v19 = vcombine.low %v798_v12, %v814_v17  ;;  %v823_v20 = vcombine.high %v798_v12, %v814_v17  ;;  %v838_v21 = vcombine.low %v805_v15, %v821_v18  ;;  %v839_v22 = vcombine.high %v805_v15, %v821_v18 }
 0x311   : > { %v1154_v7 = vsel %vm1150_vm2, %v1011_v5, 0.0  ;;  %v1160_v12 = vsel %vm1150_vm2, %v1013_v10, 0.0  ;;  %v1157_v15 = vsel %vm1150_vm2, %v1012_v11, 0.0 }
 0x312   : > { %v830_v27 = vrot.slane %v822_v19, %v3054_v56  ;;  %v837_v28 = vrot.slane %v823_v20, %v3054_v56  ;;  %v846_v29 = vrot.slane %v838_v21, %v3054_v56  ;;  %v853_v30 = vrot.slane %v839_v22, %v3054_v56 }
 0x314   : > { %v1014_v31 = vcombine.low %v830_v27, %v837_v28  ;;  %v2448_v33 = vcombine.high %v830_v27, %v837_v28  ;;  %v1030_v34 = vcombine.low %v846_v29, %v853_v30  ;;  %v2449_v35 = vcombine.high %v846_v29, %v853_v30 }
 0x316   : > { %v1021_v41 = vrot.slane %v1014_v31, %v3043_v46  ;;  %v1029_v42 = vrot.slane %v2448_v33, %v3043_v46  ;;  %v1037_v43 = vrot.slane %v1030_v34, %v3043_v46  ;;  %v1045_v44 = vrot.slane %v2449_v35, %v3043_v46 }
 0x318   : > { %v1046_v45 = vcombine.low %v1021_v41, %v1029_v42  ;;  %v1062_v47 = vcombine.low %v1037_v43, %v1045_v44  ;;  %v1047_v48 = vcombine.high %v1021_v41, %v1029_v42  ;;  %v1063_v49 = vcombine.high %v1037_v43, %v1045_v44 }
 0x31a   : > { %v1054_v52 = vrot.slane %v1046_v45, %v3054_v56  ;;  %v1070_v53 = vrot.slane %v1062_v47, %v3054_v56  ;;  %v1061_v54 = vrot.slane %v1047_v48, %v3054_v56  ;;  %v1077_v55 = vrot.slane %v1063_v49, %v3054_v56 }
 0x31c   : > { %v1079_v57 = vcombine.high %v1054_v52, %v1070_v53  ;;  %v1078_v58 = vcombine.low %v1054_v52, %v1070_v53  ;;  %v1080_v63 = vcombine.low %v1061_v54, %v1077_v55  ;;  %v1081_v6 = vcombine.high %v1061_v54, %v1077_v55 }
 0x31e   : > { %v1233_v61 = vsel %vm1150_vm2, %v1079_v57, 0.0  ;;  %v1230_v62 = vsel %vm1150_vm2, %v1078_v58, 0.0  ;;  %v1236_v3 = vsel %vm1150_vm2, %v1080_v63, 0.0  ;;  %v1239_v9 = vsel %vm1150_vm2, %v1081_v6, 0.0 }
 0x31f   : > { %1234 = vadd.xlane.f32.xlu0 %v1233_v61  ;;  %1231 = vadd.xlane.f32.xlu1 %v1230_v62 }
 0x323   : > { %1237 = vadd.xlane.f32.xlu0 %v1236_v3  ;;  %1152 = vadd.xlane.f32.xlu1 %v1151_v4 }
 0x327   : > { %1155 = vadd.xlane.f32.xlu0 %v1154_v7  ;;  %1240 = vadd.xlane.f32.xlu1 %v1239_v9 }
 0x32b   : > { %1161 = vadd.xlane.f32.xlu0 %v1160_v12  ;;  %1158 = vadd.xlane.f32.xlu1 %v1157_v15 }
 0x3a8   : > { %v1235_v17 = vpop.xlane.xlu0 %1234  ;;  %v1232_v18 = vpop.xlane.xlu1 %1231 }
 0x3a9   : > { %v1243_v19 = vmul.f32 0.125, %v1235_v17  ;;  %v1242_v20 = vmul.f32 0.125, %v1232_v18 }
 0x3ab   : > { %v3092_v21 = vsub.f32 %v1079_v57, %v1243_v19  ;;  %v3094_v22 = vsub.f32 %v1078_v58, %v1242_v20 }
 0x3ac   : > { %v1238_v23 = vpop.xlane.xlu0 %1237  ;;  %v1153_v24 = vpop.xlane.xlu1 %1152 }
 0x3ad   : > { %v1244_v25 = vmul.f32 0.125, %v1238_v23  ;;  %v1164_v26 = vmul.f32 0.125, %v1153_v24  ;;  %v1251_v27 = vmul.f32 %v3092_v21, %v3092_v21  ;;  %v1250_v28 = vmul.f32 %v3094_v22, %v3094_v22 }
 0x3af   : > { %v3100_v29 = vsub.f32 %v1080_v63, %v1244_v25  ;;  %v3102_v30 = vsub.f32 %v1010_v0, %v1164_v26  ;;  %v1257_v31 = vsel %vm1150_vm2, %v1251_v27, 0.0  ;;  %v1254_v33 = vsel %vm1150_vm2, %v1250_v28, 0.0  ;;  %v2456_v26 = vld [vmem:[%s3471_s10] ss:$0 sm:$0xff] }
 0x3b0   : > { %1258 = vadd.xlane.f32.xlu0 %v1257_v31  ;;  %v1156_v34 = vpop.xlane.xlu0 %1155  ;;  %1255 = vadd.xlane.f32.xlu1 %v1254_v33  ;;  %v1241_v35 = vpop.xlane.xlu1 %1240 }
 0x3b1   : > { %v1165_v39 = vmul.f32 0.125, %v1156_v34  ;;  %v1245_v40 = vmul.f32 0.125, %v1241_v35  ;;  %v1252_v41 = vmul.f32 %v3100_v29, %v3100_v29  ;;  %v1172_v42 = vmul.f32 %v3102_v30, %v3102_v30  ;;  %v2457_v34 = vld [vmem:[%s3472_s11] ss:$0 sm:$0xff] }
 0x3b3   : > { %v3110_v43 = vsub.f32 %v1011_v5, %v1165_v39  ;;  %v3112_v44 = vsub.f32 %v1081_v6, %v1245_v40  ;;  %v1260_v45 = vsel %vm1150_vm2, %v1252_v41, 0.0  ;;  %v1176_v47 = vsel %vm1150_vm2, %v1172_v42, 0.0 }
 0x3b4   : > { %1261 = vadd.xlane.f32.xlu0 %v1260_v45  ;;  %v1162_v48 = vpop.xlane.xlu0 %1161  ;;  %1177 = vadd.xlane.f32.xlu1 %v1176_v47  ;;  %v1159_v49 = vpop.xlane.xlu1 %1158 }
 0x3b5   : > { %v1167_v50 = vmul.f32 0.125, %v1162_v48  ;;  %v1166_v51 = vmul.f32 0.125, %v1159_v49  ;;  %v1173_v52 = vmul.f32 %v3110_v43, %v3110_v43  ;;  %v1253_v53 = vmul.f32 %v3112_v44, %v3112_v44 }
 0x3b7   : > { %v3120_v54 = vsub.f32 %v1013_v10, %v1167_v50  ;;  %v3122_v55 = vsub.f32 %v1012_v11, %v1166_v51  ;;  %v1179_v57 = vsel %vm1150_vm2, %v1173_v52, 0.0  ;;  %v1263_v58 = vsel %vm1150_vm2, %v1253_v53, 0.0 }
 0x3b8   : > { %1180 = vadd.xlane.f32.xlu0 %v1179_v57  ;;  %1264 = vadd.xlane.f32.xlu1 %v1263_v58 }
 0x3b9   : > { %v1175_v59 = vmul.f32 %v3120_v54, %v3120_v54  ;;  %v1174_v60 = vmul.f32 %v3122_v55, %v3122_v55 }
 0x3bb   : > { %v1185_v61 = vsel %vm1150_vm2, %v1175_v59, 0.0  ;;  %v1182_v62 = vsel %vm1150_vm2, %v1174_v60, 0.0 }
 0x3bc   : > { %1186 = vadd.xlane.f32.xlu0 %v1185_v61  ;;  %1183 = vadd.xlane.f32.xlu1 %v1182_v62  ;;  %v2454_v61 = vld [vmem:[%s3469_s8] ss:$0 sm:$0xff] }
 0x439   : > { %v1259_v63 = vpop.xlane.xlu0 %1258  ;;  %v1256_v0 = vpop.xlane.xlu1 %1255 }
 0x43a   : > { %v1267_v1 = vmul.f32 0.125, %v1259_v63  ;;  %v1266_v2 = vmul.f32 0.125, %v1256_v0 }
 0x43c   : > { %v1271_v3 = vadd.f32 1e-05, %v1267_v1  ;;  %v1270_v4 = vadd.f32 1e-05, %v1266_v2 }
 0x43d   : > { %v1262_v5 = vpop.xlane.xlu0 %1261  ;;  %v1178_v6 = vpop.xlane.xlu1 %1177 }
 0x43e   : > { %2689 = vrsqrt.f32 %v1271_v3  ;;  %v1268_v7 = vmul.f32 0.125, %v1262_v5  ;;  %v1188_v9 = vmul.f32 0.125, %v1178_v6 }
 0x43f   : > { %2691 = vrsqrt.f32 %v1270_v4 }
 0x440   : > { %v1272_v10 = vadd.f32 1e-05, %v1268_v7  ;;  %v1192_v12 = vadd.f32 1e-05, %v1188_v9 }
 0x441   : > { %v1265_v11 = vpop.xlane.xlu1 %1264  ;;  %v1181_v17 = vpop.xlane.xlu0 %1180 }
 0x442   : > { %2693 = vrsqrt.f32 %v1272_v10  ;;  %v1269_v15 = vmul.f32 0.125, %v1265_v11  ;;  %v1189_v23 = vmul.f32 0.125, %v1181_v17 }
 0x443   : > { %2695 = vrsqrt.f32 %v1192_v12 }
 0x444   : > { %v1273_v18 = vadd.f32 1e-05, %v1269_v15  ;;  %v1193_v27 = vadd.f32 1e-05, %v1189_v23 }
 0x445   : > { %v1184_v19 = vpop.xlane.xlu1 %1183  ;;  %v1187_v33 = vpop.xlane.xlu0 %1186 }
 0x446   : > { %v1190_v20 = vmul.f32 0.125, %v1184_v19  ;;  %2697 = vrsqrt.f32 %v1273_v18  ;;  %v1191_v42 = vmul.f32 0.125, %v1187_v33 }
 0x448   : > { %v1194_v24 = vadd.f32 1e-05, %v1190_v20  ;;  %v1195_v52 = vadd.f32 1e-05, %v1191_v42 }
 0x44a   : > { %2699 = vrsqrt.f32 %v1194_v24 }
 0x44b   : > { %v2690_v25 = vpop.eup %2689  ;;  %2701 = vrsqrt.f32 %v1193_v27  ;;  %v2805_v27 = vmov -inf  }
 0x44c   : > { %v2692_v28 = vpop.eup %2691  ;;  %v1279_v31 = vmul.f32 %v2690_v25, %v3092_v21  ;;  %2703 = vrsqrt.f32 %v1195_v52  ;;  %1316 = vst.msk [vmem:[#allocation4] sm:$0xff] %vm1315_vm4, %v2805_v27  ;;  %1317 = vst.msk [vmem:[#allocation4 + $0x8] sm:$0xff] %vm1315_vm4, %v2805_v27 }
 0x44d   : > { %v1278_v35 = vmul.f32 %v2692_v28, %v3094_v22  ;;  %1318 = vst.msk [vmem:[#allocation4 + $0x10] sm:$0xff] %vm1315_vm4, %v2805_v27  ;;  %1319 = vst.msk [vmem:[#allocation4 + $0x18] sm:$0xff] %vm1315_vm4, %v2805_v27  ;;  %v1331_v28 = vand.u32 127, %v623_v13 }
 0x44e   : > { %v1289_v39 = vmul.f32 %v2456_v26, %v1279_v31  ;;  %v2806_v31 = vmov -1e+30  }
 0x44f   : > { %v2694_v40 = vpop.eup %2693  ;;  %v1288_v41 = vmul.f32 %v2456_v26, %v1278_v35  ;;  %vm1342_vm5 = vcmp.ge.s32.totalorder %v2995_v14, %v1331_v28 }
 0x450   : > { %v1299_v45 = vadd.f32 %v2457_v34, %v1289_v39  ;;  %v1280_v47 = vmul.f32 %v2694_v40, %v3100_v29  ;;  %v2696_v21 = vpop.eup %2695  ;;  %v1343_v33 = vsel %vm1342_vm5, 0.0, %v2806_v31 }
 0x451   : > { %v1298_v48 = vadd.f32 %v2457_v34, %v1288_v41  ;;  %v1200_v59 = vmul.f32 %v2696_v21, %v3102_v30  ;;  %v2455_v30 = vld [vmem:[%s3470_s9] ss:$0 sm:$0xff] }
 0x452   : > { %v1303_v49 = vpack.c.bf16 %v1299_v45, %v1299_v45  ;;  %v1290_v50 = vmul.f32 %v2456_v26, %v1280_v47 }
 0x453   : > { %v1302_v51 = vpack.c.bf16 %v1298_v48, %v1298_v48  ;;  %v2698_v53 = vpop.eup %2697  ;;  %v1210_v1 = vmul.f32 %v2454_v61, %v1200_v59 }
 0x454   : > { %1308 = vst.msk [vmem:[#allocation2 + $0x4] sm:$0xf] %vm1306_vm3, %v1303_v49  ;;  %v1300_v57 = vadd.f32 %v2457_v34, %v1290_v50  ;;  %v1281_v22 = vmul.f32 %v2698_v53, %v3112_v44 }
 0x455   : > { %1307 = vst.msk [vmem:[#allocation2] sm:$0xf] %vm1306_vm3, %v1302_v51  ;;  %v1220_v7 = vadd.f32 %v2455_v30, %v1210_v1 }
 0x456   : > { %v1304_v58 = vpack.c.bf16 %v1300_v57, %v1300_v57  ;;  %v1291_v60 = vmul.f32 %v2456_v26, %v1281_v22 }
 0x457   : > { %v2700_v29 = vpop.eup %2699  ;;  %v1224_v11 = vpack.c.bf16 %v1220_v7, %v1220_v7 }
 0x458   : > { %1309 = vst.msk [vmem:[#allocation2 + $0x8] sm:$0xf] %vm1306_vm3, %v1304_v58  ;;  %v1301_v62 = vadd.f32 %v2457_v34, %v1291_v60  ;;  %v1202_v63 = vmul.f32 %v2700_v29, %v3122_v55  ;;  %v2702_v2 = vpop.eup %2701  ;;  %v2807_v58 = vmov 0  }
 0x459   : > { %v1201_v5 = vmul.f32 %v2702_v2, %v3110_v43  ;;  %v2704_v15 = vpop.eup %2703  ;;  %2671 = vset.pattern.permute.xlu0 %v2807_v58  ;;  %2672 = vset.pattern.permute.xlu1 %v2807_v58 }
 0x45a   : > { %v1305_v0 = vpack.c.bf16 %v1301_v62, %v1301_v62  ;;  %v1212_v4 = vmul.f32 %v2454_v61, %v1202_v63  ;;  %v1203_v18 = vmul.f32 %v2704_v15, %v3120_v54 }
 0x45b   : > { %v1333_v9 = vld [vmem:[#allocation2 + $0x4] sm:$0xf]  ;;  %v1211_v12 = vmul.f32 %v2454_v61, %v1201_v5 }
 0x45c   : > { %v1332_v3 = vld [vmem:[#allocation2] sm:$0xf]  ;;  %1310 = vst.msk [vmem:[#allocation2 + $0xc] sm:$0xf] %vm1306_vm3, %v1305_v0  ;;  %v1222_v10 = vadd.f32 %v2455_v30, %v1212_v4  ;;  %v1394_v17 = vsel %vm1150_vm2, %v1333_v9, 0  ;;  %v1213_v24 = vmul.f32 %v2454_v61, %v1203_v18 }
 0x45d   : > { %v1348_v44 = vsel %vm1150_vm2, %v1332_v3, 0  ;;  %v1221_v19 = vadd.f32 %v2455_v30, %v1211_v12  ;;  %v3212_v0 = vld [vmem:[#allocation4] sm:$0xff]  ;;  %v3217_v3 = vld [vmem:[#allocation4 + $0x10] sm:$0xff] }
 0x45e   : > { %2534 = vmatpush3.bf16.xpose.msra.mxu0 %v1348_v44  ;;  %v1226_v43 = vpack.c.bf16 %v1222_v10, %v1222_v10  ;;  %v1223_v54 = vadd.f32 %v2455_v30, %v1213_v24 }
 0x45f   : > { %v1334_v6 = vld [vmem:[#allocation2 + $0x8] sm:$0xf]  ;;  %2539 = vmatprep.subr.bf16.mxu0 %v2797_v8  ;;  %v1225_v23 = vpack.c.bf16 %v1221_v19, %v1221_v19 }
 0x460   : > { %v1440_v55 = vsel %vm1150_vm2, %v1334_v6, 0  ;;  %v1227_v26 = vpack.c.bf16 %v1223_v54, %v1223_v54 }
 0x461   : > { %2546 = vmatpush3.bf16.xpose.msra.mxu1 %v1440_v55  ;;  %v3241_v55 = vld [vmem:[#allocation4 + $0x18] sm:$0xff] }
 0x462   : > { %2557 = vmatprep.subr.bf16.mxu1 %v2797_v8 }
 0x463   : > { %v1335_v20 = vld [vmem:[#allocation2 + $0xc] sm:$0xf] }
 0x464   : > { %v1486_v25 = vsel %vm1150_vm2, %v1335_v20, 0 }
 0x465   : > { %2536 = vmatmul.mubr.msk.bf16.vlgmr.msra.gmra.mxu0 %vm1150_vm2, %v1224_v11 }
 0x466   : > { %2540 = vmatpush3.bf16.xpose.msra.mxu0 %v1394_v17  ;;  %2541 = vmatprep.mubr.msk.bf16.mxu0 %vm2798_vm1, %v2797_v8 }
 0x467   : > { %2551 = vmatprep.subr.bf16.mxu0 %v2797_v8 }
 0x468   : > { %2548 = vmatmul.mubr.msk.bf16.vlgmr.msra.gmra.mxu1 %vm1150_vm2, %v1226_v43 }
 0x469   : > { %2559 = vmatprep.mubr.msk.bf16.mxu1 %vm2798_vm1, %v2797_v8 }
 0x46d   : > { %2542 = vmatmul.mubr.msk.bf16.vlgmr.msra.gmra.mxu0 %vm1150_vm2, %v1225_v23 }
 0x46e   : > { %2552 = vmatpush3.bf16.xpose.msra.mxu0 %v1486_v25  ;;  %2553 = vmatprep.mubr.msk.bf16.mxu0 %vm2798_vm1, %v2797_v8 }
 0x46f   : > { %2563 = vmatprep.subr.bf16.mxu0 %v2797_v8 }
 0x475   : > { %2554 = vmatmul.mubr.msk.bf16.vlgmr.msra.gmra.mxu0 %vm1150_vm2, %v1227_v26 }
 0x476   : > { %2565 = vmatprep.mubr.msk.bf16.mxu0 %vm2798_vm1, %v2797_v8 }
 0x525   : > { %v1384_v34 = vpop.f32.mrf.mxu0 }
 0x526   : > { %v3190_v35 = vadd.f32 %v1384_v34, %v1343_v33 }
 0x527   : > { %v2537_v39 = vpop.f32.mrf.mxu0 }
 0x528   : > { %v1476_v40 = vpop.f32.mrf.mxu1  ;;  %v1532_v41 = vsel %vm1150_vm2, %v3190_v35, -inf }
 0x529   : > { %v3194_v42 = vadd.f32 %v1476_v40, %v1343_v33  ;;  %1533 = vmax.xlane.f32.xlu1 %v1532_v41  ;;  %v1387_v45 = vpop.f32.mrf.mxu0 }
 0x52a   : > { %v2549_v47 = vpop.f32.mrf.mxu1 }
 0x52b   : > { %v2538_v48 = vpop.f32.mrf.mxu0  ;;  %v1538_v13 = vsel %vm1150_vm2, %v3194_v42, -inf }
 0x52c   : > { %v1479_v49 = vpop.f32.mrf.mxu1 }
 0x52d   : > { %1539 = vmax.xlane.f32.xlu1 %v1538_v13  ;;  %v1430_v50 = vpop.f32.mrf.mxu0 }
 0x52e   : > { %v3198_v21 = vadd.f32 %v1430_v50, %v1343_v33  ;;  %v2550_v51 = vpop.f32.mrf.mxu1 }
 0x52f   : > { %v2543_v52 = vpop.f32.mrf.mxu0 }
 0x530   : > { %v1535_v53 = vsel %vm1150_vm2, %v3198_v21, -inf }
 0x531   : > { %1536 = vmax.xlane.f32.xlu0 %v1535_v53  ;;  %v1433_v57 = vpop.f32.mrf.mxu0 }
 0x533   : > { %v2544_v22 = vpop.f32.mrf.mxu0 }
 0x535   : > { %v1522_v59 = vpop.f32.mrf.mxu0 }
 0x536   : > { %v3204_v60 = vadd.f32 %v1522_v59, %v1343_v33 }
 0x537   : > { %v2555_v29 = vpop.f32.mrf.mxu0 }
 0x538   : > { %v1541_v61 = vsel %vm1150_vm2, %v3204_v60, -inf }
 0x539   : > { %1542 = vmax.xlane.f32.xlu0 %v1541_v61  ;;  %v1525_v62 = vpop.f32.mrf.mxu0 }
 0x53b   : > { %v2556_v63 = vpop.f32.mrf.mxu0 }
 0x53e   : > { %858 = vrot.lane.b32.xlu1 %v3015_v32, %s2808_s24 }
 0x542   : > { %862 = vrot.lane.b32.xlu1 %v3032_v37, %s2808_s24 }
 0x546   : > { %864 = vrot.lane.b32.xlu1 %v3035_v38, %s2808_s24 }
 0x54f   : > { %860 = vrot.lane.b32.xlu0 %v3029_v36, %s2808_s24  ;;  %v3227_v36 = vld [vmem:[#allocation4 + $0x8] sm:$0xff] }
 0x5b2   : > { %v1534_v1 = vpop.xlane.xlu1 %1533 }
 0x5b3   : > { %v3215_v2 = vmax.f32 %v3212_v0, %v1534_v1 }
 0x5b5   : > { %v1548_v30 = vsub.f32 %v3212_v0, %v3215_v2  ;;  %1845 = vst.msk [vmem:[#allocation4] sm:$0xff] %vm1315_vm4, %v3215_v2  ;;  %1562 = vperm.xlu0 %2671, %v3215_v2  }
 0x5b6   : > { %v1540_v32 = vpop.xlane.xlu1 %1539 }
 0x5b7   : > { %v3225_v37 = vmax.f32 %v3217_v3, %v1540_v32 }
 0x5b9   : > { %v1550_v38 = vsub.f32 %v3217_v3, %v3225_v37  ;;  %1847 = vst.msk [vmem:[#allocation4 + $0x10] sm:$0xff] %vm1315_vm4, %v3225_v37 }
 0x5ba   : > { %v859_v44 = vpop.permute.xlu1 %858  ;;  %v1537_v4 = vpop.xlane.xlu0 %1536 }
 0x5bb   : > { %v3234_v5 = vmax.f32 %v3227_v36, %v1537_v4 }
 0x5bd   : > { %v1549_v6 = vsub.f32 %v3227_v36, %v3234_v5  ;;  %1846 = vst.msk [vmem:[#allocation4 + $0x8] sm:$0xff] %vm1315_vm4, %v3234_v5  ;;  %1567 = vperm.xlu1 %2672, %v3234_v5  }
 0x5be   : > { %v863_v7 = vpop.permute.xlu1 %862 }
 0x5bf   : > { %v870_v11 = vcombine.low %v859_v44, %v863_v7  ;;  %v871_v12 = vcombine.high %v859_v44, %v863_v7 }
 0x5c1   : > { %1572 = vperm.xlu1 %2672, %v3225_v37   ;;  %v878_v20 = vrot.slane %v870_v11, %v3043_v46  ;;  %v885_v23 = vrot.slane %v871_v12, %v3043_v46 }
 0x5c2   : > { %v1543_v9 = vpop.xlane.xlu0 %1542  ;;  %v865_v17 = vpop.permute.xlu1 %864 }
 0x5c3   : > { %v3245_v10 = vmax.f32 %v3241_v55, %v1543_v9 }
 0x5c5   : > { %v1551_v15 = vsub.f32 %v3241_v55, %v3245_v10  ;;  %1848 = vst.msk [vmem:[#allocation4 + $0x18] sm:$0xff] %vm1315_vm4, %v3245_v10  ;;  %1577 = vperm.xlu0 %2671, %v3245_v10   ;;  %v1594_v10 = vld [vmem:[#allocation5 + $0x10] sm:$0xff] }
 0x5c6   : > { %v861_v43 = vpop.permute.xlu0 %860 }
 0x5c7   : > { %v886_v18 = vcombine.low %v861_v43, %v865_v17  ;;  %v887_v19 = vcombine.high %v861_v43, %v865_v17  ;;  %v1558_v36 = vmul.f32 1.442695, %v1551_v15 }
 0x5c9   : > { %v894_v24 = vrot.slane %v886_v18, %v3043_v46  ;;  %v901_v25 = vrot.slane %v887_v19, %v3043_v46 }
 0x5cb   : > { %v902_v54 = vcombine.low %v878_v20, %v894_v24  ;;  %v903_v26 = vcombine.high %v878_v20, %v894_v24  ;;  %v918_v27 = vcombine.low %v885_v23, %v901_v25  ;;  %v919_v28 = vcombine.high %v885_v23, %v901_v25 }
 0x5cd   : > { %v910_v31 = vrot.slane %v902_v54, %v3054_v56  ;;  %v917_v33 = vrot.slane %v903_v26, %v3054_v56  ;;  %v926_v34 = vrot.slane %v918_v27, %v3054_v56  ;;  %v933_v39 = vrot.slane %v919_v28, %v3054_v56 }
 0x5cf   : > { %v934_v40 = vcombine.high %v910_v31, %v2797_v8  ;;  %v935_v41 = vcombine.high %v917_v33, %v2797_v8  ;;  %v936_v45 = vcombine.high %v926_v34, %v2797_v8  ;;  %v937_v47 = vcombine.high %v933_v39, %v2797_v8 }
 0x5d0   : > { %v2450_v48 = vpack.c.bf16 %v926_v34, %v910_v31  ;;  %v2451_v13 = vpack.c.bf16 %v933_v39, %v917_v33 }
 0x5d1   : > { %v2452_v49 = vpack.c.bf16 %v936_v45, %v934_v40  ;;  %v2453_v50 = vpack.c.bf16 %v937_v47, %v935_v41 }
 0x5d2   : > { %v1089_v51 = vrot.slane %v2450_v48, %v3043_v46  ;;  %v1097_v52 = vrot.slane %v2451_v13, %v3043_v46 }
 0x5d3   : > { %v1114_v53 = vrot.slane %v2452_v49, %v3043_v46  ;;  %v1122_v57 = vrot.slane %v2453_v50, %v3043_v46 }
 0x5d4   : > { %v1098_v22 = vcombine.low %v1089_v51, %v1097_v52  ;;  %v1554_v52 = vmul.f32 1.442695, %v1549_v6  ;;  %v1592_v6 = vld [vmem:[#allocation5] sm:$0xff] }
 0x5d5   : > { %v1123_v59 = vcombine.low %v1114_v53, %v1122_v57 }
 0x5d6   : > { %v1105_v29 = vrot.slane %v1098_v22, %v3054_v56  ;;  %v1552_v22 = vmul.f32 1.442695, %v1548_v30 }
 0x5d7   : > { %v1130_v61 = vrot.slane %v1123_v59, %v3054_v56  ;;  %v1556_v59 = vmul.f32 1.442695, %v1550_v38  ;;  %v1593_v38 = vld [vmem:[#allocation5 + $0x8] sm:$0xff] }
 0x5d8   : > { %v1106_v62 = vcombine.high %v1105_v29, %v2807_v58  ;;  %v1136_v32 = vshrl.u32 %v1105_v29, 16 }
 0x5d9   : > { %v1131_v63 = vcombine.high %v1130_v61, %v2807_v58  ;;  %v1134_v1 = vpack.i.b16 %v1130_v61, %v1105_v29  ;;  %v1137_v44 = vshrl.u32 %v1130_v61, 16 }
 0x5da   : > { %v1144_v9 = vshrl.u32 %v1106_v62, 16 }
 0x5db   : > { %v1138_v4 = vpack.i.b16 %v1137_v44, %v1136_v32  ;;  %v1142_v7 = vpack.i.b16 %v1131_v63, %v1106_v62  ;;  %v1145_v11 = vshrl.u32 %v1131_v63, 16  ;;  %1311 = vst.msk [vmem:[#allocation3] sm:$0xf] %vm1306_vm3, %v1134_v1  ;;  %v1595_v32 = vld [vmem:[#allocation5 + $0x18] sm:$0xff] }
 0x5dd   : > { %v1146_v12 = vpack.i.b16 %v1145_v11, %v1144_v9  ;;  %1312 = vst.msk [vmem:[#allocation3 + $0x4] sm:$0xf] %vm1306_vm3, %v1138_v4  ;;  %1313 = vst.msk [vmem:[#allocation3 + $0x8] sm:$0xf] %vm1306_vm3, %v1142_v7 }
 0x5df   : > { %1314 = vst.msk [vmem:[#allocation3 + $0xc] sm:$0xf] %vm1306_vm3, %v1146_v12 }
 0x5e2   : > { %v1336_v17 = vld [vmem:[#allocation3] sm:$0xf] }
 0x5e3   : > { %v1657_v58 = vsel %vm1655_vm6, %v1336_v17, 0 }
 0x5e4   : > { %2558 = vmatpush3.bf16.msra.mxu1 %v1657_v58  ;;  %v1337_v43 = vld [vmem:[#allocation3 + $0x4] sm:$0xf]  ;;  %v1338_v39 = vld [vmem:[#allocation3 + $0x8] sm:$0xf] }
 0x5e5   : > { %v1703_v18 = vsel %vm1655_vm6, %v1337_v43, 0  ;;  %2569 = vmatprep.subr.bf16.mxu1 %v2797_v8 }
 0x5e6   : > { %2564 = vmatpush3.bf16.msra.mxu0 %v1703_v18 }
 0x5e7   : > { %2575 = vmatprep.subr.bf16.mxu0 %v2797_v8 }
 0x630   : > { %v1563_v19 = vpop.permute.xlu0 %1562 }
 0x631   : > { %v1580_v20 = vsub.f32 %v3190_v35, %v1563_v19 }
 0x633   : > { %v1584_v23 = vmul.f32 1.442695, %v1580_v20  ;;  %v1620_v20 = vld [vmem:[#allocation6] sm:$0xff] }
 0x635   : > { %2705 = vpow2.f32 %v1584_v23 }
 0x638   : > { %v1568_v24 = vpop.permute.xlu1 %1567 }
 0x639   : > { %v1581_v25 = vsub.f32 %v3198_v21, %v1568_v24  ;;  %v1749_v21 = vsel %vm1655_vm6, %v1338_v39, 0  ;;  %v1622_v39 = vld [vmem:[#allocation6 + $0x10] sm:$0xff] }
 0x63b   : > { %v1586_v54 = vmul.f32 1.442695, %v1581_v25 }
 0x63c   : > { %v1573_v26 = vpop.permute.xlu1 %1572 }
 0x63d   : > { %2707 = vpow2.f32 %v1586_v54  ;;  %v1582_v27 = vsub.f32 %v3194_v42, %v1573_v26 }
 0x63f   : > { %v1588_v28 = vmul.f32 1.442695, %v1582_v27 }
 0x640   : > { %v1578_v31 = vpop.permute.xlu0 %1577 }
 0x641   : > { %2709 = vpow2.f32 %v1588_v28  ;;  %v1583_v33 = vsub.f32 %v3204_v60, %v1578_v31  ;;  %v1339_v60 = vld [vmem:[#allocation3 + $0xc] sm:$0xf]  ;;  %v1621_v28 = vld [vmem:[#allocation6 + $0x8] sm:$0xff] }
 0x642   : > { %v2706_v34 = vpop.eup %2705  ;;  %v1795_v48 = vsel %vm1655_vm6, %v1339_v60, 0 }
 0x643   : > { %v1590_v40 = vmul.f32 1.442695, %v1583_v33  ;;  %v1600_v35 = vsel %vm1150_vm2, %v2706_v34, 0.0  ;;  %v1648_v41 = vpack.c.bf16 %v2706_v34, %v2706_v34 }
 0x644   : > { %1601 = vadd.xlane.f32.xlu1 %v1600_v35 }
 0x645   : > { %2711 = vpow2.f32 %v1590_v40  ;;  %2560 = vmatmul.mubr.msk.bf16.vlgmr.msra.gmra.mxu1 %vm1150_vm2, %v1648_v41 }
 0x646   : > { %2570 = vmatpush3.bf16.msra.mxu1 %v1749_v21  ;;  %2571 = vmatprep.mubr.msk.bf16.mxu1 %vm2798_vm1, %v2797_v8  ;;  %2713 = vpow2.f32 %v1554_v52 }
 0x647   : > { %2581 = vmatprep.subr.bf16.mxu1 %v2797_v8  ;;  %2715 = vpow2.f32 %v1552_v22 }
 0x648   : > { %2717 = vpow2.f32 %v1556_v59 }
 0x649   : > { %2719 = vpow2.f32 %v1558_v36 }
 0x64a   : > { %v2708_v42 = vpop.eup %2707 }
 0x64b   : > { %v1603_v45 = vsel %vm1150_vm2, %v2708_v42, 0.0  ;;  %v1649_v47 = vpack.c.bf16 %v2708_v42, %v2708_v42 }
 0x64c   : > { %1604 = vadd.xlane.f32.xlu0 %v1603_v45  ;;  %v1623_v45 = vld [vmem:[#allocation6 + $0x18] sm:$0xff] }
 0x64d   : > { %2566 = vmatmul.mubr.msk.bf16.vlgmr.msra.gmra.mxu0 %vm1150_vm2, %v1649_v47 }
 0x64e   : > { %v2710_v13 = vpop.eup %2709  ;;  %2576 = vmatpush3.bf16.msra.mxu0 %v1795_v48  ;;  %2577 = vmatprep.mubr.msk.bf16.mxu0 %vm2798_vm1, %v2797_v8 }
 0x64f   : > { %v1606_v49 = vsel %vm1150_vm2, %v2710_v13, 0.0  ;;  %v1650_v50 = vpack.c.bf16 %v2710_v13, %v2710_v13  ;;  %2589 = vmatprep.subr.bf16.mxu0 %v2797_v8 }
 0x650   : > { %1607 = vadd.xlane.f32.xlu0 %v1606_v49 }
 0x651   : > { %2572 = vmatmul.mubr.msk.bf16.vlgmr.msra.gmra.mxu1 %vm1150_vm2, %v1650_v50 }
 0x652   : > { %v2712_v51 = vpop.eup %2711  ;;  %2585 = vmatprep.mubr.msk.bf16.mxu1 %vm2798_vm1, %v2797_v8 }
 0x653   : > { %v1609_v53 = vsel %vm1150_vm2, %v2712_v51, 0.0  ;;  %v1651_v57 = vpack.c.bf16 %v2712_v51, %v2712_v51  ;;  %v2714_v0 = vpop.eup %2713 }
 0x654   : > { %1610 = vadd.xlane.f32.xlu1 %v1609_v53  ;;  %v2716_v2 = vpop.eup %2715  ;;  %v1597_v61 = vmul.f32 %v2714_v0, %v1593_v38 }
 0x655   : > { %2578 = vmatmul.mubr.msk.bf16.vlgmr.msra.gmra.mxu0 %vm1150_vm2, %v1651_v57  ;;  %v2718_v30 = vpop.eup %2717  ;;  %v1596_v29 = vmul.f32 %v2716_v2, %v1592_v6 }
 0x656   : > { %2593 = vmatprep.mubr.msk.bf16.mxu0 %vm2798_vm1, %v2797_v8  ;;  %v2720_v5 = vpop.eup %2719  ;;  %v1598_v63 = vmul.f32 %v2718_v30, %v1594_v10 }
 0x657   : > { %v1599_v4 = vmul.f32 %v2720_v5, %v1595_v32 }
 0x665   : > { %1631 = vperm.xlu1 %2672, %v2714_v0  }
 0x666   : > { %1626 = vperm.xlu0 %2671, %v2716_v2  }
 0x669   : > { %1636 = vperm.xlu1 %2672, %v2718_v30  }
 0x66a   : > { %1641 = vperm.xlu0 %2671, %v2720_v5  }
 0x6cd   : > { %v1602_v3 = vpop.xlane.xlu1 %1601 }
 0x6ce   : > { %v1612_v37 = vadd.f32 %v1602_v3, %v1596_v29 }
 0x6d0   : > { %1616 = vst.msk [vmem:[#allocation5] sm:$0xff] %vm1315_vm4, %v1612_v37 }
 0x6d5   : > { %v1605_v55 = vpop.xlane.xlu0 %1604 }
 0x6d6   : > { %v1613_v15 = vadd.f32 %v1605_v55, %v1597_v61 }
 0x6d7   : > { %v1853_v62 = vld [vmem:[#allocation5] sm:$0xff] }
 0x6d8   : > { %1617 = vst.msk [vmem:[#allocation5 + $0x8] sm:$0xff] %vm1315_vm4, %v1613_v15  ;;  %2721 = vrcp.f32 %v1853_v62 }
 0x6d9   : > { %v1608_v1 = vpop.xlane.xlu0 %1607 }
 0x6da   : > { %v1614_v44 = vadd.f32 %v1608_v1, %v1598_v63 }
 0x6dc   : > { %1618 = vst.msk [vmem:[#allocation5 + $0x10] sm:$0xff] %vm1315_vm4, %v1614_v44 }
 0x6dd   : > { %v1611_v7 = vpop.xlane.xlu1 %1610 }
 0x6de   : > { %v1615_v9 = vadd.f32 %v1611_v7, %v1599_v4 }
 0x6df   : > { %v1854_v11 = vld [vmem:[#allocation5 + $0x8] sm:$0xff] }
 0x6e0   : > { %1619 = vst.msk [vmem:[#allocation5 + $0x18] sm:$0xff] %vm1315_vm4, %v1615_v9  ;;  %2723 = vrcp.f32 %v1854_v11 }
 0x6e1   : > { %v1627_v23 = vpop.permute.xlu0 %1626  ;;  %v1632_v26 = vpop.permute.xlu1 %1631 }
 0x6e2   : > { %v1644_v24 = vmul.f32 %v1627_v23, %v1620_v20  ;;  %v1645_v34 = vmul.f32 %v1632_v26, %v1621_v28 }
 0x6e3   : > { %v1855_v12 = vld [vmem:[#allocation5 + $0x10] sm:$0xff] }
 0x6e4   : > { %2725 = vrcp.f32 %v1855_v12 }
 0x6e5   : > { %v2722_v17 = vpop.eup %2721  ;;  %v1637_v40 = vpop.permute.xlu1 %1636 }
 0x6e6   : > { %1863 = vperm.xlu1 %2672, %v2722_v17   ;;  %v1646_v42 = vmul.f32 %v1637_v40, %v1622_v39  ;;  %v1642_v60 = vpop.permute.xlu0 %1641 }
 0x6e7   : > { %v1856_v58 = vld [vmem:[#allocation5 + $0x18] sm:$0xff]  ;;  %v1647_v51 = vmul.f32 %v1642_v60, %v1623_v45 }
 0x6e8   : > { %2727 = vrcp.f32 %v1856_v58 }
 0x6ed   : > { %v2724_v43 = vpop.eup %2723 }
 0x6ee   : > { %1868 = vperm.xlu0 %2671, %v2724_v43   ;;  %v2675_v43 = vld [vmem:[%s3473_s12 + $0x8] sm:$0xff]  }
 0x6ef   : > { %2582 = vmatpush3.bf16.msra.mxu1 %v2675_v43  ;;  %v2147_v43 = vsub.s32 3, %v2995_v14 }
 0x6f0   : > { %2583 = vmatprep.subr.bf16.mxu1 %v2797_v8 }
 0x6f1   : > { %v2726_v18 = vpop.eup %2725 }
 0x6f2   : > { %1873 = vperm.xlu1 %2672, %v2726_v18  }
 0x6f5   : > { %v2728_v19 = vpop.eup %2727 }
 0x6f6   : > { %1878 = vperm.xlu0 %2671, %v2728_v19  }
 0x705   : > { %v1693_v25 = vpop.f32.mrf.mxu1 }
 0x706   : > { %v1837_v54 = vadd.f32 %v1693_v25, %v1644_v24 }
 0x707   : > { %v2561_v27 = vpop.f32.mrf.mxu1 }
 0x708   : > { %1841 = vst.msk [vmem:[#allocation6] sm:$0xff] %vm1150_vm2, %v1837_v54  ;;  %v2676_v27 = vld [vmem:[%s3473_s12] sm:$0xff]  }
 0x709   : > { %v1696_v31 = vpop.f32.mrf.mxu1  ;;  %2584 = vmatpush3.bf16.msra.mxu1 %v2676_v27 }
 0x70a   : > { %2597 = vmatprep.subr.bf16.mxu1 %v2797_v8 }
 0x70b   : > { %v2562_v33 = vpop.f32.mrf.mxu1 }
 0x70d   : > { %v1739_v35 = vpop.f32.mrf.mxu0 }
 0x70e   : > { %v1838_v41 = vadd.f32 %v1739_v35, %v1645_v34 }
 0x70f   : > { %v2567_v21 = vpop.f32.mrf.mxu0  ;;  %v1849_v3 = vld [vmem:[#allocation6] sm:$0xff] }
 0x710   : > { %1842 = vst.msk [vmem:[#allocation6 + $0x8] sm:$0xff] %vm1150_vm2, %v1838_v41 }
 0x711   : > { %v1742_v47 = vpop.f32.mrf.mxu0  ;;  %v1785_v48 = vpop.f32.mrf.mxu1 }
 0x712   : > { %v1839_v13 = vadd.f32 %v1785_v48, %v1646_v42 }
 0x713   : > { %v2568_v49 = vpop.f32.mrf.mxu0  ;;  %v2573_v50 = vpop.f32.mrf.mxu1 }
 0x714   : > { %1843 = vst.msk [vmem:[#allocation6 + $0x10] sm:$0xff] %vm1150_vm2, %v1839_v13 }
 0x715   : > { %v1788_v52 = vpop.f32.mrf.mxu1  ;;  %v1831_v53 = vpop.f32.mrf.mxu0 }
 0x716   : > { %v1840_v57 = vadd.f32 %v1831_v53, %v1647_v51 }
 0x717   : > { %v2574_v22 = vpop.f32.mrf.mxu1  ;;  %v2579_v59 = vpop.f32.mrf.mxu0  ;;  %v1850_v38 = vld [vmem:[#allocation6 + $0x8] sm:$0xff] }
 0x718   : > { %1844 = vst.msk [vmem:[#allocation6 + $0x18] sm:$0xff] %vm1150_vm2, %v1840_v57  ;;  %v2107_v22 = vsub.s32 2, %v2995_v14  ;;  %v2468_v59 = vld [vmem:[%s3474_s13] ss:$0 sm:$0xff] }
 0x719   : > { %v1834_v36 = vpop.f32.mrf.mxu0 }
 0x71a   : > { %v3357_v36 = vld [vmem:[%s2992_s26] sm:$0x3f]  ;;  %s2488_s26 = sshll.u32 %s2929_s0, 7  ;;  %s2739_s0 = sshll.u32 %s2812_s3, 4  ;;  %s2740_s0 = int_to_ptr.vmem [resolvable:$false] %s2739_s0 }
 0x71b   : > { %v2580_v0 = vpop.f32.mrf.mxu0  ;;  %v1851_v5 = vld [vmem:[#allocation6 + $0x10] sm:$0xff] }
 0x71c   : > { %v2108_v0 = vrot.slane %v3357_v36, %v2107_v22  ;;  %v2486_v22 = vld [vmem:[%s3478_s17] ss:$0 sm:$0xff] }
 0x71f   : > { %v1852_v55 = vld [vmem:[#allocation6 + $0x18] sm:$0xff] }
 0x761   : > { %v1864_v2 = vpop.permute.xlu1 %1863 }
 0x762   : > { %v1881_v37 = vmul.f32 %v1864_v2, %v1849_v3  ;;  %v2734_v3 = vld [vmem:[%s2966_s21] sm:$0xff] }
 0x769   : > { %v1869_v30 = vpop.permute.xlu0 %1868 }
 0x76a   : > { %v1882_v10 = vmul.f32 %v1869_v30, %v1850_v38 }
 0x76d   : > { %v1874_v6 = vpop.permute.xlu1 %1873 }
 0x76e   : > { %v1883_v29 = vmul.f32 %v1874_v6, %v1851_v5 }
 0x770   : > { %v1885_v15 = vcombine.low %v1881_v37, %v1883_v29  ;;  %v1886_v62 = vcombine.high %v1881_v37, %v1883_v29 }
 0x771   : > { %v1879_v61 = vpop.permute.xlu0 %1878 }
 0x772   : > { %v1884_v63 = vmul.f32 %v1879_v61, %v1852_v55  ;;  %v1893_v44 = vrot.slane %v1885_v15, %v3043_v46  ;;  %v1900_v4 = vrot.slane %v1886_v62, %v3043_v46 }
 0x774   : > { %v1901_v1 = vcombine.low %v1882_v10, %v1884_v63  ;;  %v1902_v32 = vcombine.high %v1882_v10, %v1884_v63 }
 0x776   : > { %v1909_v7 = vrot.slane %v1901_v1, %v3043_v46  ;;  %v1916_v9 = vrot.slane %v1902_v32, %v3043_v46  ;;  %v2677_v1 = vld [vmem:[%s3475_s14 + $0x8] sm:$0xff]   ;;  %v2678_v32 = vld [vmem:[%s3475_s14] sm:$0xff]  }
 0x777   : > { %2590 = vmatpush3.bf16.msra.mxu0 %v2677_v1 }
 0x778   : > { %v1917_v11 = vcombine.low %v1893_v44, %v1909_v7  ;;  %v1918_v12 = vcombine.high %v1893_v44, %v1909_v7  ;;  %v1933_v17 = vcombine.low %v1900_v4, %v1916_v9  ;;  %v1934_v58 = vcombine.high %v1900_v4, %v1916_v9  ;;  %2591 = vmatprep.subr.bf16.mxu0 %v2797_v8  ;;  %v2679_v44 = vld [vmem:[%s3477_s16 + $0x38] sm:$0xff]   ;;  %v2680_v4 = vld [vmem:[%s3477_s16 + $0x30] sm:$0xff]  }
 0x77a   : > { %v1925_v18 = vrot.slane %v1917_v11, %v3054_v56  ;;  %v1932_v19 = vrot.slane %v1918_v12, %v3054_v56  ;;  %v1941_v20 = vrot.slane %v1933_v17, %v3054_v56  ;;  %v1948_v23 = vrot.slane %v1934_v58, %v3054_v56  ;;  %v2472_v58 = vld [vmem:[%s3499_s4] ss:$0 sm:$0xff] }
 0x77b   : > { %2592 = vmatpush3.bf16.msra.mxu0 %v2678_v32  ;;  %v2142_v12 = vsub.s32 4, %v2995_v14 }
 0x77c   : > { %v1953_v24 = vcombine.low %v1925_v18, %v1932_v19  ;;  %v2466_v25 = vcombine.high %v1925_v18, %v1932_v19  ;;  %v1969_v54 = vcombine.low %v1941_v20, %v1948_v23  ;;  %v2467_v26 = vcombine.high %v1941_v20, %v1948_v23  ;;  %v2473_v19 = vld [vmem:[%s3466_s5] ss:$0 sm:$0xff] }
 0x77d   : > { %v2143_v20 = vrot.slane %v2998_v16, %v2142_v12  ;;  %v2682_v16 = vld [vmem:[%s3477_s16 + $0x20] sm:$0xff]  }
 0x77e   : > { %v1960_v28 = vrot.slane %v1953_v24, %v3043_v46  ;;  %v1968_v31 = vrot.slane %v2466_v25, %v3043_v46  ;;  %v1976_v33 = vrot.slane %v1969_v54, %v3043_v46  ;;  %v1984_v34 = vrot.slane %v2467_v26, %v3043_v46 }
 0x77f   : > { %v2148_v24 = vrot.slane %v3357_v36, %v2147_v43 }
 0x780   : > { %v1986_v39 = vcombine.high %v1960_v28, %v1968_v31  ;;  %v2002_v40 = vcombine.high %v1976_v33, %v1984_v34  ;;  %v1985_v35 = vcombine.low %v1960_v28, %v1968_v31  ;;  %v2001_v41 = vcombine.low %v1976_v33, %v1984_v34  ;;  %v2681_v28 = vld [vmem:[%s3477_s16 + $0x28] sm:$0xff]   ;;  %v2683_v31 = vld [vmem:[%s3477_s16 + $0x18] sm:$0xff]   ;;  %v2684_v33 = vld [vmem:[%s3477_s16 + $0x10] sm:$0xff]  }
 0x781   : > { %v2685_v34 = vld [vmem:[%s3477_s16 + $0x8] sm:$0xff]  }
 0x782   : > { %v2000_v21 = vrot.slane %v1986_v39, %v3054_v56  ;;  %v2016_v42 = vrot.slane %v2002_v40, %v3054_v56  ;;  %v1993_v60 = vrot.slane %v1985_v35, %v3054_v56  ;;  %v2009_v45 = vrot.slane %v2001_v41, %v3054_v56  ;;  %v2686_v39 = vld [vmem:[%s3477_s16] sm:$0xff]  }
 0x783   : > { %v2474_v40 = vld [vmem:[%s3476_s15] ss:$0 sm:$0xff] }
 0x784   : > { %v2019_v47 = vcombine.low %v2000_v21, %v2016_v42  ;;  %v2018_v48 = vcombine.high %v1993_v60, %v2009_v45  ;;  %v2017_v13 = vcombine.low %v1993_v60, %v2009_v45  ;;  %v2020_v46 = vcombine.high %v2000_v21, %v2016_v42 }
 0x786   : > { %2026 = vrot.lane.b32.xlu0 %v2019_v47, %s2809_s22  ;;  %2022 = vrot.lane.b32.xlu1 %v2018_v48, %s2810_s20  ;;  %s577_s20 = sand.u32 1, %s2787_s28   ;;  %s2360_s22 = scalar_lea.hbm %s3479_s18, %s2488_s26 }
 0x787   : > { %s2349_s24 = scalar_lea.sflag [#allocation9], %s577_s20 }
 0x78a   : > { %2030 = vrot.lane.b32.xlu1 %v2020_v46, %s2811_s19  ;;  %s2437_s19 = sshll.u32 %s577_s20, 3 }
 0x78b   : > { %s579_s6 = scalar_lea.vmem [#allocation8], %s2437_s19  ;;  %s2741_s19 = scalar_lea.vmem %s2740_s0, 256 }
 0x78c   : > { %s2362_s21 = sshll.u32 %s579_s6, 4  ;;  %s2363_s21 = int_to_ptr.vmem [resolvable:$true] %s2362_s21 }
 0x78d   : > { %s2735_s25 = scalar_lea.vmem %s2363_s21, 128  ;;  %p2742_p0 = scmp.lt.s32.totalorder %s2363_s21, %s2740_s0 }
 0x78e   : > { %p2736_p11 = scmp.ne.s32.totalorder %s2363_s21, %s2735_s25  ;;  %p2743_p1 = scmp.lt.s32.totalorder %s2741_s19, %s2735_s25 }
 0x790   : > { %p2737_p12 = pnand %p2736_p11, %p2946_p5  ;;  %p2744_p2 = por %p2743_p1, %p2742_p0 }
 0x792   : > { %p2738_p13 = pneg %p2737_p12 }
 0x794   : > { %p2745_p3 = pnand %p2744_p2, %p2738_p13 }
 0x7f8   : > { %v2023_v49 = vpop.permute.xlu1 %2022  ;;  %v2027_v50 = vpop.permute.xlu0 %2026 }
 0x7f9   : > { %v2033_v51 = vsel %vm1150_vm2, %v2017_v13, %v2023_v49  ;;  %v2241_v49 = vld [vmem:[#allocation7] sm:$0xff] }
 0x7fa   : > { %v2035_v56 = vsel %vm2034_vm7, %v2033_v51, %v2027_v50 }
 0x7fc   : > { %v2031_v52 = vpop.permute.xlu1 %2030 }
 0x7fd   : > { %v2037_v53 = vsel %vm2036_vm8, %v2035_v56, %v2031_v52 }
 0x7fe   : > { %v2038_v57 = vpack.c.bf16 %v2037_v53, %v2037_v53  ;;  %v2343_v53 = vsub.s32 5, %v2995_v14 }
 0x800   : > { %2586 = vmatmul.mubr.msk.bf16.vlgmr.msra.gmra.mxu1 %vm593_vm0, %v2038_v57 }
 0x801   : > { %2613 = vmatprep.mubr.msk.bf16.mxu1 %vm2798_vm1, %v2797_v8  ;;  %2598 = vmatpush3.bf16.msra.mxu1 %v2679_v44 }
 0x802   : > { %2599 = vmatprep.subr.bf16.mxu1 %v2797_v8 }
 0x805   : > { %2600 = vmatpush3.bf16.msra.mxu1 %v2680_v4 }
 0x806   : > { %2601 = vmatprep.subr.bf16.mxu1 %v2797_v8 }
 0x809   : > { %2602 = vmatpush3.bf16.msra.mxu1 %v2681_v28 }
 0x80a   : > { %2603 = vmatprep.subr.bf16.mxu1 %v2797_v8 }
 0x80d   : > { %2604 = vmatpush3.bf16.msra.mxu1 %v2682_v16 }
 0x80e   : > { %2605 = vmatprep.subr.bf16.mxu1 %v2797_v8 }
 0x811   : > { %2606 = vmatpush3.bf16.msra.mxu1 %v2683_v31 }
 0x812   : > { %2607 = vmatprep.subr.bf16.mxu1 %v2797_v8 }
 0x815   : > { %2608 = vmatpush3.bf16.msra.mxu1 %v2684_v33 }
 0x816   : > { %2609 = vmatprep.subr.bf16.mxu1 %v2797_v8 }
 0x819   : > { %2610 = vmatpush3.bf16.msra.mxu1 %v2685_v34 }
 0x81a   : > { %2611 = vmatprep.subr.bf16.mxu1 %v2797_v8 }
 0x81d   : > { %2612 = vmatpush3.bf16.msra.mxu1 %v2686_v39 }
 0x8c0   : > { %v2099_v2 = vpop.f32.mrf.mxu1 }
 0x8c1   : > { %v2100_v30 = vadd.f32 %v2468_v59, %v2099_v2  ;;  %v2344_v59 = vrot.slane %v3357_v36, %v2343_v53 }
 0x8c2   : > { %v2587_v5 = vpop.f32.mrf.mxu1 }
 0x8c3   : > { %v2109_v6 = vmul.f32 %v2108_v0, %v2100_v30 }
 0x8c4   : > { %v2102_v29 = vpop.f32.mrf.mxu1 }
 0x8c5   : > { %v3361_v37 = vadd.f32 %v2734_v3, %v2109_v6 }
 0x8c6   : > { %v2588_v38 = vpop.f32.mrf.mxu1 }
 0x8c7   : > { %v2113_v61 = vsel %vm593_vm0, %v3361_v37, 0.0 }
 0x8c8   : > { %2114 = vadd.xlane.f32.xlu0 %v2113_v61 }
 0x951   : > { %v2115_v55 = vpop.xlane.xlu0 %2114 }
 0x952   : > { %v2116_v10 = vmul.f32 0.03125, %v2115_v55 }
 0x954   : > { %v2117_v15 = vsub.f32 %v3361_v37, %v2116_v10 }
 0x956   : > { %v2118_v62 = vmul.f32 %v2117_v15, %v2117_v15 }
 0x958   : > { %v2119_v63 = vsel %vm593_vm0, %v2118_v62, 0.0 }
 0x959   : > { %2120 = vadd.xlane.f32.xlu1 %v2119_v63 }
 0x9e2   : > { %v2121_v7 = vpop.xlane.xlu1 %2120 }
 0x9e3   : > { %v2122_v9 = vmul.f32 0.03125, %v2121_v7 }
 0x9e5   : > { %v2123_v11 = vadd.f32 1e-05, %v2122_v9 }
 0x9e7   : > { %2729 = vrsqrt.f32 %v2123_v11 }
 0x9f4   : > { %v2730_v17 = vpop.eup %2729 }
 0x9f5   : > { %v2125_v18 = vmul.f32 %v2730_v17, %v2117_v15 }
 0x9f7   : > { %v2132_v23 = vmul.f32 %v2472_v58, %v2125_v18 }
 0x9f9   : > { %v2139_v25 = vadd.f32 %v2473_v19, %v2132_v23 }
 0x9fb   : > { %v2144_v54 = vmul.f32 %v2143_v20, %v2139_v25 }
 0x9fd   : > { %v2149_v26 = vadd.f32 %v2148_v24, %v2144_v54 }
 0x9ff   : > { %v2150_v27 = vpack.c.bf16 %v2149_v26, %v2149_v26 }
 0xa01   : > { %2594 = vmatmul.mubr.msk.bf16.vlgmr.msra.gmra.mxu0 %vm593_vm0, %v2150_v27 }
 0xac1   : > { %v2212_v35 = vpop.f32.mrf.mxu0 }
 0xac2   : > { %v2213_v41 = vadd.f32 %v2474_v40, %v2212_v35 }
 0xac3   : > { %v2595_v21 = vpop.f32.mrf.mxu0 }
 0xac4   : > { %v2220_v42 = vmul.f32 0.70710677, %v2213_v41  ;;  %v2218_v48 = vmul.f32 0.5, %v2213_v41 }
 0xac5   : > { %v2215_v60 = vpop.f32.mrf.mxu0 }
 0xac6   : > { %2731 = verf.f32 %v2220_v42 }
 0xac7   : > { %v2596_v45 = vpop.f32.mrf.mxu0 }
 0xad3   : > { %v2732_v47 = vpop.eup %2731 }
 0xad4   : > { %v2222_v8 = vadd.f32 1.0, %v2732_v47 }
 0xad6   : > { %v2223_v13 = vmul.f32 %v2222_v8, %v2218_v48 }
 0xad8   : > { %v2224_v46 = vpack.c.bf16 %v2223_v13, %v2223_v13 }
 0xada   : > { %2614 = vmatmul.mubr.bf16.vlgmr.msra.gmra.mxu1 %v2224_v46 }
 0xb9a   : > { %v2324_v50 = vpop.f32.mrf.mxu1 }
 0xb9b   : > { %v2330_v51 = vadd.f32 %v2324_v50, %v2241_v49 }
 0xb9c   : > { %v2615_v52 = vpop.f32.mrf.mxu1 }
 0xb9d   : > { %2331 = vst.msk [vmem:[#allocation7] sm:$0xff] %vm593_vm0, %v2330_v51 }
 0xb9e   : > { %v2327_v56 = vpop.f32.mrf.mxu1 }
 0xba0   : > { %v2616_v57 = vpop.f32.mrf.mxu1 }
 0xba4   : > { %v2332_v0 = vld [vmem:[#allocation7] sm:$0xff] }
 0xba5   : > { %v2340_v2 = vadd.f32 %v2486_v22, %v2332_v0 }
 0xba7   : > { %v2345_v30 = vmul.f32 %v2344_v59, %v2340_v2 }
 0xba9   : > { %v2346_v5 = vadd.f32 %v2345_v30, %v3361_v37 }
 0xbab   : > { %2347 = vst.msk [vmem:[%s579_s6] sm:$0xff] %vm593_vm0, %v2346_v5 }
 0xbac   : > { %2748 = shalt.err (!%p2745_p3)
}
 0xbad   : > { %s2749_s1 = scalar_lea.hbm %s2360_s22, 128  ;;  %s2753_s6 = scalar_lea.hbm %s3479_s18, 256 }
 0xbae   : > { %p2750_p4 = scmp.ne.s32.totalorder %s2360_s22, %s2749_s1  ;;  %p2754_p9 = scmp.lt.s32.totalorder %s2360_s22, %s3479_s18 }
 0xbaf   : > { %p2755_p10 = scmp.lt.s32.totalorder %s2753_s6, %s2749_s1 }
 0xbb0   : > { %p2751_p7 = pnand %p2750_p4, %p2946_p5 }
 0xbb1   : > { %p2756_p11 = por %p2755_p10, %p2754_p9 }
 0xbb2   : > { %p2752_p8 = pneg %p2751_p7 }
 0xbb4   : > { %p2757_p12 = pnand %p2756_p11, %p2752_p8 }
 0xbb6   : > { %2760 = shalt.err (!%p2757_p12)
}
 0xbb7   : > { %2617 = dma.vmem_to_hbm [thread:$0]  (%p2946_p5), %s2363_s21, 128, %s2360_s22, %s2349_s24  }
 0xbb8 PF: > { %p2623_p13 = scmp.ge.s32.totalorder %s2795_s30, 2  ;;  %s2374_s3 = sand.u32 1, %s2783_s27  }
 0xbb9   : > { %s2375_s25 = scalar_lea.sflag [#allocation9], %s2374_s3 }
 0xbba   : > { %p2620_p0 = pnand %p2623_p13, %p2950_p6 }
 0xbbc   : > { %p2621_p1 = pneg %p2620_p0 }
 0xbbe   : > { %2778 = dma.done.wait (%p2621_p1), %s2375_s25, 128  }
 0xbbf   : > { %2780 = vsyncadd (%p2621_p1), %s2375_s25, 4294967168  ;;  %s3500_s30 = sld [smem:[#allocation12_spill]]  ;;  %s3503_s27 = smov %s2787_s28 }
 0xbc0   : > { %s3501_s4 = sld [smem:[#allocation11_spill]] }
 0xbc1   : > { %s3502_s29 = sld [smem:[#allocation13_spill]] }
 0xbc5   : > { %p28_p2 = scmp.ge.s32.totalorder %s3500_s30, 4  }
 0xbc6   : > { %s3504_s28 = smov %s3501_s4 }
 0xbc7   :  { %30 = sbr.rel (!%p28_p2) target bundleno = 10 (0xa), region = 130 }
 0xbcc   :  { %2380 = vsyncpa [#allocation9], 1 }
 0xbcd   :  { %2382 = vsyncpa [#allocation9 + $0x1], 1 }

</bundles_post_ra>
